<compile_context>
chip_gen: v7x
topology: tpu7x:2x2x1
jax: 0.10.0
libtpu: 0.0.40
codegen_flags: <defaults>
</compile_context>

<pallas_src>
import math
import functools
import numpy as np

import jax
import jax.numpy as jnp
from jax.experimental import pallas as pl
from jax.experimental.pallas import tpu as pltpu

H = 14
W = 14
P = H * W           # 196, hard-coded by the module
PP = 256            # lane-padded spatial (lane-dense stores)
EPS = 1e-5          # nn.LayerNorm default eps


# ---------- small in-kernel helpers (2-step reductions keep Mosaic happy) ----
def _sum_all(x):
    return jnp.sum(jnp.sum(x, axis=1, keepdims=True), axis=0, keepdims=True)


def _max_all(x):
    return jnp.max(jnp.max(x, axis=1, keepdims=True), axis=0, keepdims=True)


# ------------------------------ the kernel -----------------------------------
def transformer_kernel(multi_head, outplanes, inplanes, tb,
                       x1_ref, x2_ref,
                       lane_mask_ref, tap_mask_ref,
                       ln11w_ref, ln11b_ref,
                       ln21w_ref, ln21b_ref, ln22w_ref, ln22b_ref,
                       wqkv_ref, wz1_ref, wff_ref, ffb_ref,
                       o1_ref, o2_ref):
    C = inplanes
    O = outplanes
    M = multi_head

    lane_mask = lane_mask_ref[...]                    # (1, PP) 1.0 on real lanes
    tap_masks = [tap_mask_ref[k] for k in range(9)]   # each (1, PP)
    shifts = [W * (dy - 1) + (dx - 1) for dy in range(3) for dx in range(3)]

    ln11w, ln11b = ln11w_ref[...], ln11b_ref[...]
    ln21w, ln21b = ln21w_ref[...], ln21b_ref[...]
    ln22w, ln22b = ln22w_ref[...], ln22b_ref[...]
    wqkv = wqkv_ref[...]                              # (6*M*O, C)
    wz1 = wz1_ref[...]                                # (C, M*O)
    wff = wff_ref[...]                                # (2*C, 18*C) block-diag
    ffb = ffb_ref[...]                                # (2*C, 1)

    inv_n = 1.0 / float(C * P)                        # LN normalizes over C*196
    scale = 1.0 / math.sqrt(O)

    def layernorm(x, w, b):
        # LayerNorm over the full (C, 14, 14) slab; padded lanes of x are 0.
        mu = _sum_all(x) * inv_n
        d = (x - mu) * lane_mask                      # zero out padded lanes
        var = _sum_all(d * d) * inv_n
        inv = jax.lax.rsqrt(var + EPS)
        return d * (inv * w) + b                      # w,b zero-padded -> pad lanes 0

    def softmax_pair(s_a, s_b):
        # softmax over the concatenation of two (1, P) score maps (2*196 elems)
        m = jnp.maximum(_max_all(s_a), _max_all(s_b))
        e_a = jnp.exp(s_a - m) * lane_mask
        e_b = jnp.exp(s_b - m) * lane_mask
        inv = pl.reciprocal(_sum_all(e_a) + _sum_all(e_b), approx=True)
        return e_a * inv, e_b * inv

    for t in range(tb):
        x1 = x1_ref[t]                                # (C, PP)
        x2 = x2_ref[t]

        # ---- LN1 (LN1_2(x2) is computed but unused by the module: skipped) ----
        z1 = layernorm(x1, ln11w, ln11b)

        # ---- all per-head Q/K/V projections in ONE matmul ----
        qkv = jnp.dot(wqkv, z1, preferred_element_type=jnp.float32)  # (6*M*O, PP)

        z_heads = []
        for h in range(M):
            base = h * 6 * O
            q1 = qkv[base + 0 * O: base + 1 * O]
            k1 = qkv[base + 1 * O: base + 2 * O]
            v1 = qkv[base + 2 * O: base + 3 * O]
            q2 = qkv[base + 3 * O: base + 4 * O]
            k2 = qkv[base + 4 * O: base + 5 * O]
            v2 = qkv[base + 5 * O: base + 6 * O]

            s11 = jnp.sum(q1 * k1, axis=0, keepdims=True) * scale    # (1, PP)
            s12 = jnp.sum(q1 * k2, axis=0, keepdims=True) * scale
            s21 = jnp.sum(q2 * k1, axis=0, keepdims=True) * scale
            s22 = jnp.sum(q2 * k2, axis=0, keepdims=True) * scale

            a11, a12 = softmax_pair(s11, s12)
            a21, a22 = softmax_pair(s21, s22)

            z1_h = a11 * v1 + a12 * v2                               # (O, PP)
            z2_h = a21 * v1 + a22 * v2
            # stack the two branches on lanes (256-aligned) -> one makeZ1 matmul
            z_heads.append(jnp.concatenate([z1_h, z2_h], axis=1))    # (O, 2*PP)

        zcat = z_heads[0] if M == 1 else jnp.concatenate(z_heads, axis=0)
        # makeZ1 applied to BOTH branches (exactly as in the PyTorch module)
        zr = jnp.dot(wz1, zcat, preferred_element_type=jnp.float32)  # (C, 2*PP)
        z1r = zr[:, :PP] + x1
        z2r = zr[:, PP:] + x2

        # ---- LN2 ----
        zn1 = layernorm(z1r, ln21w, ln21b)
        zn2 = layernorm(z2r, ln22w, ln22b)

        # ---- both 3x3 convs as ONE im2col matmul (block-diagonal weight) ----
        taps = []
        for xin in (zn1, zn2):
            for k in range(9):
                s = shifts[k]
                if s == 0:
                    taps.append(xin)                  # center tap: mask is identity
                else:
                    taps.append(jnp.roll(xin, -s, axis=1) * tap_masks[k])
        taps_all = jnp.concatenate(taps, axis=0)      # (18*C, PP)
        o_both = jnp.dot(wff, taps_all,
                         preferred_element_type=jnp.float32) + ffb   # (2*C, PP)

        o1_ref[t] = o_both[:C] + z1r
        o2_ref[t] = o_both[C:] + z2r


# ------------------------------ wrapper ---------------------------------------
def transformer_pallas(x1, x2, params, *, multi_head, outplanes):
    B, C, h, w = x1.shape
    assert (h, w) == (H, W), "module hard-codes 14x14 spatial"
    O, M = outplanes, multi_head

    # activations: (B, C, 196) -> lane-padded (B, C, 256), zeros in padding
    def prep(x):
        xf = x.reshape(B, C, P).astype(jnp.float32)
        return jnp.pad(xf, ((0, 0), (0, 0), (0, PP - P)))

    x1p, x2p = prep(x1), prep(x2)

    def pad_cp(a):  # (C, H, W) LN param -> (C, PP) zero-padded
        return jnp.pad(a.reshape(C, P).astype(jnp.float32), ((0, 0), (0, PP - P)))

    # fused QKV weight: per head, rows [q1; k1; v1; q2; k2; v2], each (O, C)
    wqkv = jnp.stack([params["wq1"], params["wk1"], params["wv1"],
                      params["wq2"], params["wk2"], params["wv2"]],
                     axis=1).reshape(M * 6 * O, C).astype(jnp.float32)

    wz1 = params["wz1"].astype(jnp.float32)           # (C, M*O)

    def ff_w(wf):  # (Cout, Cin, 3, 3) -> (Cout, 9*Cin), column order (kh, kw, cin)
        return wf.transpose(0, 2, 3, 1).reshape(C, 9 * C).astype(jnp.float32)

    wff = jnp.zeros((2 * C, 18 * C), jnp.float32)
    wff = wff.at[:C, :9 * C].set(ff_w(params["ff1_w"]))
    wff = wff.at[C:, 9 * C:].set(ff_w(params["ff2_w"]))
    ffb = jnp.concatenate([params["ff1_b"], params["ff2_b"]]
                          ).reshape(2 * C, 1).astype(jnp.float32)

    # host-precomputed masks (replace in-kernel iota/compare chains)
    lane_mask = jnp.asarray((np.arange(PP) < P).astype(np.float32).reshape(1, PP))
    py, px = np.arange(P) // W, np.arange(P) % W
    tap_mask_np = np.zeros((9, 1, PP), np.float32)
    for dy in range(3):
        for dx in range(3):
            valid = ((py + dy - 1 >= 0) & (py + dy - 1 < H) &
                     (px + dx - 1 >= 0) & (px + dx - 1 < W))
            tap_mask_np[dy * 3 + dx, 0, :P] = valid.astype(np.float32)
    tap_mask = jnp.asarray(tap_mask_np)

    weight_args = [
        lane_mask, tap_mask,
        pad_cp(params["ln1_1_w"]), pad_cp(params["ln1_1_b"]),
        pad_cp(params["ln2_1_w"]), pad_cp(params["ln2_1_b"]),
        pad_cp(params["ln2_2_w"]), pad_cp(params["ln2_2_b"]),
        wqkv, wz1, wff, ffb,
    ]

    # batch tile: largest divisor of B not exceeding 8 (amortize grid overhead)
    TB = 1
    for d in range(min(B, 8), 0, -1):
        if B % d == 0:
            TB = d
            break

    x_spec = pl.BlockSpec((TB, C, PP), lambda b: (b, 0, 0))

    def wspec(a):
        nd = a.ndim
        return pl.BlockSpec(a.shape, lambda b, _n=nd: (0,) * _n)

    kernel = functools.partial(transformer_kernel, M, O, C, TB)

    o1, o2 = pl.pallas_call(
        kernel,
        grid=(B // TB,),
        in_specs=[x_spec, x_spec] + [wspec(a) for a in weight_args],
        out_specs=(x_spec, x_spec),
        out_shape=(jax.ShapeDtypeStruct((B, C, PP), jnp.float32),
                   jax.ShapeDtypeStruct((B, C, PP), jnp.float32)),
        compiler_params=pltpu.CompilerParams(
            dimension_semantics=("parallel",)),
    )(x1p, x2p, *weight_args)

    return (o1[:, :, :P].reshape(B, C, H, W),
            o2[:, :, :P].reshape(B, C, H, W))


# ------------------------- deterministic params --------------------------------
def init_params(key, inplanes, outplanes, multi_head):
    C, O, M = inplanes, outplanes, multi_head
    keys = iter(jax.random.split(key, 32))

    def nrm(shape, scale):
        return jax.random.normal(next(keys), shape, jnp.float32) * scale

    p = {}
    for name in ["ln1_1", "ln1_2", "ln2_1", "ln2_2"]:
        p[name + "_w"] = 1.0 + 0.1 * nrm((C, H, W), 1.0)
        p[name + "_b"] = 0.1 * nrm((C, H, W), 1.0)
    s1 = 1.0 / math.sqrt(C)
    for name in ["wq1", "wk1", "wv1", "wq2", "wk2", "wv2"]:
        p[name] = nrm((M, O, C), s1)                     # per-head 1x1 conv (no bias)
    p["wz1"] = nrm((C, O * M), 1.0 / math.sqrt(O * M))   # makeZ1 weight
    s3 = 1.0 / math.sqrt(C * 9)
    p["ff1_w"] = nrm((C, C, 3, 3), s3)
    p["ff1_b"] = nrm((C,), s3)
    p["ff2_w"] = nrm((C, C, 3, 3), s3)
    p["ff2_b"] = nrm((C,), s3)
    return p


# ---------------------------- pure-JAX reference -------------------------------
def _ln_ref(x, w, b):
    mu = jnp.mean(x, axis=(1, 2, 3), keepdims=True)
    var = jnp.mean((x - mu) ** 2, axis=(1, 2, 3), keepdims=True)
    return (x - mu) / jnp.sqrt(var + EPS) * w[None] + b[None]


def _conv1x1_ref(x, w):
    return jnp.einsum("oc,bchw->bohw", w, x)


def _conv3x3_ref(x, w, b):
    y = jax.lax.conv_general_dilated(x, w, (1, 1), ((1, 1), (1, 1)),
                                     dimension_numbers=("NCHW", "OIHW", "NCHW"))
    return y + b[None, :, None, None]


def _sh_ref(x1, wq1, wk1, wv1, wq2, wk2, wv2, O):
    Q1, K1, V1 = _conv1x1_ref(x1, wq1), _conv1x1_ref(x1, wk1), _conv1x1_ref(x1, wv1)
    Q2, K2, V2 = _conv1x1_ref(x1, wq2), _conv1x1_ref(x1, wk2), _conv1x1_ref(x1, wv2)
    B = x1.shape[0]

    def branch(Q):
        sa = jnp.sum(Q * K1, axis=1) / math.sqrt(O)
        sb = jnp.sum(Q * K2, axis=1) / math.sqrt(O)
        sm = jax.nn.softmax(jnp.concatenate([sa.reshape(B, -1), sb.reshape(B, -1)],
                                            axis=1), axis=1)
        aa = sm[:, :P].reshape(B, 1, H, W)
        ab = sm[:, P:].reshape(B, 1, H, W)
        return aa * V1 + ab * V2

    return branch(Q1), branch(Q2)


def transformer_ref(x1, x2, p, *, multi_head, outplanes):
    z1 = _ln_ref(x1, p["ln1_1_w"], p["ln1_1_b"])
    _ = _ln_ref(x2, p["ln1_2_w"], p["ln1_2_b"])  # computed but unused downstream
    Z1h, Z2h = [], []
    for h in range(multi_head):
        a, b = _sh_ref(z1, p["wq1"][h], p["wk1"][h], p["wv1"][h],
                       p["wq2"][h], p["wk2"][h], p["wv2"][h], outplanes)
        Z1h.append(a)
        Z2h.append(b)
    Z1 = jnp.concatenate(Z1h, axis=1)
    Z2 = jnp.concatenate(Z2h, axis=1)
    z1 = _conv1x1_ref(Z1, p["wz1"]) + x1
    z2 = _conv1x1_ref(Z2, p["wz1"]) + x2   # makeZ1 for both branches
    Zn1 = _ln_ref(z1, p["ln2_1_w"], p["ln2_1_b"])
    Zn2 = _ln_ref(z2, p["ln2_2_w"], p["ln2_2_b"])
    o1 = _conv3x3_ref(Zn1, p["ff1_w"], p["ff1_b"]) + z1
    o2 = _conv3x3_ref(Zn2, p["ff2_w"], p["ff2_b"]) + z2
    return o1, o2


# ----------------------------------- main ---------------------------------------
if __name__ == "__main__":
    inplanes, outplanes, multi_head = 8, 8, 2
    B = 2

    key = jax.random.PRNGKey(0)
    k1, k2, kp = jax.random.split(key, 3)
    x1 = jax.random.normal(k1, (B, inplanes, H, W), jnp.float32)
    x2 = jax.random.normal(k2, (B, inplanes, H, W), jnp.float32)
    params = init_params(kp, inplanes, outplanes, multi_head)

    o1, o2 = transformer_pallas(x1, x2, params,
                                multi_head=multi_head, outplanes=outplanes)
    jax.block_until_ready((o1, o2))

    r1, r2 = transformer_ref(x1, x2, params,
                             multi_head=multi_head, outplanes=outplanes)
    err = max(float(jnp.max(jnp.abs(o1 - r1))), float(jnp.max(jnp.abs(o2 - r2))))
    assert err < 5e-2, f"kernel/reference mismatch, max abs err = {err}"
    print("KERNEL_OK")
</pallas_src>

<mosaic_0001>
module attributes {stable_mosaic.version = 11 : i64} {
  func.func @transformer_kernel(%arg0: i32, %arg1: memref<2x8x256xf32, #tpu.memory_space<vmem>>, %arg2: memref<2x8x256xf32, #tpu.memory_space<vmem>>, %arg3: memref<1x256xf32, #tpu.memory_space<vmem>>, %arg4: memref<9x1x256xf32, #tpu.memory_space<vmem>>, %arg5: memref<8x256xf32, #tpu.memory_space<vmem>>, %arg6: memref<8x256xf32, #tpu.memory_space<vmem>>, %arg7: memref<8x256xf32, #tpu.memory_space<vmem>>, %arg8: memref<8x256xf32, #tpu.memory_space<vmem>>, %arg9: memref<8x256xf32, #tpu.memory_space<vmem>>, %arg10: memref<8x256xf32, #tpu.memory_space<vmem>>, %arg11: memref<96x8xf32, #tpu.memory_space<vmem>>, %arg12: memref<8x16xf32, #tpu.memory_space<vmem>>, %arg13: memref<16x144xf32, #tpu.memory_space<vmem>>, %arg14: memref<16x1xf32, #tpu.memory_space<vmem>>, %arg15: memref<2x8x256xf32, #tpu.memory_space<vmem>>, %arg16: memref<2x8x256xf32, #tpu.memory_space<vmem>>) attributes {dimension_semantics = [#tpu.dimension_semantics<parallel>], iteration_bounds = array<i64: 1>, scalar_prefetch = 0 : i64, scratch_operands = 0 : i64, tpu.core_type = #tpu.core_type<tc>, window_params = [{transform_indices = @transform_0, window_bounds = array<i64: 2, 8, 256>}, {transform_indices = @transform_1, window_bounds = array<i64: 2, 8, 256>}, {pipeline_mode = #tpu.pipeline_mode<synchronous>, transform_indices = @transform_2, window_bounds = array<i64: 1, 256>}, {pipeline_mode = #tpu.pipeline_mode<synchronous>, transform_indices = @transform_3, window_bounds = array<i64: 9, 1, 256>}, {pipeline_mode = #tpu.pipeline_mode<synchronous>, transform_indices = @transform_4, window_bounds = array<i64: 8, 256>}, {pipeline_mode = #tpu.pipeline_mode<synchronous>, transform_indices = @transform_5, window_bounds = array<i64: 8, 256>}, {pipeline_mode = #tpu.pipeline_mode<synchronous>, transform_indices = @transform_6, window_bounds = array<i64: 8, 256>}, {pipeline_mode = #tpu.pipeline_mode<synchronous>, transform_indices = @transform_7, window_bounds = array<i64: 8, 256>}, {pipeline_mode = #tpu.pipeline_mode<synchronous>, transform_indices = @transform_8, window_bounds = array<i64: 8, 256>}, {pipeline_mode = #tpu.pipeline_mode<synchronous>, transform_indices = @transform_9, window_bounds = array<i64: 8, 256>}, {pipeline_mode = #tpu.pipeline_mode<synchronous>, transform_indices = @transform_10, window_bounds = array<i64: 96, 8>}, {pipeline_mode = #tpu.pipeline_mode<synchronous>, transform_indices = @transform_11, window_bounds = array<i64: 8, 16>}, {pipeline_mode = #tpu.pipeline_mode<synchronous>, transform_indices = @transform_12, window_bounds = array<i64: 16, 144>}, {pipeline_mode = #tpu.pipeline_mode<synchronous>, transform_indices = @transform_13, window_bounds = array<i64: 16, 1>}, {transform_indices = @transform_14, window_bounds = array<i64: 2, 8, 256>}, {transform_indices = @transform_15, window_bounds = array<i64: 2, 8, 256>}]} {
    %c0 = arith.constant 0 : index
    %c0_0 = arith.constant 0 : index
    %0 = vector.load %arg3[%c0, %c0_0] : memref<1x256xf32, #tpu.memory_space<vmem>>, vector<1x256xf32>
    %c0_1 = arith.constant 0 : index
    %c0_2 = arith.constant 0 : index
    %c0_3 = arith.constant 0 : index
    %1 = vector.load %arg4[%c0_1, %c0_2, %c0_3] : memref<9x1x256xf32, #tpu.memory_space<vmem>>, vector<1x1x256xf32>
    %2 = vector.shape_cast %1 : vector<1x1x256xf32> to vector<1x256xf32>
    %c1 = arith.constant 1 : index
    %c0_4 = arith.constant 0 : index
    %c0_5 = arith.constant 0 : index
    %3 = vector.load %arg4[%c1, %c0_4, %c0_5] : memref<9x1x256xf32, #tpu.memory_space<vmem>>, vector<1x1x256xf32>
    %4 = vector.shape_cast %3 : vector<1x1x256xf32> to vector<1x256xf32>
    %c2 = arith.constant 2 : index
    %c0_6 = arith.constant 0 : index
    %c0_7 = arith.constant 0 : index
    %5 = vector.load %arg4[%c2, %c0_6, %c0_7] : memref<9x1x256xf32, #tpu.memory_space<vmem>>, vector<1x1x256xf32>
    %6 = vector.shape_cast %5 : vector<1x1x256xf32> to vector<1x256xf32>
    %c3 = arith.constant 3 : index
    %c0_8 = arith.constant 0 : index
    %c0_9 = arith.constant 0 : index
    %7 = vector.load %arg4[%c3, %c0_8, %c0_9] : memref<9x1x256xf32, #tpu.memory_space<vmem>>, vector<1x1x256xf32>
    %8 = vector.shape_cast %7 : vector<1x1x256xf32> to vector<1x256xf32>
    %c5 = arith.constant 5 : index
    %c0_10 = arith.constant 0 : index
    %c0_11 = arith.constant 0 : index
    %9 = vector.load %arg4[%c5, %c0_10, %c0_11] : memref<9x1x256xf32, #tpu.memory_space<vmem>>, vector<1x1x256xf32>
    %10 = vector.shape_cast %9 : vector<1x1x256xf32> to vector<1x256xf32>
    %c6 = arith.constant 6 : index
    %c0_12 = arith.constant 0 : index
    %c0_13 = arith.constant 0 : index
    %11 = vector.load %arg4[%c6, %c0_12, %c0_13] : memref<9x1x256xf32, #tpu.memory_space<vmem>>, vector<1x1x256xf32>
    %12 = vector.shape_cast %11 : vector<1x1x256xf32> to vector<1x256xf32>
    %c7 = arith.constant 7 : index
    %c0_14 = arith.constant 0 : index
    %c0_15 = arith.constant 0 : index
    %13 = vector.load %arg4[%c7, %c0_14, %c0_15] : memref<9x1x256xf32, #tpu.memory_space<vmem>>, vector<1x1x256xf32>
    %14 = vector.shape_cast %13 : vector<1x1x256xf32> to vector<1x256xf32>
    %c8 = arith.constant 8 : index
    %c0_16 = arith.constant 0 : index
    %c0_17 = arith.constant 0 : index
    %15 = vector.load %arg4[%c8, %c0_16, %c0_17] : memref<9x1x256xf32, #tpu.memory_space<vmem>>, vector<1x1x256xf32>
    %16 = vector.shape_cast %15 : vector<1x1x256xf32> to vector<1x256xf32>
    %c0_18 = arith.constant 0 : index
    %c0_19 = arith.constant 0 : index
    %17 = vector.load %arg5[%c0_18, %c0_19] : memref<8x256xf32, #tpu.memory_space<vmem>>, vector<8x256xf32>
    %c0_20 = arith.constant 0 : index
    %c0_21 = arith.constant 0 : index
    %18 = vector.load %arg6[%c0_20, %c0_21] : memref<8x256xf32, #tpu.memory_space<vmem>>, vector<8x256xf32>
    %c0_22 = arith.constant 0 : index
    %c0_23 = arith.constant 0 : index
    %19 = vector.load %arg7[%c0_22, %c0_23] : memref<8x256xf32, #tpu.memory_space<vmem>>, vector<8x256xf32>
    %c0_24 = arith.constant 0 : index
    %c0_25 = arith.constant 0 : index
    %20 = vector.load %arg8[%c0_24, %c0_25] : memref<8x256xf32, #tpu.memory_space<vmem>>, vector<8x256xf32>
    %c0_26 = arith.constant 0 : index
    %c0_27 = arith.constant 0 : index
    %21 = vector.load %arg9[%c0_26, %c0_27] : memref<8x256xf32, #tpu.memory_space<vmem>>, vector<8x256xf32>
    %c0_28 = arith.constant 0 : index
    %c0_29 = arith.constant 0 : index
    %22 = vector.load %arg10[%c0_28, %c0_29] : memref<8x256xf32, #tpu.memory_space<vmem>>, vector<8x256xf32>
    %c0_30 = arith.constant 0 : index
    %c0_31 = arith.constant 0 : index
    %23 = vector.load %arg11[%c0_30, %c0_31] : memref<96x8xf32, #tpu.memory_space<vmem>>, vector<96x8xf32>
    %c0_32 = arith.constant 0 : index
    %c0_33 = arith.constant 0 : index
    %24 = vector.load %arg12[%c0_32, %c0_33] : memref<8x16xf32, #tpu.memory_space<vmem>>, vector<8x16xf32>
    %c0_34 = arith.constant 0 : index
    %c0_35 = arith.constant 0 : index
    %25 = vector.load %arg13[%c0_34, %c0_35] : memref<16x144xf32, #tpu.memory_space<vmem>>, vector<16x144xf32>
    %c0_36 = arith.constant 0 : index
    %c0_37 = arith.constant 0 : index
    %26 = vector.load %arg14[%c0_36, %c0_37] : memref<16x1xf32, #tpu.memory_space<vmem>>, vector<16x1xf32>
    %c0_38 = arith.constant 0 : index
    %c0_39 = arith.constant 0 : index
    %c0_40 = arith.constant 0 : index
    %27 = vector.load %arg1[%c0_38, %c0_39, %c0_40] : memref<2x8x256xf32, #tpu.memory_space<vmem>>, vector<1x8x256xf32>
    %28 = vector.shape_cast %27 : vector<1x8x256xf32> to vector<8x256xf32>
    %c0_41 = arith.constant 0 : index
    %c0_42 = arith.constant 0 : index
    %c0_43 = arith.constant 0 : index
    %29 = vector.load %arg2[%c0_41, %c0_42, %c0_43] : memref<2x8x256xf32, #tpu.memory_space<vmem>>, vector<1x8x256xf32>
    %30 = vector.shape_cast %29 : vector<1x8x256xf32> to vector<8x256xf32>
    %cst = arith.constant dense<0.000000e+00> : vector<8xf32>
    %31 = vector.multi_reduction <add>, %28, %cst [1] : vector<8x256xf32> to vector<8xf32>
    %32 = vector.shape_cast %31 : vector<8xf32> to vector<8x1xf32>
    %cst_44 = arith.constant dense<0.000000e+00> : vector<1xf32>
    %33 = vector.multi_reduction <add>, %32, %cst_44 [0] : vector<8x1xf32> to vector<1xf32>
    %34 = vector.shape_cast %33 : vector<1xf32> to vector<1x1xf32>
    %cst_45 = arith.constant 6.37755089E-4 : f32
    %35 = vector.broadcast %cst_45 : f32 to vector<1x1xf32>
    %36 = arith.mulf %34, %35 : vector<1x1xf32>
    %37 = vector.broadcast %36 : vector<1x1xf32> to vector<8x256xf32>
    %38 = arith.subf %28, %37 : vector<8x256xf32>
    %39 = vector.broadcast %0 : vector<1x256xf32> to vector<8x256xf32>
    %40 = arith.mulf %38, %39 : vector<8x256xf32>
    %41 = arith.mulf %40, %40 : vector<8x256xf32>
    %cst_46 = arith.constant dense<0.000000e+00> : vector<8xf32>
    %42 = vector.multi_reduction <add>, %41, %cst_46 [1] : vector<8x256xf32> to vector<8xf32>
    %43 = vector.shape_cast %42 : vector<8xf32> to vector<8x1xf32>
    %cst_47 = arith.constant dense<0.000000e+00> : vector<1xf32>
    %44 = vector.multi_reduction <add>, %43, %cst_47 [0] : vector<8x1xf32> to vector<1xf32>
    %45 = vector.shape_cast %44 : vector<1xf32> to vector<1x1xf32>
    %cst_48 = arith.constant 6.37755089E-4 : f32
    %46 = vector.broadcast %cst_48 : f32 to vector<1x1xf32>
    %47 = arith.mulf %45, %46 : vector<1x1xf32>
    %cst_49 = arith.constant 9.99999974E-6 : f32
    %48 = vector.broadcast %cst_49 : f32 to vector<1x1xf32>
    %49 = arith.addf %47, %48 : vector<1x1xf32>
    %50 = math.rsqrt %49 : vector<1x1xf32>
    %51 = vector.broadcast %50 : vector<1x1xf32> to vector<8x256xf32>
    %52 = arith.mulf %51, %17 : vector<8x256xf32>
    %53 = arith.mulf %40, %52 : vector<8x256xf32>
    %54 = arith.addf %53, %18 : vector<8x256xf32>
    %cst_50 = arith.constant dense<0.000000e+00> : vector<96x256xf32>
    %55 = tpu.matmul %23, %54, %cst_50 {dimension_numbers = #tpu.dot_dimension_numbers<[1], [0], [0], [1], [0, 0, 1, 1], [], []>} : vector<96x8xf32>, vector<8x256xf32>, vector<96x256xf32> -> vector<96x256xf32>
    %56 = vector.extract_strided_slice %55 {offsets = [0, 0], sizes = [8, 256], strides = [1, 1]} : vector<96x256xf32> to vector<8x256xf32>
    %57 = vector.extract_strided_slice %55 {offsets = [8, 0], sizes = [8, 256], strides = [1, 1]} : vector<96x256xf32> to vector<8x256xf32>
    %58 = vector.extract_strided_slice %55 {offsets = [16, 0], sizes = [8, 256], strides = [1, 1]} : vector<96x256xf32> to vector<8x256xf32>
    %59 = vector.extract_strided_slice %55 {offsets = [24, 0], sizes = [8, 256], strides = [1, 1]} : vector<96x256xf32> to vector<8x256xf32>
    %60 = vector.extract_strided_slice %55 {offsets = [32, 0], sizes = [8, 256], strides = [1, 1]} : vector<96x256xf32> to vector<8x256xf32>
    %61 = vector.extract_strided_slice %55 {offsets = [40, 0], sizes = [8, 256], strides = [1, 1]} : vector<96x256xf32> to vector<8x256xf32>
    %62 = arith.mulf %56, %57 : vector<8x256xf32>
    %cst_51 = arith.constant dense<0.000000e+00> : vector<256xf32>
    %63 = vector.multi_reduction <add>, %62, %cst_51 [0] : vector<8x256xf32> to vector<256xf32>
    %64 = vector.shape_cast %63 : vector<256xf32> to vector<1x256xf32>
    %cst_52 = arith.constant 0.353553385 : f32
    %65 = vector.broadcast %cst_52 : f32 to vector<1x256xf32>
    %66 = arith.mulf %64, %65 : vector<1x256xf32>
    %67 = arith.mulf %56, %60 : vector<8x256xf32>
    %cst_53 = arith.constant dense<0.000000e+00> : vector<256xf32>
    %68 = vector.multi_reduction <add>, %67, %cst_53 [0] : vector<8x256xf32> to vector<256xf32>
    %69 = vector.shape_cast %68 : vector<256xf32> to vector<1x256xf32>
    %cst_54 = arith.constant 0.353553385 : f32
    %70 = vector.broadcast %cst_54 : f32 to vector<1x256xf32>
    %71 = arith.mulf %69, %70 : vector<1x256xf32>
    %72 = arith.mulf %59, %57 : vector<8x256xf32>
    %cst_55 = arith.constant dense<0.000000e+00> : vector<256xf32>
    %73 = vector.multi_reduction <add>, %72, %cst_55 [0] : vector<8x256xf32> to vector<256xf32>
    %74 = vector.shape_cast %73 : vector<256xf32> to vector<1x256xf32>
    %cst_56 = arith.constant 0.353553385 : f32
    %75 = vector.broadcast %cst_56 : f32 to vector<1x256xf32>
    %76 = arith.mulf %74, %75 : vector<1x256xf32>
    %77 = arith.mulf %59, %60 : vector<8x256xf32>
    %cst_57 = arith.constant dense<0.000000e+00> : vector<256xf32>
    %78 = vector.multi_reduction <add>, %77, %cst_57 [0] : vector<8x256xf32> to vector<256xf32>
    %79 = vector.shape_cast %78 : vector<256xf32> to vector<1x256xf32>
    %cst_58 = arith.constant 0.353553385 : f32
    %80 = vector.broadcast %cst_58 : f32 to vector<1x256xf32>
    %81 = arith.mulf %79, %80 : vector<1x256xf32>
    %cst_59 = arith.constant dense<0xFF800000> : vector<1xf32>
    %82 = vector.multi_reduction <maximumf>, %66, %cst_59 [1] : vector<1x256xf32> to vector<1xf32>
    %83 = vector.shape_cast %82 : vector<1xf32> to vector<1x1xf32>
    %cst_60 = arith.constant dense<0xFF800000> : vector<1xf32>
    %84 = vector.multi_reduction <maximumf>, %83, %cst_60 [0] : vector<1x1xf32> to vector<1xf32>
    %85 = vector.shape_cast %84 : vector<1xf32> to vector<1x1xf32>
    %cst_61 = arith.constant dense<0xFF800000> : vector<1xf32>
    %86 = vector.multi_reduction <maximumf>, %71, %cst_61 [1] : vector<1x256xf32> to vector<1xf32>
    %87 = vector.shape_cast %86 : vector<1xf32> to vector<1x1xf32>
    %cst_62 = arith.constant dense<0xFF800000> : vector<1xf32>
    %88 = vector.multi_reduction <maximumf>, %87, %cst_62 [0] : vector<1x1xf32> to vector<1xf32>
    %89 = vector.shape_cast %88 : vector<1xf32> to vector<1x1xf32>
    %90 = arith.maximumf %85, %89 : vector<1x1xf32>
    %91 = vector.broadcast %90 : vector<1x1xf32> to vector<1x256xf32>
    %92 = arith.subf %66, %91 : vector<1x256xf32>
    %93 = math.exp %92 : vector<1x256xf32>
    %94 = arith.mulf %93, %0 : vector<1x256xf32>
    %95 = vector.broadcast %90 : vector<1x1xf32> to vector<1x256xf32>
    %96 = arith.subf %71, %95 : vector<1x256xf32>
    %97 = math.exp %96 : vector<1x256xf32>
    %98 = arith.mulf %97, %0 : vector<1x256xf32>
    %cst_63 = arith.constant dense<0.000000e+00> : vector<1xf32>
    %99 = vector.multi_reduction <add>, %94, %cst_63 [1] : vector<1x256xf32> to vector<1xf32>
    %100 = vector.shape_cast %99 : vector<1xf32> to vector<1x1xf32>
    %cst_64 = arith.constant dense<0.000000e+00> : vector<1xf32>
    %101 = vector.multi_reduction <add>, %100, %cst_64 [0] : vector<1x1xf32> to vector<1xf32>
    %102 = vector.shape_cast %101 : vector<1xf32> to vector<1x1xf32>
    %cst_65 = arith.constant dense<0.000000e+00> : vector<1xf32>
    %103 = vector.multi_reduction <add>, %98, %cst_65 [1] : vector<1x256xf32> to vector<1xf32>
    %104 = vector.shape_cast %103 : vector<1xf32> to vector<1x1xf32>
    %cst_66 = arith.constant dense<0.000000e+00> : vector<1xf32>
    %105 = vector.multi_reduction <add>, %104, %cst_66 [0] : vector<1x1xf32> to vector<1xf32>
    %106 = vector.shape_cast %105 : vector<1xf32> to vector<1x1xf32>
    %107 = arith.addf %102, %106 : vector<1x1xf32>
    %108 = tpu.reciprocal %107 {approx = true} : vector<1x1xf32> -> vector<1x1xf32>
    %109 = vector.broadcast %108 : vector<1x1xf32> to vector<1x256xf32>
    %110 = arith.mulf %94, %109 : vector<1x256xf32>
    %111 = vector.broadcast %108 : vector<1x1xf32> to vector<1x256xf32>
    %112 = arith.mulf %98, %111 : vector<1x256xf32>
    %cst_67 = arith.constant dense<0xFF800000> : vector<1xf32>
    %113 = vector.multi_reduction <maximumf>, %76, %cst_67 [1] : vector<1x256xf32> to vector<1xf32>
    %114 = vector.shape_cast %113 : vector<1xf32> to vector<1x1xf32>
    %cst_68 = arith.constant dense<0xFF800000> : vector<1xf32>
    %115 = vector.multi_reduction <maximumf>, %114, %cst_68 [0] : vector<1x1xf32> to vector<1xf32>
    %116 = vector.shape_cast %115 : vector<1xf32> to vector<1x1xf32>
    %cst_69 = arith.constant dense<0xFF800000> : vector<1xf32>
    %117 = vector.multi_reduction <maximumf>, %81, %cst_69 [1] : vector<1x256xf32> to vector<1xf32>
    %118 = vector.shape_cast %117 : vector<1xf32> to vector<1x1xf32>
    %cst_70 = arith.constant dense<0xFF800000> : vector<1xf32>
    %119 = vector.multi_reduction <maximumf>, %118, %cst_70 [0] : vector<1x1xf32> to vector<1xf32>
    %120 = vector.shape_cast %119 : vector<1xf32> to vector<1x1xf32>
    %121 = arith.maximumf %116, %120 : vector<1x1xf32>
    %122 = vector.broadcast %121 : vector<1x1xf32> to vector<1x256xf32>
    %123 = arith.subf %76, %122 : vector<1x256xf32>
    %124 = math.exp %123 : vector<1x256xf32>
    %125 = arith.mulf %124, %0 : vector<1x256xf32>
    %126 = vector.broadcast %121 : vector<1x1xf32> to vector<1x256xf32>
    %127 = arith.subf %81, %126 : vector<1x256xf32>
    %128 = math.exp %127 : vector<1x256xf32>
    %129 = arith.mulf %128, %0 : vector<1x256xf32>
    %cst_71 = arith.constant dense<0.000000e+00> : vector<1xf32>
    %130 = vector.multi_reduction <add>, %125, %cst_71 [1] : vector<1x256xf32> to vector<1xf32>
    %131 = vector.shape_cast %130 : vector<1xf32> to vector<1x1xf32>
    %cst_72 = arith.constant dense<0.000000e+00> : vector<1xf32>
    %132 = vector.multi_reduction <add>, %131, %cst_72 [0] : vector<1x1xf32> to vector<1xf32>
    %133 = vector.shape_cast %132 : vector<1xf32> to vector<1x1xf32>
    %cst_73 = arith.constant dense<0.000000e+00> : vector<1xf32>
    %134 = vector.multi_reduction <add>, %129, %cst_73 [1] : vector<1x256xf32> to vector<1xf32>
    %135 = vector.shape_cast %134 : vector<1xf32> to vector<1x1xf32>
    %cst_74 = arith.constant dense<0.000000e+00> : vector<1xf32>
    %136 = vector.multi_reduction <add>, %135, %cst_74 [0] : vector<1x1xf32> to vector<1xf32>
    %137 = vector.shape_cast %136 : vector<1xf32> to vector<1x1xf32>
    %138 = arith.addf %133, %137 : vector<1x1xf32>
    %139 = tpu.reciprocal %138 {approx = true} : vector<1x1xf32> -> vector<1x1xf32>
    %140 = vector.broadcast %139 : vector<1x1xf32> to vector<1x256xf32>
    %141 = arith.mulf %125, %140 : vector<1x256xf32>
    %142 = vector.broadcast %139 : vector<1x1xf32> to vector<1x256xf32>
    %143 = arith.mulf %129, %142 : vector<1x256xf32>
    %144 = vector.broadcast %110 : vector<1x256xf32> to vector<8x256xf32>
    %145 = arith.mulf %144, %58 : vector<8x256xf32>
    %146 = vector.broadcast %112 : vector<1x256xf32> to vector<8x256xf32>
    %147 = arith.mulf %146, %61 : vector<8x256xf32>
    %148 = arith.addf %145, %147 : vector<8x256xf32>
    %149 = vector.broadcast %141 : vector<1x256xf32> to vector<8x256xf32>
    %150 = arith.mulf %149, %58 : vector<8x256xf32>
    %151 = vector.broadcast %143 : vector<1x256xf32> to vector<8x256xf32>
    %152 = arith.mulf %151, %61 : vector<8x256xf32>
    %153 = arith.addf %150, %152 : vector<8x256xf32>
    %154 = tpu.concatenate %148, %153 in 1 : vector<8x256xf32>, vector<8x256xf32> -> vector<8x512xf32>
    %155 = vector.extract_strided_slice %55 {offsets = [48, 0], sizes = [8, 256], strides = [1, 1]} : vector<96x256xf32> to vector<8x256xf32>
    %156 = vector.extract_strided_slice %55 {offsets = [56, 0], sizes = [8, 256], strides = [1, 1]} : vector<96x256xf32> to vector<8x256xf32>
    %157 = vector.extract_strided_slice %55 {offsets = [64, 0], sizes = [8, 256], strides = [1, 1]} : vector<96x256xf32> to vector<8x256xf32>
    %158 = vector.extract_strided_slice %55 {offsets = [72, 0], sizes = [8, 256], strides = [1, 1]} : vector<96x256xf32> to vector<8x256xf32>
    %159 = vector.extract_strided_slice %55 {offsets = [80, 0], sizes = [8, 256], strides = [1, 1]} : vector<96x256xf32> to vector<8x256xf32>
    %160 = vector.extract_strided_slice %55 {offsets = [88, 0], sizes = [8, 256], strides = [1, 1]} : vector<96x256xf32> to vector<8x256xf32>
    %161 = arith.mulf %155, %156 : vector<8x256xf32>
    %cst_75 = arith.constant dense<0.000000e+00> : vector<256xf32>
    %162 = vector.multi_reduction <add>, %161, %cst_75 [0] : vector<8x256xf32> to vector<256xf32>
    %163 = vector.shape_cast %162 : vector<256xf32> to vector<1x256xf32>
    %cst_76 = arith.constant 0.353553385 : f32
    %164 = vector.broadcast %cst_76 : f32 to vector<1x256xf32>
    %165 = arith.mulf %163, %164 : vector<1x256xf32>
    %166 = arith.mulf %155, %159 : vector<8x256xf32>
    %cst_77 = arith.constant dense<0.000000e+00> : vector<256xf32>
    %167 = vector.multi_reduction <add>, %166, %cst_77 [0] : vector<8x256xf32> to vector<256xf32>
    %168 = vector.shape_cast %167 : vector<256xf32> to vector<1x256xf32>
    %cst_78 = arith.constant 0.353553385 : f32
    %169 = vector.broadcast %cst_78 : f32 to vector<1x256xf32>
    %170 = arith.mulf %168, %169 : vector<1x256xf32>
    %171 = arith.mulf %158, %156 : vector<8x256xf32>
    %cst_79 = arith.constant dense<0.000000e+00> : vector<256xf32>
    %172 = vector.multi_reduction <add>, %171, %cst_79 [0] : vector<8x256xf32> to vector<256xf32>
    %173 = vector.shape_cast %172 : vector<256xf32> to vector<1x256xf32>
    %cst_80 = arith.constant 0.353553385 : f32
    %174 = vector.broadcast %cst_80 : f32 to vector<1x256xf32>
    %175 = arith.mulf %173, %174 : vector<1x256xf32>
    %176 = arith.mulf %158, %159 : vector<8x256xf32>
    %cst_81 = arith.constant dense<0.000000e+00> : vector<256xf32>
    %177 = vector.multi_reduction <add>, %176, %cst_81 [0] : vector<8x256xf32> to vector<256xf32>
    %178 = vector.shape_cast %177 : vector<256xf32> to vector<1x256xf32>
    %cst_82 = arith.constant 0.353553385 : f32
    %179 = vector.broadcast %cst_82 : f32 to vector<1x256xf32>
    %180 = arith.mulf %178, %179 : vector<1x256xf32>
    %cst_83 = arith.constant dense<0xFF800000> : vector<1xf32>
    %181 = vector.multi_reduction <maximumf>, %165, %cst_83 [1] : vector<1x256xf32> to vector<1xf32>
    %182 = vector.shape_cast %181 : vector<1xf32> to vector<1x1xf32>
    %cst_84 = arith.constant dense<0xFF800000> : vector<1xf32>
    %183 = vector.multi_reduction <maximumf>, %182, %cst_84 [0] : vector<1x1xf32> to vector<1xf32>
    %184 = vector.shape_cast %183 : vector<1xf32> to vector<1x1xf32>
    %cst_85 = arith.constant dense<0xFF800000> : vector<1xf32>
    %185 = vector.multi_reduction <maximumf>, %170, %cst_85 [1] : vector<1x256xf32> to vector<1xf32>
    %186 = vector.shape_cast %185 : vector<1xf32> to vector<1x1xf32>
    %cst_86 = arith.constant dense<0xFF800000> : vector<1xf32>
    %187 = vector.multi_reduction <maximumf>, %186, %cst_86 [0] : vector<1x1xf32> to vector<1xf32>
    %188 = vector.shape_cast %187 : vector<1xf32> to vector<1x1xf32>
    %189 = arith.maximumf %184, %188 : vector<1x1xf32>
    %190 = vector.broadcast %189 : vector<1x1xf32> to vector<1x256xf32>
    %191 = arith.subf %165, %190 : vector<1x256xf32>
    %192 = math.exp %191 : vector<1x256xf32>
    %193 = arith.mulf %192, %0 : vector<1x256xf32>
    %194 = vector.broadcast %189 : vector<1x1xf32> to vector<1x256xf32>
    %195 = arith.subf %170, %194 : vector<1x256xf32>
    %196 = math.exp %195 : vector<1x256xf32>
    %197 = arith.mulf %196, %0 : vector<1x256xf32>
    %cst_87 = arith.constant dense<0.000000e+00> : vector<1xf32>
    %198 = vector.multi_reduction <add>, %193, %cst_87 [1] : vector<1x256xf32> to vector<1xf32>
    %199 = vector.shape_cast %198 : vector<1xf32> to vector<1x1xf32>
    %cst_88 = arith.constant dense<0.000000e+00> : vector<1xf32>
    %200 = vector.multi_reduction <add>, %199, %cst_88 [0] : vector<1x1xf32> to vector<1xf32>
    %201 = vector.shape_cast %200 : vector<1xf32> to vector<1x1xf32>
    %cst_89 = arith.constant dense<0.000000e+00> : vector<1xf32>
    %202 = vector.multi_reduction <add>, %197, %cst_89 [1] : vector<1x256xf32> to vector<1xf32>
    %203 = vector.shape_cast %202 : vector<1xf32> to vector<1x1xf32>
    %cst_90 = arith.constant dense<0.000000e+00> : vector<1xf32>
    %204 = vector.multi_reduction <add>, %203, %cst_90 [0] : vector<1x1xf32> to vector<1xf32>
    %205 = vector.shape_cast %204 : vector<1xf32> to vector<1x1xf32>
    %206 = arith.addf %201, %205 : vector<1x1xf32>
    %207 = tpu.reciprocal %206 {approx = true} : vector<1x1xf32> -> vector<1x1xf32>
    %208 = vector.broadcast %207 : vector<1x1xf32> to vector<1x256xf32>
    %209 = arith.mulf %193, %208 : vector<1x256xf32>
    %210 = vector.broadcast %207 : vector<1x1xf32> to vector<1x256xf32>
    %211 = arith.mulf %197, %210 : vector<1x256xf32>
    %cst_91 = arith.constant dense<0xFF800000> : vector<1xf32>
    %212 = vector.multi_reduction <maximumf>, %175, %cst_91 [1] : vector<1x256xf32> to vector<1xf32>
    %213 = vector.shape_cast %212 : vector<1xf32> to vector<1x1xf32>
    %cst_92 = arith.constant dense<0xFF800000> : vector<1xf32>
    %214 = vector.multi_reduction <maximumf>, %213, %cst_92 [0] : vector<1x1xf32> to vector<1xf32>
    %215 = vector.shape_cast %214 : vector<1xf32> to vector<1x1xf32>
    %cst_93 = arith.constant dense<0xFF800000> : vector<1xf32>
    %216 = vector.multi_reduction <maximumf>, %180, %cst_93 [1] : vector<1x256xf32> to vector<1xf32>
    %217 = vector.shape_cast %216 : vector<1xf32> to vector<1x1xf32>
    %cst_94 = arith.constant dense<0xFF800000> : vector<1xf32>
    %218 = vector.multi_reduction <maximumf>, %217, %cst_94 [0] : vector<1x1xf32> to vector<1xf32>
    %219 = vector.shape_cast %218 : vector<1xf32> to vector<1x1xf32>
    %220 = arith.maximumf %215, %219 : vector<1x1xf32>
    %221 = vector.broadcast %220 : vector<1x1xf32> to vector<1x256xf32>
    %222 = arith.subf %175, %221 : vector<1x256xf32>
    %223 = math.exp %222 : vector<1x256xf32>
    %224 = arith.mulf %223, %0 : vector<1x256xf32>
    %225 = vector.broadcast %220 : vector<1x1xf32> to vector<1x256xf32>
    %226 = arith.subf %180, %225 : vector<1x256xf32>
    %227 = math.exp %226 : vector<1x256xf32>
    %228 = arith.mulf %227, %0 : vector<1x256xf32>
    %cst_95 = arith.constant dense<0.000000e+00> : vector<1xf32>
    %229 = vector.multi_reduction <add>, %224, %cst_95 [1] : vector<1x256xf32> to vector<1xf32>
    %230 = vector.shape_cast %229 : vector<1xf32> to vector<1x1xf32>
    %cst_96 = arith.constant dense<0.000000e+00> : vector<1xf32>
    %231 = vector.multi_reduction <add>, %230, %cst_96 [0] : vector<1x1xf32> to vector<1xf32>
    %232 = vector.shape_cast %231 : vector<1xf32> to vector<1x1xf32>
    %cst_97 = arith.constant dense<0.000000e+00> : vector<1xf32>
    %233 = vector.multi_reduction <add>, %228, %cst_97 [1] : vector<1x256xf32> to vector<1xf32>
    %234 = vector.shape_cast %233 : vector<1xf32> to vector<1x1xf32>
    %cst_98 = arith.constant dense<0.000000e+00> : vector<1xf32>
    %235 = vector.multi_reduction <add>, %234, %cst_98 [0] : vector<1x1xf32> to vector<1xf32>
    %236 = vector.shape_cast %235 : vector<1xf32> to vector<1x1xf32>
    %237 = arith.addf %232, %236 : vector<1x1xf32>
    %238 = tpu.reciprocal %237 {approx = true} : vector<1x1xf32> -> vector<1x1xf32>
    %239 = vector.broadcast %238 : vector<1x1xf32> to vector<1x256xf32>
    %240 = arith.mulf %224, %239 : vector<1x256xf32>
    %241 = vector.broadcast %238 : vector<1x1xf32> to vector<1x256xf32>
    %242 = arith.mulf %228, %241 : vector<1x256xf32>
    %243 = vector.broadcast %209 : vector<1x256xf32> to vector<8x256xf32>
    %244 = arith.mulf %243, %157 : vector<8x256xf32>
    %245 = vector.broadcast %211 : vector<1x256xf32> to vector<8x256xf32>
    %246 = arith.mulf %245, %160 : vector<8x256xf32>
    %247 = arith.addf %244, %246 : vector<8x256xf32>
    %248 = vector.broadcast %240 : vector<1x256xf32> to vector<8x256xf32>
    %249 = arith.mulf %248, %157 : vector<8x256xf32>
    %250 = vector.broadcast %242 : vector<1x256xf32> to vector<8x256xf32>
    %251 = arith.mulf %250, %160 : vector<8x256xf32>
    %252 = arith.addf %249, %251 : vector<8x256xf32>
    %253 = tpu.concatenate %247, %252 in 1 : vector<8x256xf32>, vector<8x256xf32> -> vector<8x512xf32>
    %254 = tpu.concatenate %154, %253 in 0 : vector<8x512xf32>, vector<8x512xf32> -> vector<16x512xf32>
    %cst_99 = arith.constant dense<0.000000e+00> : vector<8x512xf32>
    %255 = tpu.matmul %24, %254, %cst_99 {dimension_numbers = #tpu.dot_dimension_numbers<[1], [0], [0], [1], [0, 0, 1, 1], [], []>} : vector<8x16xf32>, vector<16x512xf32>, vector<8x512xf32> -> vector<8x512xf32>
    %256 = vector.extract_strided_slice %255 {offsets = [0, 0], sizes = [8, 256], strides = [1, 1]} : vector<8x512xf32> to vector<8x256xf32>
    %257 = arith.addf %256, %28 : vector<8x256xf32>
    %258 = vector.extract_strided_slice %255 {offsets = [0, 256], sizes = [8, 256], strides = [1, 1]} : vector<8x512xf32> to vector<8x256xf32>
    %259 = arith.addf %258, %30 : vector<8x256xf32>
    %cst_100 = arith.constant dense<0.000000e+00> : vector<8xf32>
    %260 = vector.multi_reduction <add>, %257, %cst_100 [1] : vector<8x256xf32> to vector<8xf32>
    %261 = vector.shape_cast %260 : vector<8xf32> to vector<8x1xf32>
    %cst_101 = arith.constant dense<0.000000e+00> : vector<1xf32>
    %262 = vector.multi_reduction <add>, %261, %cst_101 [0] : vector<8x1xf32> to vector<1xf32>
    %263 = vector.shape_cast %262 : vector<1xf32> to vector<1x1xf32>
    %cst_102 = arith.constant 6.37755089E-4 : f32
    %264 = vector.broadcast %cst_102 : f32 to vector<1x1xf32>
    %265 = arith.mulf %263, %264 : vector<1x1xf32>
    %266 = vector.broadcast %265 : vector<1x1xf32> to vector<8x256xf32>
    %267 = arith.subf %257, %266 : vector<8x256xf32>
    %268 = vector.broadcast %0 : vector<1x256xf32> to vector<8x256xf32>
    %269 = arith.mulf %267, %268 : vector<8x256xf32>
    %270 = arith.mulf %269, %269 : vector<8x256xf32>
    %cst_103 = arith.constant dense<0.000000e+00> : vector<8xf32>
    %271 = vector.multi_reduction <add>, %270, %cst_103 [1] : vector<8x256xf32> to vector<8xf32>
    %272 = vector.shape_cast %271 : vector<8xf32> to vector<8x1xf32>
    %cst_104 = arith.constant dense<0.000000e+00> : vector<1xf32>
    %273 = vector.multi_reduction <add>, %272, %cst_104 [0] : vector<8x1xf32> to vector<1xf32>
    %274 = vector.shape_cast %273 : vector<1xf32> to vector<1x1xf32>
    %cst_105 = arith.constant 6.37755089E-4 : f32
    %275 = vector.broadcast %cst_105 : f32 to vector<1x1xf32>
    %276 = arith.mulf %274, %275 : vector<1x1xf32>
    %cst_106 = arith.constant 9.99999974E-6 : f32
    %277 = vector.broadcast %cst_106 : f32 to vector<1x1xf32>
    %278 = arith.addf %276, %277 : vector<1x1xf32>
    %279 = math.rsqrt %278 : vector<1x1xf32>
    %280 = vector.broadcast %279 : vector<1x1xf32> to vector<8x256xf32>
    %281 = arith.mulf %280, %19 : vector<8x256xf32>
    %282 = arith.mulf %269, %281 : vector<8x256xf32>
    %283 = arith.addf %282, %20 : vector<8x256xf32>
    %cst_107 = arith.constant dense<0.000000e+00> : vector<8xf32>
    %284 = vector.multi_reduction <add>, %259, %cst_107 [1] : vector<8x256xf32> to vector<8xf32>
    %285 = vector.shape_cast %284 : vector<8xf32> to vector<8x1xf32>
    %cst_108 = arith.constant dense<0.000000e+00> : vector<1xf32>
    %286 = vector.multi_reduction <add>, %285, %cst_108 [0] : vector<8x1xf32> to vector<1xf32>
    %287 = vector.shape_cast %286 : vector<1xf32> to vector<1x1xf32>
    %cst_109 = arith.constant 6.37755089E-4 : f32
    %288 = vector.broadcast %cst_109 : f32 to vector<1x1xf32>
    %289 = arith.mulf %287, %288 : vector<1x1xf32>
    %290 = vector.broadcast %289 : vector<1x1xf32> to vector<8x256xf32>
    %291 = arith.subf %259, %290 : vector<8x256xf32>
    %292 = vector.broadcast %0 : vector<1x256xf32> to vector<8x256xf32>
    %293 = arith.mulf %291, %292 : vector<8x256xf32>
    %294 = arith.mulf %293, %293 : vector<8x256xf32>
    %cst_110 = arith.constant dense<0.000000e+00> : vector<8xf32>
    %295 = vector.multi_reduction <add>, %294, %cst_110 [1] : vector<8x256xf32> to vector<8xf32>
    %296 = vector.shape_cast %295 : vector<8xf32> to vector<8x1xf32>
    %cst_111 = arith.constant dense<0.000000e+00> : vector<1xf32>
    %297 = vector.multi_reduction <add>, %296, %cst_111 [0] : vector<8x1xf32> to vector<1xf32>
    %298 = vector.shape_cast %297 : vector<1xf32> to vector<1x1xf32>
    %cst_112 = arith.constant 6.37755089E-4 : f32
    %299 = vector.broadcast %cst_112 : f32 to vector<1x1xf32>
    %300 = arith.mulf %298, %299 : vector<1x1xf32>
    %cst_113 = arith.constant 9.99999974E-6 : f32
    %301 = vector.broadcast %cst_113 : f32 to vector<1x1xf32>
    %302 = arith.addf %300, %301 : vector<1x1xf32>
    %303 = math.rsqrt %302 : vector<1x1xf32>
    %304 = vector.broadcast %303 : vector<1x1xf32> to vector<8x256xf32>
    %305 = arith.mulf %304, %21 : vector<8x256xf32>
    %306 = arith.mulf %293, %305 : vector<8x256xf32>
    %307 = arith.addf %306, %22 : vector<8x256xf32>
    %308 = vector.extract_strided_slice %283 {offsets = [0, 241], sizes = [8, 15], strides = [1, 1]} : vector<8x256xf32> to vector<8x15xf32>
    %309 = vector.extract_strided_slice %283 {offsets = [0, 0], sizes = [8, 241], strides = [1, 1]} : vector<8x256xf32> to vector<8x241xf32>
    %310 = tpu.concatenate %308, %309 in 1 : vector<8x15xf32>, vector<8x241xf32> -> vector<8x256xf32>
    %311 = vector.broadcast %2 : vector<1x256xf32> to vector<8x256xf32>
    %312 = arith.mulf %310, %311 : vector<8x256xf32>
    %313 = vector.extract_strided_slice %283 {offsets = [0, 242], sizes = [8, 14], strides = [1, 1]} : vector<8x256xf32> to vector<8x14xf32>
    %314 = vector.extract_strided_slice %283 {offsets = [0, 0], sizes = [8, 242], strides = [1, 1]} : vector<8x256xf32> to vector<8x242xf32>
    %315 = tpu.concatenate %313, %314 in 1 : vector<8x14xf32>, vector<8x242xf32> -> vector<8x256xf32>
    %316 = vector.broadcast %4 : vector<1x256xf32> to vector<8x256xf32>
    %317 = arith.mulf %315, %316 : vector<8x256xf32>
    %318 = vector.extract_strided_slice %283 {offsets = [0, 243], sizes = [8, 13], strides = [1, 1]} : vector<8x256xf32> to vector<8x13xf32>
    %319 = vector.extract_strided_slice %283 {offsets = [0, 0], sizes = [8, 243], strides = [1, 1]} : vector<8x256xf32> to vector<8x243xf32>
    %320 = tpu.concatenate %318, %319 in 1 : vector<8x13xf32>, vector<8x243xf32> -> vector<8x256xf32>
    %321 = vector.broadcast %6 : vector<1x256xf32> to vector<8x256xf32>
    %322 = arith.mulf %320, %321 : vector<8x256xf32>
    %323 = vector.extract_strided_slice %283 {offsets = [0, 255], sizes = [8, 1], strides = [1, 1]} : vector<8x256xf32> to vector<8x1xf32>
    %324 = vector.extract_strided_slice %283 {offsets = [0, 0], sizes = [8, 255], strides = [1, 1]} : vector<8x256xf32> to vector<8x255xf32>
    %325 = tpu.concatenate %323, %324 in 1 : vector<8x1xf32>, vector<8x255xf32> -> vector<8x256xf32>
    %326 = vector.broadcast %8 : vector<1x256xf32> to vector<8x256xf32>
    %327 = arith.mulf %325, %326 : vector<8x256xf32>
    %328 = vector.extract_strided_slice %283 {offsets = [0, 1], sizes = [8, 255], strides = [1, 1]} : vector<8x256xf32> to vector<8x255xf32>
    %329 = vector.extract_strided_slice %283 {offsets = [0, 0], sizes = [8, 1], strides = [1, 1]} : vector<8x256xf32> to vector<8x1xf32>
    %330 = tpu.concatenate %328, %329 in 1 : vector<8x255xf32>, vector<8x1xf32> -> vector<8x256xf32>
    %331 = vector.broadcast %10 : vector<1x256xf32> to vector<8x256xf32>
    %332 = arith.mulf %330, %331 : vector<8x256xf32>
    %333 = vector.extract_strided_slice %283 {offsets = [0, 13], sizes = [8, 243], strides = [1, 1]} : vector<8x256xf32> to vector<8x243xf32>
    %334 = vector.extract_strided_slice %283 {offsets = [0, 0], sizes = [8, 13], strides = [1, 1]} : vector<8x256xf32> to vector<8x13xf32>
    %335 = tpu.concatenate %333, %334 in 1 : vector<8x243xf32>, vector<8x13xf32> -> vector<8x256xf32>
    %336 = vector.broadcast %12 : vector<1x256xf32> to vector<8x256xf32>
    %337 = arith.mulf %335, %336 : vector<8x256xf32>
    %338 = vector.extract_strided_slice %283 {offsets = [0, 14], sizes = [8, 242], strides = [1, 1]} : vector<8x256xf32> to vector<8x242xf32>
    %339 = vector.extract_strided_slice %283 {offsets = [0, 0], sizes = [8, 14], strides = [1, 1]} : vector<8x256xf32> to vector<8x14xf32>
    %340 = tpu.concatenate %338, %339 in 1 : vector<8x242xf32>, vector<8x14xf32> -> vector<8x256xf32>
    %341 = vector.broadcast %14 : vector<1x256xf32> to vector<8x256xf32>
    %342 = arith.mulf %340, %341 : vector<8x256xf32>
    %343 = vector.extract_strided_slice %283 {offsets = [0, 15], sizes = [8, 241], strides = [1, 1]} : vector<8x256xf32> to vector<8x241xf32>
    %344 = vector.extract_strided_slice %283 {offsets = [0, 0], sizes = [8, 15], strides = [1, 1]} : vector<8x256xf32> to vector<8x15xf32>
    %345 = tpu.concatenate %343, %344 in 1 : vector<8x241xf32>, vector<8x15xf32> -> vector<8x256xf32>
    %346 = vector.broadcast %16 : vector<1x256xf32> to vector<8x256xf32>
    %347 = arith.mulf %345, %346 : vector<8x256xf32>
    %348 = vector.extract_strided_slice %307 {offsets = [0, 241], sizes = [8, 15], strides = [1, 1]} : vector<8x256xf32> to vector<8x15xf32>
    %349 = vector.extract_strided_slice %307 {offsets = [0, 0], sizes = [8, 241], strides = [1, 1]} : vector<8x256xf32> to vector<8x241xf32>
    %350 = tpu.concatenate %348, %349 in 1 : vector<8x15xf32>, vector<8x241xf32> -> vector<8x256xf32>
    %351 = vector.broadcast %2 : vector<1x256xf32> to vector<8x256xf32>
    %352 = arith.mulf %350, %351 : vector<8x256xf32>
    %353 = vector.extract_strided_slice %307 {offsets = [0, 242], sizes = [8, 14], strides = [1, 1]} : vector<8x256xf32> to vector<8x14xf32>
    %354 = vector.extract_strided_slice %307 {offsets = [0, 0], sizes = [8, 242], strides = [1, 1]} : vector<8x256xf32> to vector<8x242xf32>
    %355 = tpu.concatenate %353, %354 in 1 : vector<8x14xf32>, vector<8x242xf32> -> vector<8x256xf32>
    %356 = vector.broadcast %4 : vector<1x256xf32> to vector<8x256xf32>
    %357 = arith.mulf %355, %356 : vector<8x256xf32>
    %358 = vector.extract_strided_slice %307 {offsets = [0, 243], sizes = [8, 13], strides = [1, 1]} : vector<8x256xf32> to vector<8x13xf32>
    %359 = vector.extract_strided_slice %307 {offsets = [0, 0], sizes = [8, 243], strides = [1, 1]} : vector<8x256xf32> to vector<8x243xf32>
    %360 = tpu.concatenate %358, %359 in 1 : vector<8x13xf32>, vector<8x243xf32> -> vector<8x256xf32>
    %361 = vector.broadcast %6 : vector<1x256xf32> to vector<8x256xf32>
    %362 = arith.mulf %360, %361 : vector<8x256xf32>
    %363 = vector.extract_strided_slice %307 {offsets = [0, 255], sizes = [8, 1], strides = [1, 1]} : vector<8x256xf32> to vector<8x1xf32>
    %364 = vector.extract_strided_slice %307 {offsets = [0, 0], sizes = [8, 255], strides = [1, 1]} : vector<8x256xf32> to vector<8x255xf32>
    %365 = tpu.concatenate %363, %364 in 1 : vector<8x1xf32>, vector<8x255xf32> -> vector<8x256xf32>
    %366 = vector.broadcast %8 : vector<1x256xf32> to vector<8x256xf32>
    %367 = arith.mulf %365, %366 : vector<8x256xf32>
    %368 = vector.extract_strided_slice %307 {offsets = [0, 1], sizes = [8, 255], strides = [1, 1]} : vector<8x256xf32> to vector<8x255xf32>
    %369 = vector.extract_strided_slice %307 {offsets = [0, 0], sizes = [8, 1], strides = [1, 1]} : vector<8x256xf32> to vector<8x1xf32>
    %370 = tpu.concatenate %368, %369 in 1 : vector<8x255xf32>, vector<8x1xf32> -> vector<8x256xf32>
    %371 = vector.broadcast %10 : vector<1x256xf32> to vector<8x256xf32>
    %372 = arith.mulf %370, %371 : vector<8x256xf32>
    %373 = vector.extract_strided_slice %307 {offsets = [0, 13], sizes = [8, 243], strides = [1, 1]} : vector<8x256xf32> to vector<8x243xf32>
    %374 = vector.extract_strided_slice %307 {offsets = [0, 0], sizes = [8, 13], strides = [1, 1]} : vector<8x256xf32> to vector<8x13xf32>
    %375 = tpu.concatenate %373, %374 in 1 : vector<8x243xf32>, vector<8x13xf32> -> vector<8x256xf32>
    %376 = vector.broadcast %12 : vector<1x256xf32> to vector<8x256xf32>
    %377 = arith.mulf %375, %376 : vector<8x256xf32>
    %378 = vector.extract_strided_slice %307 {offsets = [0, 14], sizes = [8, 242], strides = [1, 1]} : vector<8x256xf32> to vector<8x242xf32>
    %379 = vector.extract_strided_slice %307 {offsets = [0, 0], sizes = [8, 14], strides = [1, 1]} : vector<8x256xf32> to vector<8x14xf32>
    %380 = tpu.concatenate %378, %379 in 1 : vector<8x242xf32>, vector<8x14xf32> -> vector<8x256xf32>
    %381 = vector.broadcast %14 : vector<1x256xf32> to vector<8x256xf32>
    %382 = arith.mulf %380, %381 : vector<8x256xf32>
    %383 = vector.extract_strided_slice %307 {offsets = [0, 15], sizes = [8, 241], strides = [1, 1]} : vector<8x256xf32> to vector<8x241xf32>
    %384 = vector.extract_strided_slice %307 {offsets = [0, 0], sizes = [8, 15], strides = [1, 1]} : vector<8x256xf32> to vector<8x15xf32>
    %385 = tpu.concatenate %383, %384 in 1 : vector<8x241xf32>, vector<8x15xf32> -> vector<8x256xf32>
    %386 = vector.broadcast %16 : vector<1x256xf32> to vector<8x256xf32>
    %387 = arith.mulf %385, %386 : vector<8x256xf32>
    %388 = tpu.concatenate %312, %317, %322, %327, %283, %332, %337, %342, %347, %352, %357, %362, %367, %307, %372, %377 in 0 : vector<8x256xf32>, vector<8x256xf32>, vector<8x256xf32>, vector<8x256xf32>, vector<8x256xf32>, vector<8x256xf32>, vector<8x256xf32>, vector<8x256xf32>, vector<8x256xf32>, vector<8x256xf32>, vector<8x256xf32>, vector<8x256xf32>, vector<8x256xf32>, vector<8x256xf32>, vector<8x256xf32>, vector<8x256xf32> -> vector<128x256xf32>
    %389 = tpu.concatenate %382, %387 in 0 : vector<8x256xf32>, vector<8x256xf32> -> vector<16x256xf32>
    %390 = tpu.concatenate %388, %389 in 0 : vector<128x256xf32>, vector<16x256xf32> -> vector<144x256xf32>
    %cst_114 = arith.constant dense<0.000000e+00> : vector<16x256xf32>
    %391 = tpu.matmul %25, %390, %cst_114 {dimension_numbers = #tpu.dot_dimension_numbers<[1], [0], [0], [1], [0, 0, 1, 1], [], []>} : vector<16x144xf32>, vector<144x256xf32>, vector<16x256xf32> -> vector<16x256xf32>
    %392 = vector.broadcast %26 : vector<16x1xf32> to vector<16x256xf32>
    %393 = arith.addf %391, %392 : vector<16x256xf32>
    %394 = vector.extract_strided_slice %393 {offsets = [0, 0], sizes = [8, 256], strides = [1, 1]} : vector<16x256xf32> to vector<8x256xf32>
    %395 = arith.addf %394, %257 : vector<8x256xf32>
    %c0_115 = arith.constant 0 : index
    %c0_116 = arith.constant 0 : index
    %c0_117 = arith.constant 0 : index
    %396 = vector.load %arg15[%c0_115, %c0_116, %c0_117] : memref<2x8x256xf32, #tpu.memory_space<vmem>>, vector<1x8x256xf32>
    %397 = vector.shape_cast %396 : vector<1x8x256xf32> to vector<8x256xf32>
    %398 = vector.shape_cast %395 : vector<8x256xf32> to vector<1x8x256xf32>
    tpu.vector_store %arg15[%c0_115, %c0_116, %c0_117], %398 {strides = array<i32>} : memref<2x8x256xf32, #tpu.memory_space<vmem>>, vector<1x8x256xf32>,
    %399 = vector.extract_strided_slice %393 {offsets = [8, 0], sizes = [8, 256], strides = [1, 1]} : vector<16x256xf32> to vector<8x256xf32>
    %400 = arith.addf %399, %259 : vector<8x256xf32>
    %c0_118 = arith.constant 0 : index
    %c0_119 = arith.constant 0 : index
    %c0_120 = arith.constant 0 : index
    %401 = vector.load %arg16[%c0_118, %c0_119, %c0_120] : memref<2x8x256xf32, #tpu.memory_space<vmem>>, vector<1x8x256xf32>
    %402 = vector.shape_cast %401 : vector<1x8x256xf32> to vector<8x256xf32>
    %403 = vector.shape_cast %400 : vector<8x256xf32> to vector<1x8x256xf32>
    tpu.vector_store %arg16[%c0_118, %c0_119, %c0_120], %403 {strides = array<i32>} : memref<2x8x256xf32, #tpu.memory_space<vmem>>, vector<1x8x256xf32>,
    %c1_121 = arith.constant 1 : index
    %c0_122 = arith.constant 0 : index
    %c0_123 = arith.constant 0 : index
    %404 = vector.load %arg1[%c1_121, %c0_122, %c0_123] : memref<2x8x256xf32, #tpu.memory_space<vmem>>, vector<1x8x256xf32>
    %405 = vector.shape_cast %404 : vector<1x8x256xf32> to vector<8x256xf32>
    %c1_124 = arith.constant 1 : index
    %c0_125 = arith.constant 0 : index
    %c0_126 = arith.constant 0 : index
    %406 = vector.load %arg2[%c1_124, %c0_125, %c0_126] : memref<2x8x256xf32, #tpu.memory_space<vmem>>, vector<1x8x256xf32>
    %407 = vector.shape_cast %406 : vector<1x8x256xf32> to vector<8x256xf32>
    %cst_127 = arith.constant dense<0.000000e+00> : vector<8xf32>
    %408 = vector.multi_reduction <add>, %405, %cst_127 [1] : vector<8x256xf32> to vector<8xf32>
    %409 = vector.shape_cast %408 : vector<8xf32> to vector<8x1xf32>
    %cst_128 = arith.constant dense<0.000000e+00> : vector<1xf32>
    %410 = vector.multi_reduction <add>, %409, %cst_128 [0] : vector<8x1xf32> to vector<1xf32>
    %411 = vector.shape_cast %410 : vector<1xf32> to vector<1x1xf32>
    %cst_129 = arith.constant 6.37755089E-4 : f32
    %412 = vector.broadcast %cst_129 : f32 to vector<1x1xf32>
    %413 = arith.mulf %411, %412 : vector<1x1xf32>
    %414 = vector.broadcast %413 : vector<1x1xf32> to vector<8x256xf32>
    %415 = arith.subf %405, %414 : vector<8x256xf32>
    %416 = vector.broadcast %0 : vector<1x256xf32> to vector<8x256xf32>
    %417 = arith.mulf %415, %416 : vector<8x256xf32>
    %418 = arith.mulf %417, %417 : vector<8x256xf32>
    %cst_130 = arith.constant dense<0.000000e+00> : vector<8xf32>
    %419 = vector.multi_reduction <add>, %418, %cst_130 [1] : vector<8x256xf32> to vector<8xf32>
    %420 = vector.shape_cast %419 : vector<8xf32> to vector<8x1xf32>
    %cst_131 = arith.constant dense<0.000000e+00> : vector<1xf32>
    %421 = vector.multi_reduction <add>, %420, %cst_131 [0] : vector<8x1xf32> to vector<1xf32>
    %422 = vector.shape_cast %421 : vector<1xf32> to vector<1x1xf32>
    %cst_132 = arith.constant 6.37755089E-4 : f32
    %423 = vector.broadcast %cst_132 : f32 to vector<1x1xf32>
    %424 = arith.mulf %422, %423 : vector<1x1xf32>
    %cst_133 = arith.constant 9.99999974E-6 : f32
    %425 = vector.broadcast %cst_133 : f32 to vector<1x1xf32>
    %426 = arith.addf %424, %425 : vector<1x1xf32>
    %427 = math.rsqrt %426 : vector<1x1xf32>
    %428 = vector.broadcast %427 : vector<1x1xf32> to vector<8x256xf32>
    %429 = arith.mulf %428, %17 : vector<8x256xf32>
    %430 = arith.mulf %417, %429 : vector<8x256xf32>
    %431 = arith.addf %430, %18 : vector<8x256xf32>
    %cst_134 = arith.constant dense<0.000000e+00> : vector<96x256xf32>
    %432 = tpu.matmul %23, %431, %cst_134 {dimension_numbers = #tpu.dot_dimension_numbers<[1], [0], [0], [1], [0, 0, 1, 1], [], []>} : vector<96x8xf32>, vector<8x256xf32>, vector<96x256xf32> -> vector<96x256xf32>
    %433 = vector.extract_strided_slice %432 {offsets = [0, 0], sizes = [8, 256], strides = [1, 1]} : vector<96x256xf32> to vector<8x256xf32>
    %434 = vector.extract_strided_slice %432 {offsets = [8, 0], sizes = [8, 256], strides = [1, 1]} : vector<96x256xf32> to vector<8x256xf32>
    %435 = vector.extract_strided_slice %432 {offsets = [16, 0], sizes = [8, 256], strides = [1, 1]} : vector<96x256xf32> to vector<8x256xf32>
    %436 = vector.extract_strided_slice %432 {offsets = [24, 0], sizes = [8, 256], strides = [1, 1]} : vector<96x256xf32> to vector<8x256xf32>
    %437 = vector.extract_strided_slice %432 {offsets = [32, 0], sizes = [8, 256], strides = [1, 1]} : vector<96x256xf32> to vector<8x256xf32>
    %438 = vector.extract_strided_slice %432 {offsets = [40, 0], sizes = [8, 256], strides = [1, 1]} : vector<96x256xf32> to vector<8x256xf32>
    %439 = arith.mulf %433, %434 : vector<8x256xf32>
    %cst_135 = arith.constant dense<0.000000e+00> : vector<256xf32>
    %440 = vector.multi_reduction <add>, %439, %cst_135 [0] : vector<8x256xf32> to vector<256xf32>
    %441 = vector.shape_cast %440 : vector<256xf32> to vector<1x256xf32>
    %cst_136 = arith.constant 0.353553385 : f32
    %442 = vector.broadcast %cst_136 : f32 to vector<1x256xf32>
    %443 = arith.mulf %441, %442 : vector<1x256xf32>
    %444 = arith.mulf %433, %437 : vector<8x256xf32>
    %cst_137 = arith.constant dense<0.000000e+00> : vector<256xf32>
    %445 = vector.multi_reduction <add>, %444, %cst_137 [0] : vector<8x256xf32> to vector<256xf32>
    %446 = vector.shape_cast %445 : vector<256xf32> to vector<1x256xf32>
    %cst_138 = arith.constant 0.353553385 : f32
    %447 = vector.broadcast %cst_138 : f32 to vector<1x256xf32>
    %448 = arith.mulf %446, %447 : vector<1x256xf32>
    %449 = arith.mulf %436, %434 : vector<8x256xf32>
    %cst_139 = arith.constant dense<0.000000e+00> : vector<256xf32>
    %450 = vector.multi_reduction <add>, %449, %cst_139 [0] : vector<8x256xf32> to vector<256xf32>
    %451 = vector.shape_cast %450 : vector<256xf32> to vector<1x256xf32>
    %cst_140 = arith.constant 0.353553385 : f32
    %452 = vector.broadcast %cst_140 : f32 to vector<1x256xf32>
    %453 = arith.mulf %451, %452 : vector<1x256xf32>
    %454 = arith.mulf %436, %437 : vector<8x256xf32>
    %cst_141 = arith.constant dense<0.000000e+00> : vector<256xf32>
    %455 = vector.multi_reduction <add>, %454, %cst_141 [0] : vector<8x256xf32> to vector<256xf32>
    %456 = vector.shape_cast %455 : vector<256xf32> to vector<1x256xf32>
    %cst_142 = arith.constant 0.353553385 : f32
    %457 = vector.broadcast %cst_142 : f32 to vector<1x256xf32>
    %458 = arith.mulf %456, %457 : vector<1x256xf32>
    %cst_143 = arith.constant dense<0xFF800000> : vector<1xf32>
    %459 = vector.multi_reduction <maximumf>, %443, %cst_143 [1] : vector<1x256xf32> to vector<1xf32>
    %460 = vector.shape_cast %459 : vector<1xf32> to vector<1x1xf32>
    %cst_144 = arith.constant dense<0xFF800000> : vector<1xf32>
    %461 = vector.multi_reduction <maximumf>, %460, %cst_144 [0] : vector<1x1xf32> to vector<1xf32>
    %462 = vector.shape_cast %461 : vector<1xf32> to vector<1x1xf32>
    %cst_145 = arith.constant dense<0xFF800000> : vector<1xf32>
    %463 = vector.multi_reduction <maximumf>, %448, %cst_145 [1] : vector<1x256xf32> to vector<1xf32>
    %464 = vector.shape_cast %463 : vector<1xf32> to vector<1x1xf32>
    %cst_146 = arith.constant dense<0xFF800000> : vector<1xf32>
    %465 = vector.multi_reduction <maximumf>, %464, %cst_146 [0] : vector<1x1xf32> to vector<1xf32>
    %466 = vector.shape_cast %465 : vector<1xf32> to vector<1x1xf32>
    %467 = arith.maximumf %462, %466 : vector<1x1xf32>
    %468 = vector.broadcast %467 : vector<1x1xf32> to vector<1x256xf32>
    %469 = arith.subf %443, %468 : vector<1x256xf32>
    %470 = math.exp %469 : vector<1x256xf32>
    %471 = arith.mulf %470, %0 : vector<1x256xf32>
    %472 = vector.broadcast %467 : vector<1x1xf32> to vector<1x256xf32>
    %473 = arith.subf %448, %472 : vector<1x256xf32>
    %474 = math.exp %473 : vector<1x256xf32>
    %475 = arith.mulf %474, %0 : vector<1x256xf32>
    %cst_147 = arith.constant dense<0.000000e+00> : vector<1xf32>
    %476 = vector.multi_reduction <add>, %471, %cst_147 [1] : vector<1x256xf32> to vector<1xf32>
    %477 = vector.shape_cast %476 : vector<1xf32> to vector<1x1xf32>
    %cst_148 = arith.constant dense<0.000000e+00> : vector<1xf32>
    %478 = vector.multi_reduction <add>, %477, %cst_148 [0] : vector<1x1xf32> to vector<1xf32>
    %479 = vector.shape_cast %478 : vector<1xf32> to vector<1x1xf32>
    %cst_149 = arith.constant dense<0.000000e+00> : vector<1xf32>
    %480 = vector.multi_reduction <add>, %475, %cst_149 [1] : vector<1x256xf32> to vector<1xf32>
    %481 = vector.shape_cast %480 : vector<1xf32> to vector<1x1xf32>
    %cst_150 = arith.constant dense<0.000000e+00> : vector<1xf32>
    %482 = vector.multi_reduction <add>, %481, %cst_150 [0] : vector<1x1xf32> to vector<1xf32>
    %483 = vector.shape_cast %482 : vector<1xf32> to vector<1x1xf32>
    %484 = arith.addf %479, %483 : vector<1x1xf32>
    %485 = tpu.reciprocal %484 {approx = true} : vector<1x1xf32> -> vector<1x1xf32>
    %486 = vector.broadcast %485 : vector<1x1xf32> to vector<1x256xf32>
    %487 = arith.mulf %471, %486 : vector<1x256xf32>
    %488 = vector.broadcast %485 : vector<1x1xf32> to vector<1x256xf32>
    %489 = arith.mulf %475, %488 : vector<1x256xf32>
    %cst_151 = arith.constant dense<0xFF800000> : vector<1xf32>
    %490 = vector.multi_reduction <maximumf>, %453, %cst_151 [1] : vector<1x256xf32> to vector<1xf32>
    %491 = vector.shape_cast %490 : vector<1xf32> to vector<1x1xf32>
    %cst_152 = arith.constant dense<0xFF800000> : vector<1xf32>
    %492 = vector.multi_reduction <maximumf>, %491, %cst_152 [0] : vector<1x1xf32> to vector<1xf32>
    %493 = vector.shape_cast %492 : vector<1xf32> to vector<1x1xf32>
    %cst_153 = arith.constant dense<0xFF800000> : vector<1xf32>
    %494 = vector.multi_reduction <maximumf>, %458, %cst_153 [1] : vector<1x256xf32> to vector<1xf32>
    %495 = vector.shape_cast %494 : vector<1xf32> to vector<1x1xf32>
    %cst_154 = arith.constant dense<0xFF800000> : vector<1xf32>
    %496 = vector.multi_reduction <maximumf>, %495, %cst_154 [0] : vector<1x1xf32> to vector<1xf32>
    %497 = vector.shape_cast %496 : vector<1xf32> to vector<1x1xf32>
    %498 = arith.maximumf %493, %497 : vector<1x1xf32>
    %499 = vector.broadcast %498 : vector<1x1xf32> to vector<1x256xf32>
    %500 = arith.subf %453, %499 : vector<1x256xf32>
    %501 = math.exp %500 : vector<1x256xf32>
    %502 = arith.mulf %501, %0 : vector<1x256xf32>
    %503 = vector.broadcast %498 : vector<1x1xf32> to vector<1x256xf32>
    %504 = arith.subf %458, %503 : vector<1x256xf32>
    %505 = math.exp %504 : vector<1x256xf32>
    %506 = arith.mulf %505, %0 : vector<1x256xf32>
    %cst_155 = arith.constant dense<0.000000e+00> : vector<1xf32>
    %507 = vector.multi_reduction <add>, %502, %cst_155 [1] : vector<1x256xf32> to vector<1xf32>
    %508 = vector.shape_cast %507 : vector<1xf32> to vector<1x1xf32>
    %cst_156 = arith.constant dense<0.000000e+00> : vector<1xf32>
    %509 = vector.multi_reduction <add>, %508, %cst_156 [0] : vector<1x1xf32> to vector<1xf32>
    %510 = vector.shape_cast %509 : vector<1xf32> to vector<1x1xf32>
    %cst_157 = arith.constant dense<0.000000e+00> : vector<1xf32>
    %511 = vector.multi_reduction <add>, %506, %cst_157 [1] : vector<1x256xf32> to vector<1xf32>
    %512 = vector.shape_cast %511 : vector<1xf32> to vector<1x1xf32>
    %cst_158 = arith.constant dense<0.000000e+00> : vector<1xf32>
    %513 = vector.multi_reduction <add>, %512, %cst_158 [0] : vector<1x1xf32> to vector<1xf32>
    %514 = vector.shape_cast %513 : vector<1xf32> to vector<1x1xf32>
    %515 = arith.addf %510, %514 : vector<1x1xf32>
    %516 = tpu.reciprocal %515 {approx = true} : vector<1x1xf32> -> vector<1x1xf32>
    %517 = vector.broadcast %516 : vector<1x1xf32> to vector<1x256xf32>
    %518 = arith.mulf %502, %517 : vector<1x256xf32>
    %519 = vector.broadcast %516 : vector<1x1xf32> to vector<1x256xf32>
    %520 = arith.mulf %506, %519 : vector<1x256xf32>
    %521 = vector.broadcast %487 : vector<1x256xf32> to vector<8x256xf32>
    %522 = arith.mulf %521, %435 : vector<8x256xf32>
    %523 = vector.broadcast %489 : vector<1x256xf32> to vector<8x256xf32>
    %524 = arith.mulf %523, %438 : vector<8x256xf32>
    %525 = arith.addf %522, %524 : vector<8x256xf32>
    %526 = vector.broadcast %518 : vector<1x256xf32> to vector<8x256xf32>
    %527 = arith.mulf %526, %435 : vector<8x256xf32>
    %528 = vector.broadcast %520 : vector<1x256xf32> to vector<8x256xf32>
    %529 = arith.mulf %528, %438 : vector<8x256xf32>
    %530 = arith.addf %527, %529 : vector<8x256xf32>
    %531 = tpu.concatenate %525, %530 in 1 : vector<8x256xf32>, vector<8x256xf32> -> vector<8x512xf32>
    %532 = vector.extract_strided_slice %432 {offsets = [48, 0], sizes = [8, 256], strides = [1, 1]} : vector<96x256xf32> to vector<8x256xf32>
    %533 = vector.extract_strided_slice %432 {offsets = [56, 0], sizes = [8, 256], strides = [1, 1]} : vector<96x256xf32> to vector<8x256xf32>
    %534 = vector.extract_strided_slice %432 {offsets = [64, 0], sizes = [8, 256], strides = [1, 1]} : vector<96x256xf32> to vector<8x256xf32>
    %535 = vector.extract_strided_slice %432 {offsets = [72, 0], sizes = [8, 256], strides = [1, 1]} : vector<96x256xf32> to vector<8x256xf32>
    %536 = vector.extract_strided_slice %432 {offsets = [80, 0], sizes = [8, 256], strides = [1, 1]} : vector<96x256xf32> to vector<8x256xf32>
    %537 = vector.extract_strided_slice %432 {offsets = [88, 0], sizes = [8, 256], strides = [1, 1]} : vector<96x256xf32> to vector<8x256xf32>
    %538 = arith.mulf %532, %533 : vector<8x256xf32>
    %cst_159 = arith.constant dense<0.000000e+00> : vector<256xf32>
    %539 = vector.multi_reduction <add>, %538, %cst_159 [0] : vector<8x256xf32> to vector<256xf32>
    %540 = vector.shape_cast %539 : vector<256xf32> to vector<1x256xf32>
    %cst_160 = arith.constant 0.353553385 : f32
    %541 = vector.broadcast %cst_160 : f32 to vector<1x256xf32>
    %542 = arith.mulf %540, %541 : vector<1x256xf32>
    %543 = arith.mulf %532, %536 : vector<8x256xf32>
    %cst_161 = arith.constant dense<0.000000e+00> : vector<256xf32>
    %544 = vector.multi_reduction <add>, %543, %cst_161 [0] : vector<8x256xf32> to vector<256xf32>
    %545 = vector.shape_cast %544 : vector<256xf32> to vector<1x256xf32>
    %cst_162 = arith.constant 0.353553385 : f32
    %546 = vector.broadcast %cst_162 : f32 to vector<1x256xf32>
    %547 = arith.mulf %545, %546 : vector<1x256xf32>
    %548 = arith.mulf %535, %533 : vector<8x256xf32>
    %cst_163 = arith.constant dense<0.000000e+00> : vector<256xf32>
    %549 = vector.multi_reduction <add>, %548, %cst_163 [0] : vector<8x256xf32> to vector<256xf32>
    %550 = vector.shape_cast %549 : vector<256xf32> to vector<1x256xf32>
    %cst_164 = arith.constant 0.353553385 : f32
    %551 = vector.broadcast %cst_164 : f32 to vector<1x256xf32>
    %552 = arith.mulf %550, %551 : vector<1x256xf32>
    %553 = arith.mulf %535, %536 : vector<8x256xf32>
    %cst_165 = arith.constant dense<0.000000e+00> : vector<256xf32>
    %554 = vector.multi_reduction <add>, %553, %cst_165 [0] : vector<8x256xf32> to vector<256xf32>
    %555 = vector.shape_cast %554 : vector<256xf32> to vector<1x256xf32>
    %cst_166 = arith.constant 0.353553385 : f32
    %556 = vector.broadcast %cst_166 : f32 to vector<1x256xf32>
    %557 = arith.mulf %555, %556 : vector<1x256xf32>
    %cst_167 = arith.constant dense<0xFF800000> : vector<1xf32>
    %558 = vector.multi_reduction <maximumf>, %542, %cst_167 [1] : vector<1x256xf32> to vector<1xf32>
    %559 = vector.shape_cast %558 : vector<1xf32> to vector<1x1xf32>
    %cst_168 = arith.constant dense<0xFF800000> : vector<1xf32>
    %560 = vector.multi_reduction <maximumf>, %559, %cst_168 [0] : vector<1x1xf32> to vector<1xf32>
    %561 = vector.shape_cast %560 : vector<1xf32> to vector<1x1xf32>
    %cst_169 = arith.constant dense<0xFF800000> : vector<1xf32>
    %562 = vector.multi_reduction <maximumf>, %547, %cst_169 [1] : vector<1x256xf32> to vector<1xf32>
    %563 = vector.shape_cast %562 : vector<1xf32> to vector<1x1xf32>
    %cst_170 = arith.constant dense<0xFF800000> : vector<1xf32>
    %564 = vector.multi_reduction <maximumf>, %563, %cst_170 [0] : vector<1x1xf32> to vector<1xf32>
    %565 = vector.shape_cast %564 : vector<1xf32> to vector<1x1xf32>
    %566 = arith.maximumf %561, %565 : vector<1x1xf32>
    %567 = vector.broadcast %566 : vector<1x1xf32> to vector<1x256xf32>
    %568 = arith.subf %542, %567 : vector<1x256xf32>
    %569 = math.exp %568 : vector<1x256xf32>
    %570 = arith.mulf %569, %0 : vector<1x256xf32>
    %571 = vector.broadcast %566 : vector<1x1xf32> to vector<1x256xf32>
    %572 = arith.subf %547, %571 : vector<1x256xf32>
    %573 = math.exp %572 : vector<1x256xf32>
    %574 = arith.mulf %573, %0 : vector<1x256xf32>
    %cst_171 = arith.constant dense<0.000000e+00> : vector<1xf32>
    %575 = vector.multi_reduction <add>, %570, %cst_171 [1] : vector<1x256xf32> to vector<1xf32>
    %576 = vector.shape_cast %575 : vector<1xf32> to vector<1x1xf32>
    %cst_172 = arith.constant dense<0.000000e+00> : vector<1xf32>
    %577 = vector.multi_reduction <add>, %576, %cst_172 [0] : vector<1x1xf32> to vector<1xf32>
    %578 = vector.shape_cast %577 : vector<1xf32> to vector<1x1xf32>
    %cst_173 = arith.constant dense<0.000000e+00> : vector<1xf32>
    %579 = vector.multi_reduction <add>, %574, %cst_173 [1] : vector<1x256xf32> to vector<1xf32>
    %580 = vector.shape_cast %579 : vector<1xf32> to vector<1x1xf32>
    %cst_174 = arith.constant dense<0.000000e+00> : vector<1xf32>
    %581 = vector.multi_reduction <add>, %580, %cst_174 [0] : vector<1x1xf32> to vector<1xf32>
    %582 = vector.shape_cast %581 : vector<1xf32> to vector<1x1xf32>
    %583 = arith.addf %578, %582 : vector<1x1xf32>
    %584 = tpu.reciprocal %583 {approx = true} : vector<1x1xf32> -> vector<1x1xf32>
    %585 = vector.broadcast %584 : vector<1x1xf32> to vector<1x256xf32>
    %586 = arith.mulf %570, %585 : vector<1x256xf32>
    %587 = vector.broadcast %584 : vector<1x1xf32> to vector<1x256xf32>
    %588 = arith.mulf %574, %587 : vector<1x256xf32>
    %cst_175 = arith.constant dense<0xFF800000> : vector<1xf32>
    %589 = vector.multi_reduction <maximumf>, %552, %cst_175 [1] : vector<1x256xf32> to vector<1xf32>
    %590 = vector.shape_cast %589 : vector<1xf32> to vector<1x1xf32>
    %cst_176 = arith.constant dense<0xFF800000> : vector<1xf32>
    %591 = vector.multi_reduction <maximumf>, %590, %cst_176 [0] : vector<1x1xf32> to vector<1xf32>
    %592 = vector.shape_cast %591 : vector<1xf32> to vector<1x1xf32>
    %cst_177 = arith.constant dense<0xFF800000> : vector<1xf32>
    %593 = vector.multi_reduction <maximumf>, %557, %cst_177 [1] : vector<1x256xf32> to vector<1xf32>
    %594 = vector.shape_cast %593 : vector<1xf32> to vector<1x1xf32>
    %cst_178 = arith.constant dense<0xFF800000> : vector<1xf32>
    %595 = vector.multi_reduction <maximumf>, %594, %cst_178 [0] : vector<1x1xf32> to vector<1xf32>
    %596 = vector.shape_cast %595 : vector<1xf32> to vector<1x1xf32>
    %597 = arith.maximumf %592, %596 : vector<1x1xf32>
    %598 = vector.broadcast %597 : vector<1x1xf32> to vector<1x256xf32>
    %599 = arith.subf %552, %598 : vector<1x256xf32>
    %600 = math.exp %599 : vector<1x256xf32>
    %601 = arith.mulf %600, %0 : vector<1x256xf32>
    %602 = vector.broadcast %597 : vector<1x1xf32> to vector<1x256xf32>
    %603 = arith.subf %557, %602 : vector<1x256xf32>
    %604 = math.exp %603 : vector<1x256xf32>
    %605 = arith.mulf %604, %0 : vector<1x256xf32>
    %cst_179 = arith.constant dense<0.000000e+00> : vector<1xf32>
    %606 = vector.multi_reduction <add>, %601, %cst_179 [1] : vector<1x256xf32> to vector<1xf32>
    %607 = vector.shape_cast %606 : vector<1xf32> to vector<1x1xf32>
    %cst_180 = arith.constant dense<0.000000e+00> : vector<1xf32>
    %608 = vector.multi_reduction <add>, %607, %cst_180 [0] : vector<1x1xf32> to vector<1xf32>
    %609 = vector.shape_cast %608 : vector<1xf32> to vector<1x1xf32>
    %cst_181 = arith.constant dense<0.000000e+00> : vector<1xf32>
    %610 = vector.multi_reduction <add>, %605, %cst_181 [1] : vector<1x256xf32> to vector<1xf32>
    %611 = vector.shape_cast %610 : vector<1xf32> to vector<1x1xf32>
    %cst_182 = arith.constant dense<0.000000e+00> : vector<1xf32>
    %612 = vector.multi_reduction <add>, %611, %cst_182 [0] : vector<1x1xf32> to vector<1xf32>
    %613 = vector.shape_cast %612 : vector<1xf32> to vector<1x1xf32>
    %614 = arith.addf %609, %613 : vector<1x1xf32>
    %615 = tpu.reciprocal %614 {approx = true} : vector<1x1xf32> -> vector<1x1xf32>
    %616 = vector.broadcast %615 : vector<1x1xf32> to vector<1x256xf32>
    %617 = arith.mulf %601, %616 : vector<1x256xf32>
    %618 = vector.broadcast %615 : vector<1x1xf32> to vector<1x256xf32>
    %619 = arith.mulf %605, %618 : vector<1x256xf32>
    %620 = vector.broadcast %586 : vector<1x256xf32> to vector<8x256xf32>
    %621 = arith.mulf %620, %534 : vector<8x256xf32>
    %622 = vector.broadcast %588 : vector<1x256xf32> to vector<8x256xf32>
    %623 = arith.mulf %622, %537 : vector<8x256xf32>
    %624 = arith.addf %621, %623 : vector<8x256xf32>
    %625 = vector.broadcast %617 : vector<1x256xf32> to vector<8x256xf32>
    %626 = arith.mulf %625, %534 : vector<8x256xf32>
    %627 = vector.broadcast %619 : vector<1x256xf32> to vector<8x256xf32>
    %628 = arith.mulf %627, %537 : vector<8x256xf32>
    %629 = arith.addf %626, %628 : vector<8x256xf32>
    %630 = tpu.concatenate %624, %629 in 1 : vector<8x256xf32>, vector<8x256xf32> -> vector<8x512xf32>
    %631 = tpu.concatenate %531, %630 in 0 : vector<8x512xf32>, vector<8x512xf32> -> vector<16x512xf32>
    %cst_183 = arith.constant dense<0.000000e+00> : vector<8x512xf32>
    %632 = tpu.matmul %24, %631, %cst_183 {dimension_numbers = #tpu.dot_dimension_numbers<[1], [0], [0], [1], [0, 0, 1, 1], [], []>} : vector<8x16xf32>, vector<16x512xf32>, vector<8x512xf32> -> vector<8x512xf32>
    %633 = vector.extract_strided_slice %632 {offsets = [0, 0], sizes = [8, 256], strides = [1, 1]} : vector<8x512xf32> to vector<8x256xf32>
    %634 = arith.addf %633, %405 : vector<8x256xf32>
    %635 = vector.extract_strided_slice %632 {offsets = [0, 256], sizes = [8, 256], strides = [1, 1]} : vector<8x512xf32> to vector<8x256xf32>
    %636 = arith.addf %635, %407 : vector<8x256xf32>
    %cst_184 = arith.constant dense<0.000000e+00> : vector<8xf32>
    %637 = vector.multi_reduction <add>, %634, %cst_184 [1] : vector<8x256xf32> to vector<8xf32>
    %638 = vector.shape_cast %637 : vector<8xf32> to vector<8x1xf32>
    %cst_185 = arith.constant dense<0.000000e+00> : vector<1xf32>
    %639 = vector.multi_reduction <add>, %638, %cst_185 [0] : vector<8x1xf32> to vector<1xf32>
    %640 = vector.shape_cast %639 : vector<1xf32> to vector<1x1xf32>
    %cst_186 = arith.constant 6.37755089E-4 : f32
    %641 = vector.broadcast %cst_186 : f32 to vector<1x1xf32>
    %642 = arith.mulf %640, %641 : vector<1x1xf32>
    %643 = vector.broadcast %642 : vector<1x1xf32> to vector<8x256xf32>
    %644 = arith.subf %634, %643 : vector<8x256xf32>
    %645 = vector.broadcast %0 : vector<1x256xf32> to vector<8x256xf32>
    %646 = arith.mulf %644, %645 : vector<8x256xf32>
    %647 = arith.mulf %646, %646 : vector<8x256xf32>
    %cst_187 = arith.constant dense<0.000000e+00> : vector<8xf32>
    %648 = vector.multi_reduction <add>, %647, %cst_187 [1] : vector<8x256xf32> to vector<8xf32>
    %649 = vector.shape_cast %648 : vector<8xf32> to vector<8x1xf32>
    %cst_188 = arith.constant dense<0.000000e+00> : vector<1xf32>
    %650 = vector.multi_reduction <add>, %649, %cst_188 [0] : vector<8x1xf32> to vector<1xf32>
    %651 = vector.shape_cast %650 : vector<1xf32> to vector<1x1xf32>
    %cst_189 = arith.constant 6.37755089E-4 : f32
    %652 = vector.broadcast %cst_189 : f32 to vector<1x1xf32>
    %653 = arith.mulf %651, %652 : vector<1x1xf32>
    %cst_190 = arith.constant 9.99999974E-6 : f32
    %654 = vector.broadcast %cst_190 : f32 to vector<1x1xf32>
    %655 = arith.addf %653, %654 : vector<1x1xf32>
    %656 = math.rsqrt %655 : vector<1x1xf32>
    %657 = vector.broadcast %656 : vector<1x1xf32> to vector<8x256xf32>
    %658 = arith.mulf %657, %19 : vector<8x256xf32>
    %659 = arith.mulf %646, %658 : vector<8x256xf32>
    %660 = arith.addf %659, %20 : vector<8x256xf32>
    %cst_191 = arith.constant dense<0.000000e+00> : vector<8xf32>
    %661 = vector.multi_reduction <add>, %636, %cst_191 [1] : vector<8x256xf32> to vector<8xf32>
    %662 = vector.shape_cast %661 : vector<8xf32> to vector<8x1xf32>
    %cst_192 = arith.constant dense<0.000000e+00> : vector<1xf32>
    %663 = vector.multi_reduction <add>, %662, %cst_192 [0] : vector<8x1xf32> to vector<1xf32>
    %664 = vector.shape_cast %663 : vector<1xf32> to vector<1x1xf32>
    %cst_193 = arith.constant 6.37755089E-4 : f32
    %665 = vector.broadcast %cst_193 : f32 to vector<1x1xf32>
    %666 = arith.mulf %664, %665 : vector<1x1xf32>
    %667 = vector.broadcast %666 : vector<1x1xf32> to vector<8x256xf32>
    %668 = arith.subf %636, %667 : vector<8x256xf32>
    %669 = vector.broadcast %0 : vector<1x256xf32> to vector<8x256xf32>
    %670 = arith.mulf %668, %669 : vector<8x256xf32>
    %671 = arith.mulf %670, %670 : vector<8x256xf32>
    %cst_194 = arith.constant dense<0.000000e+00> : vector<8xf32>
    %672 = vector.multi_reduction <add>, %671, %cst_194 [1] : vector<8x256xf32> to vector<8xf32>
    %673 = vector.shape_cast %672 : vector<8xf32> to vector<8x1xf32>
    %cst_195 = arith.constant dense<0.000000e+00> : vector<1xf32>
    %674 = vector.multi_reduction <add>, %673, %cst_195 [0] : vector<8x1xf32> to vector<1xf32>
    %675 = vector.shape_cast %674 : vector<1xf32> to vector<1x1xf32>
    %cst_196 = arith.constant 6.37755089E-4 : f32
    %676 = vector.broadcast %cst_196 : f32 to vector<1x1xf32>
    %677 = arith.mulf %675, %676 : vector<1x1xf32>
    %cst_197 = arith.constant 9.99999974E-6 : f32
    %678 = vector.broadcast %cst_197 : f32 to vector<1x1xf32>
    %679 = arith.addf %677, %678 : vector<1x1xf32>
    %680 = math.rsqrt %679 : vector<1x1xf32>
    %681 = vector.broadcast %680 : vector<1x1xf32> to vector<8x256xf32>
    %682 = arith.mulf %681, %21 : vector<8x256xf32>
    %683 = arith.mulf %670, %682 : vector<8x256xf32>
    %684 = arith.addf %683, %22 : vector<8x256xf32>
    %685 = vector.extract_strided_slice %660 {offsets = [0, 241], sizes = [8, 15], strides = [1, 1]} : vector<8x256xf32> to vector<8x15xf32>
    %686 = vector.extract_strided_slice %660 {offsets = [0, 0], sizes = [8, 241], strides = [1, 1]} : vector<8x256xf32> to vector<8x241xf32>
    %687 = tpu.concatenate %685, %686 in 1 : vector<8x15xf32>, vector<8x241xf32> -> vector<8x256xf32>
    %688 = vector.broadcast %2 : vector<1x256xf32> to vector<8x256xf32>
    %689 = arith.mulf %687, %688 : vector<8x256xf32>
    %690 = vector.extract_strided_slice %660 {offsets = [0, 242], sizes = [8, 14], strides = [1, 1]} : vector<8x256xf32> to vector<8x14xf32>
    %691 = vector.extract_strided_slice %660 {offsets = [0, 0], sizes = [8, 242], strides = [1, 1]} : vector<8x256xf32> to vector<8x242xf32>
    %692 = tpu.concatenate %690, %691 in 1 : vector<8x14xf32>, vector<8x242xf32> -> vector<8x256xf32>
    %693 = vector.broadcast %4 : vector<1x256xf32> to vector<8x256xf32>
    %694 = arith.mulf %692, %693 : vector<8x256xf32>
    %695 = vector.extract_strided_slice %660 {offsets = [0, 243], sizes = [8, 13], strides = [1, 1]} : vector<8x256xf32> to vector<8x13xf32>
    %696 = vector.extract_strided_slice %660 {offsets = [0, 0], sizes = [8, 243], strides = [1, 1]} : vector<8x256xf32> to vector<8x243xf32>
    %697 = tpu.concatenate %695, %696 in 1 : vector<8x13xf32>, vector<8x243xf32> -> vector<8x256xf32>
    %698 = vector.broadcast %6 : vector<1x256xf32> to vector<8x256xf32>
    %699 = arith.mulf %697, %698 : vector<8x256xf32>
    %700 = vector.extract_strided_slice %660 {offsets = [0, 255], sizes = [8, 1], strides = [1, 1]} : vector<8x256xf32> to vector<8x1xf32>
    %701 = vector.extract_strided_slice %660 {offsets = [0, 0], sizes = [8, 255], strides = [1, 1]} : vector<8x256xf32> to vector<8x255xf32>
    %702 = tpu.concatenate %700, %701 in 1 : vector<8x1xf32>, vector<8x255xf32> -> vector<8x256xf32>
    %703 = vector.broadcast %8 : vector<1x256xf32> to vector<8x256xf32>
    %704 = arith.mulf %702, %703 : vector<8x256xf32>
    %705 = vector.extract_strided_slice %660 {offsets = [0, 1], sizes = [8, 255], strides = [1, 1]} : vector<8x256xf32> to vector<8x255xf32>
    %706 = vector.extract_strided_slice %660 {offsets = [0, 0], sizes = [8, 1], strides = [1, 1]} : vector<8x256xf32> to vector<8x1xf32>
    %707 = tpu.concatenate %705, %706 in 1 : vector<8x255xf32>, vector<8x1xf32> -> vector<8x256xf32>
    %708 = vector.broadcast %10 : vector<1x256xf32> to vector<8x256xf32>
    %709 = arith.mulf %707, %708 : vector<8x256xf32>
    %710 = vector.extract_strided_slice %660 {offsets = [0, 13], sizes = [8, 243], strides = [1, 1]} : vector<8x256xf32> to vector<8x243xf32>
    %711 = vector.extract_strided_slice %660 {offsets = [0, 0], sizes = [8, 13], strides = [1, 1]} : vector<8x256xf32> to vector<8x13xf32>
    %712 = tpu.concatenate %710, %711 in 1 : vector<8x243xf32>, vector<8x13xf32> -> vector<8x256xf32>
    %713 = vector.broadcast %12 : vector<1x256xf32> to vector<8x256xf32>
    %714 = arith.mulf %712, %713 : vector<8x256xf32>
    %715 = vector.extract_strided_slice %660 {offsets = [0, 14], sizes = [8, 242], strides = [1, 1]} : vector<8x256xf32> to vector<8x242xf32>
    %716 = vector.extract_strided_slice %660 {offsets = [0, 0], sizes = [8, 14], strides = [1, 1]} : vector<8x256xf32> to vector<8x14xf32>
    %717 = tpu.concatenate %715, %716 in 1 : vector<8x242xf32>, vector<8x14xf32> -> vector<8x256xf32>
    %718 = vector.broadcast %14 : vector<1x256xf32> to vector<8x256xf32>
    %719 = arith.mulf %717, %718 : vector<8x256xf32>
    %720 = vector.extract_strided_slice %660 {offsets = [0, 15], sizes = [8, 241], strides = [1, 1]} : vector<8x256xf32> to vector<8x241xf32>
    %721 = vector.extract_strided_slice %660 {offsets = [0, 0], sizes = [8, 15], strides = [1, 1]} : vector<8x256xf32> to vector<8x15xf32>
    %722 = tpu.concatenate %720, %721 in 1 : vector<8x241xf32>, vector<8x15xf32> -> vector<8x256xf32>
    %723 = vector.broadcast %16 : vector<1x256xf32> to vector<8x256xf32>
    %724 = arith.mulf %722, %723 : vector<8x256xf32>
    %725 = vector.extract_strided_slice %684 {offsets = [0, 241], sizes = [8, 15], strides = [1, 1]} : vector<8x256xf32> to vector<8x15xf32>
    %726 = vector.extract_strided_slice %684 {offsets = [0, 0], sizes = [8, 241], strides = [1, 1]} : vector<8x256xf32> to vector<8x241xf32>
    %727 = tpu.concatenate %725, %726 in 1 : vector<8x15xf32>, vector<8x241xf32> -> vector<8x256xf32>
    %728 = vector.broadcast %2 : vector<1x256xf32> to vector<8x256xf32>
    %729 = arith.mulf %727, %728 : vector<8x256xf32>
    %730 = vector.extract_strided_slice %684 {offsets = [0, 242], sizes = [8, 14], strides = [1, 1]} : vector<8x256xf32> to vector<8x14xf32>
    %731 = vector.extract_strided_slice %684 {offsets = [0, 0], sizes = [8, 242], strides = [1, 1]} : vector<8x256xf32> to vector<8x242xf32>
    %732 = tpu.concatenate %730, %731 in 1 : vector<8x14xf32>, vector<8x242xf32> -> vector<8x256xf32>
    %733 = vector.broadcast %4 : vector<1x256xf32> to vector<8x256xf32>
    %734 = arith.mulf %732, %733 : vector<8x256xf32>
    %735 = vector.extract_strided_slice %684 {offsets = [0, 243], sizes = [8, 13], strides = [1, 1]} : vector<8x256xf32> to vector<8x13xf32>
    %736 = vector.extract_strided_slice %684 {offsets = [0, 0], sizes = [8, 243], strides = [1, 1]} : vector<8x256xf32> to vector<8x243xf32>
    %737 = tpu.concatenate %735, %736 in 1 : vector<8x13xf32>, vector<8x243xf32> -> vector<8x256xf32>
    %738 = vector.broadcast %6 : vector<1x256xf32> to vector<8x256xf32>
    %739 = arith.mulf %737, %738 : vector<8x256xf32>
    %740 = vector.extract_strided_slice %684 {offsets = [0, 255], sizes = [8, 1], strides = [1, 1]} : vector<8x256xf32> to vector<8x1xf32>
    %741 = vector.extract_strided_slice %684 {offsets = [0, 0], sizes = [8, 255], strides = [1, 1]} : vector<8x256xf32> to vector<8x255xf32>
    %742 = tpu.concatenate %740, %741 in 1 : vector<8x1xf32>, vector<8x255xf32> -> vector<8x256xf32>
    %743 = vector.broadcast %8 : vector<1x256xf32> to vector<8x256xf32>
    %744 = arith.mulf %742, %743 : vector<8x256xf32>
    %745 = vector.extract_strided_slice %684 {offsets = [0, 1], sizes = [8, 255], strides = [1, 1]} : vector<8x256xf32> to vector<8x255xf32>
    %746 = vector.extract_strided_slice %684 {offsets = [0, 0], sizes = [8, 1], strides = [1, 1]} : vector<8x256xf32> to vector<8x1xf32>
    %747 = tpu.concatenate %745, %746 in 1 : vector<8x255xf32>, vector<8x1xf32> -> vector<8x256xf32>
    %748 = vector.broadcast %10 : vector<1x256xf32> to vector<8x256xf32>
    %749 = arith.mulf %747, %748 : vector<8x256xf32>
    %750 = vector.extract_strided_slice %684 {offsets = [0, 13], sizes = [8, 243], strides = [1, 1]} : vector<8x256xf32> to vector<8x243xf32>
    %751 = vector.extract_strided_slice %684 {offsets = [0, 0], sizes = [8, 13], strides = [1, 1]} : vector<8x256xf32> to vector<8x13xf32>
    %752 = tpu.concatenate %750, %751 in 1 : vector<8x243xf32>, vector<8x13xf32> -> vector<8x256xf32>
    %753 = vector.broadcast %12 : vector<1x256xf32> to vector<8x256xf32>
    %754 = arith.mulf %752, %753 : vector<8x256xf32>
    %755 = vector.extract_strided_slice %684 {offsets = [0, 14], sizes = [8, 242], strides = [1, 1]} : vector<8x256xf32> to vector<8x242xf32>
    %756 = vector.extract_strided_slice %684 {offsets = [0, 0], sizes = [8, 14], strides = [1, 1]} : vector<8x256xf32> to vector<8x14xf32>
    %757 = tpu.concatenate %755, %756 in 1 : vector<8x242xf32>, vector<8x14xf32> -> vector<8x256xf32>
    %758 = vector.broadcast %14 : vector<1x256xf32> to vector<8x256xf32>
    %759 = arith.mulf %757, %758 : vector<8x256xf32>
    %760 = vector.extract_strided_slice %684 {offsets = [0, 15], sizes = [8, 241], strides = [1, 1]} : vector<8x256xf32> to vector<8x241xf32>
    %761 = vector.extract_strided_slice %684 {offsets = [0, 0], sizes = [8, 15], strides = [1, 1]} : vector<8x256xf32> to vector<8x15xf32>
    %762 = tpu.concatenate %760, %761 in 1 : vector<8x241xf32>, vector<8x15xf32> -> vector<8x256xf32>
    %763 = vector.broadcast %16 : vector<1x256xf32> to vector<8x256xf32>
    %764 = arith.mulf %762, %763 : vector<8x256xf32>
    %765 = tpu.concatenate %689, %694, %699, %704, %660, %709, %714, %719, %724, %729, %734, %739, %744, %684, %749, %754 in 0 : vector<8x256xf32>, vector<8x256xf32>, vector<8x256xf32>, vector<8x256xf32>, vector<8x256xf32>, vector<8x256xf32>, vector<8x256xf32>, vector<8x256xf32>, vector<8x256xf32>, vector<8x256xf32>, vector<8x256xf32>, vector<8x256xf32>, vector<8x256xf32>, vector<8x256xf32>, vector<8x256xf32>, vector<8x256xf32> -> vector<128x256xf32>
    %766 = tpu.concatenate %759, %764 in 0 : vector<8x256xf32>, vector<8x256xf32> -> vector<16x256xf32>
    %767 = tpu.concatenate %765, %766 in 0 : vector<128x256xf32>, vector<16x256xf32> -> vector<144x256xf32>
    %cst_198 = arith.constant dense<0.000000e+00> : vector<16x256xf32>
    %768 = tpu.matmul %25, %767, %cst_198 {dimension_numbers = #tpu.dot_dimension_numbers<[1], [0], [0], [1], [0, 0, 1, 1], [], []>} : vector<16x144xf32>, vector<144x256xf32>, vector<16x256xf32> -> vector<16x256xf32>
    %769 = vector.broadcast %26 : vector<16x1xf32> to vector<16x256xf32>
    %770 = arith.addf %768, %769 : vector<16x256xf32>
    %771 = vector.extract_strided_slice %770 {offsets = [0, 0], sizes = [8, 256], strides = [1, 1]} : vector<16x256xf32> to vector<8x256xf32>
    %772 = arith.addf %771, %634 : vector<8x256xf32>
    %c1_199 = arith.constant 1 : index
    %c0_200 = arith.constant 0 : index
    %c0_201 = arith.constant 0 : index
    %773 = vector.load %arg15[%c1_199, %c0_200, %c0_201] : memref<2x8x256xf32, #tpu.memory_space<vmem>>, vector<1x8x256xf32>
    %774 = vector.shape_cast %773 : vector<1x8x256xf32> to vector<8x256xf32>
    %775 = vector.shape_cast %772 : vector<8x256xf32> to vector<1x8x256xf32>
    tpu.vector_store %arg15[%c1_199, %c0_200, %c0_201], %775 {strides = array<i32>} : memref<2x8x256xf32, #tpu.memory_space<vmem>>, vector<1x8x256xf32>,
    %776 = vector.extract_strided_slice %770 {offsets = [8, 0], sizes = [8, 256], strides = [1, 1]} : vector<16x256xf32> to vector<8x256xf32>
    %777 = arith.addf %776, %636 : vector<8x256xf32>
    %c1_202 = arith.constant 1 : index
    %c0_203 = arith.constant 0 : index
    %c0_204 = arith.constant 0 : index
    %778 = vector.load %arg16[%c1_202, %c0_203, %c0_204] : memref<2x8x256xf32, #tpu.memory_space<vmem>>, vector<1x8x256xf32>
    %779 = vector.shape_cast %778 : vector<1x8x256xf32> to vector<8x256xf32>
    %780 = vector.shape_cast %777 : vector<8x256xf32> to vector<1x8x256xf32>
    tpu.vector_store %arg16[%c1_202, %c0_203, %c0_204], %780 {strides = array<i32>} : memref<2x8x256xf32, #tpu.memory_space<vmem>>, vector<1x8x256xf32>,
    return
  }
  func.func @transform_0(%arg0: i32) -> (i32, i32, i32) {
    %c0_i32 = arith.constant 0 : i32
    %c0_i32_0 = arith.constant 0 : i32
    %c0_i32_1 = arith.constant 0 : i32
    return %arg0, %c0_i32, %c0_i32_0 : i32, i32, i32
  }
  func.func @transform_1(%arg0: i32) -> (i32, i32, i32) {
    %c0_i32 = arith.constant 0 : i32
    %c0_i32_0 = arith.constant 0 : i32
    %c0_i32_1 = arith.constant 0 : i32
    return %arg0, %c0_i32, %c0_i32_0 : i32, i32, i32
  }
  func.func @transform_2(%arg0: i32) -> (i32, i32) {
    %c0_i32 = arith.constant 0 : i32
    %c0_i32_0 = arith.constant 0 : i32
    %c0_i32_1 = arith.constant 0 : i32
    return %c0_i32, %c0_i32_0 : i32, i32
  }
  func.func @transform_3(%arg0: i32) -> (i32, i32, i32) {
    %c0_i32 = arith.constant 0 : i32
    %c0_i32_0 = arith.constant 0 : i32
    %c0_i32_1 = arith.constant 0 : i32
    %c0_i32_2 = arith.constant 0 : i32
    return %c0_i32, %c0_i32_0, %c0_i32_1 : i32, i32, i32
  }
  func.func @transform_4(%arg0: i32) -> (i32, i32) {
    %c0_i32 = arith.constant 0 : i32
    %c0_i32_0 = arith.constant 0 : i32
    %c0_i32_1 = arith.constant 0 : i32
    return %c0_i32, %c0_i32_0 : i32, i32
  }
  func.func @transform_5(%arg0: i32) -> (i32, i32) {
    %c0_i32 = arith.constant 0 : i32
    %c0_i32_0 = arith.constant 0 : i32
    %c0_i32_1 = arith.constant 0 : i32
    return %c0_i32, %c0_i32_0 : i32, i32
  }
  func.func @transform_6(%arg0: i32) -> (i32, i32) {
    %c0_i32 = arith.constant 0 : i32
    %c0_i32_0 = arith.constant 0 : i32
    %c0_i32_1 = arith.constant 0 : i32
    return %c0_i32, %c0_i32_0 : i32, i32
  }
  func.func @transform_7(%arg0: i32) -> (i32, i32) {
    %c0_i32 = arith.constant 0 : i32
    %c0_i32_0 = arith.constant 0 : i32
    %c0_i32_1 = arith.constant 0 : i32
    return %c0_i32, %c0_i32_0 : i32, i32
  }
  func.func @transform_8(%arg0: i32) -> (i32, i32) {
    %c0_i32 = arith.constant 0 : i32
    %c0_i32_0 = arith.constant 0 : i32
    %c0_i32_1 = arith.constant 0 : i32
    return %c0_i32, %c0_i32_0 : i32, i32
  }
  func.func @transform_9(%arg0: i32) -> (i32, i32) {
    %c0_i32 = arith.constant 0 : i32
    %c0_i32_0 = arith.constant 0 : i32
    %c0_i32_1 = arith.constant 0 : i32
    return %c0_i32, %c0_i32_0 : i32, i32
  }
  func.func @transform_10(%arg0: i32) -> (i32, i32) {
    %c0_i32 = arith.constant 0 : i32
    %c0_i32_0 = arith.constant 0 : i32
    %c0_i32_1 = arith.constant 0 : i32
    return %c0_i32, %c0_i32_0 : i32, i32
  }
  func.func @transform_11(%arg0: i32) -> (i32, i32) {
    %c0_i32 = arith.constant 0 : i32
    %c0_i32_0 = arith.constant 0 : i32
    %c0_i32_1 = arith.constant 0 : i32
    return %c0_i32, %c0_i32_0 : i32, i32
  }
  func.func @transform_12(%arg0: i32) -> (i32, i32) {
    %c0_i32 = arith.constant 0 : i32
    %c0_i32_0 = arith.constant 0 : i32
    %c0_i32_1 = arith.constant 0 : i32
    return %c0_i32, %c0_i32_0 : i32, i32
  }
  func.func @transform_13(%arg0: i32) -> (i32, i32) {
    %c0_i32 = arith.constant 0 : i32
    %c0_i32_0 = arith.constant 0 : i32
    %c0_i32_1 = arith.constant 0 : i32
    return %c0_i32, %c0_i32_0 : i32, i32
  }
  func.func @transform_14(%arg0: i32) -> (i32, i32, i32) {
    %c0_i32 = arith.constant 0 : i32
    %c0_i32_0 = arith.constant 0 : i32
    %c0_i32_1 = arith.constant 0 : i32
    return %arg0, %c0_i32, %c0_i32_0 : i32, i32, i32
  }
  func.func @transform_15(%arg0: i32) -> (i32, i32, i32) {
    %c0_i32 = arith.constant 0 : i32
    %c0_i32_0 = arith.constant 0 : i32
    %c0_i32_1 = arith.constant 0 : i32
    return %arg0, %c0_i32, %c0_i32_0 : i32, i32, i32
  }
}

</mosaic_0001>

<bundles_post_ra>
// kernel: tpu_custom_call.1
= control target key start
LH: loop header
LB: loop body
LE: loop exit
PB: predicated region body
PF: predicated region fallthrough
CT: control target
= control target key end

     0   :  { %21 = vsyncpa [#allocation3], 0  ;;  %s4259_s0 = inlined_call_operand.vmem [shape: f32[2,8,256], index: 0, kind: input, shape index: {}]   ;;  %s4260_s1 = inlined_call_operand.vmem [shape: f32[2,8,256], index: 1, kind: input, shape index: {}]   ;;  %s4261_s2 = inlined_call_operand.hbm [shape: f32[1,256], index: 2, kind: input, shape index: {}]   ;;  %s4262_s3 = inlined_call_operand.vmem [shape: f32[9,1,256], index: 3, kind: input, shape index: {}]   ;;  %s4263_s4 = inlined_call_operand.vmem [shape: f32[8,256], index: 4, kind: input, shape index: {}]   ;;  %s4264_s5 = inlined_call_operand.hbm [shape: f32[8,256], index: 5, kind: input, shape index: {}]   ;;  %s4265_s6 = inlined_call_operand.hbm [shape: f32[8,256], index: 6, kind: input, shape index: {}]   ;;  %s4266_s7 = inlined_call_operand.vmem [shape: f32[8,256], index: 7, kind: input, shape index: {}]   ;;  %s4267_s8 = inlined_call_operand.hbm [shape: f32[8,256], index: 8, kind: input, shape index: {}]   ;;  %s4268_s9 = inlined_call_operand.hbm [shape: f32[8,256], index: 9, kind: input, shape index: {}]   ;;  %s4269_s10 = inlined_call_operand.vmem [shape: f32[96,8], index: 10, kind: input, shape index: {}]   ;;  %s4270_s11 = inlined_call_operand.vmem [shape: f32[8,16], index: 11, kind: input, shape index: {}]   ;;  %s4271_s12 = inlined_call_operand.vmem [shape: f32[16,144], index: 12, kind: input, shape index: {}]   ;;  %s4272_s13 = inlined_call_operand.vmem [shape: f32[16,1], index: 13, kind: input, shape index: {}]   ;;  %s4273_s14 = inlined_call_operand.hbm [shape: f32[2,8,256], index: 14, kind: output, shape index: {0}]   ;;  %s4274_s15 = inlined_call_operand.hbm [shape: f32[2,8,256], index: 15, kind: output, shape index: {1}]  }
   0x1   :  { %22 = vsyncpa [#allocation6], 0 }
   0x2   :  { %23 = vsyncpa [#allocation9], 0 }
   0x3   :  { %24 = vsyncpa [#allocation4], 0 }
   0x4   :  { %25 = vsyncpa [#allocation13], 0  ;;  %s2841_s18 = smov [#allocation5]   ;;  %s2842_s20 = smov [#allocation8]  }
   0x5   :  { %s50_s19 = sshll.u32 %s2841_s18, 4  ;;  %s72_s21 = sshll.u32 %s2842_s20, 4  ;;  %s51_s19 = int_to_ptr.vmem [resolvable:$true] %s50_s19  ;;  %s73_s21 = int_to_ptr.vmem [resolvable:$true] %s72_s21 }
   0x6   :  { %s2677_s24 = scalar_lea.hbm %s4264_s5, 256 }
   0x7   :  { %p2678_p0 = scmp.ne.s32.totalorder %s4264_s5, %s2677_s24  ;;  %p2681_p1 = scmp.lt.u32.totalorder %s2677_s24, %s4264_s5 }
   0x9   :  { %p2683_p2 = pnand %p2681_p1, %p2678_p0 }
   0xb   :  { %2686 = shalt.err (!%p2683_p2)
}
   0xc   :  { %s2687_s29 = scalar_lea.vmem %s51_s19, 256  ;;  %p2692_p4 = scmp.lt.s32.totalorder %s51_s19, %s51_s19 }
   0xd   :  { %p2688_p3 = scmp.ne.s32.totalorder %s51_s19, %s2687_s29  ;;  %p2693_p5 = scmp.lt.s32.totalorder %s2687_s29, %s2687_s29 }
   0xf   :  { %p2694_p6 = por %p2693_p5, %p2692_p4 }
  0x11   :  { %p2695_p7 = pnand %p2694_p6, %p2688_p3 }
  0x13   :  { %2698 = shalt.err (!%p2695_p7)
}
  0x14   :  { %53 = dma.hbm_to_vmem [thread:$0]  %s4264_s5, 256, %s51_s19, [#allocation6]  }
  0x15   :  { %s2699_s20 = scalar_lea.hbm %s4267_s8, 256 }
  0x16   :  { %p2700_p8 = scmp.ne.s32.totalorder %s4267_s8, %s2699_s20  ;;  %p2703_p9 = scmp.lt.u32.totalorder %s2699_s20, %s4267_s8 }
  0x18   :  { %p2705_p10 = pnand %p2703_p9, %p2700_p8 }
  0x1a   :  { %2708 = shalt.err (!%p2705_p10)
}
  0x1b   :  { %s2709_s26 = scalar_lea.vmem %s73_s21, 256  ;;  %p2714_p12 = scmp.lt.s32.totalorder %s73_s21, %s73_s21 }
  0x1c   :  { %p2710_p11 = scmp.ne.s32.totalorder %s73_s21, %s2709_s26  ;;  %p2715_p13 = scmp.lt.s32.totalorder %s2709_s26, %s2709_s26 }
  0x1e   :  { %p2716_p0 = por %p2715_p13, %p2714_p12 }
  0x20   :  { %p2717_p1 = pnand %p2716_p0, %p2710_p11 }
  0x22   :  { %2720 = shalt.err (!%p2717_p1)
}
  0x23   :  { %75 = dma.hbm_to_vmem [thread:$0]  %s4267_s8, 256, %s73_s21, [#allocation9]  }
  0x24   :  { %s2843_s27 = smov [#allocation2]   ;;  %s2844_s29 = smov [#allocation7]  }
  0x25   :  { %s36_s28 = sshll.u32 %s2843_s27, 4  ;;  %s60_s30 = sshll.u32 %s2844_s29, 4  ;;  %s37_s28 = int_to_ptr.vmem [resolvable:$true] %s36_s28  ;;  %s61_s30 = int_to_ptr.vmem [resolvable:$true] %s60_s30 }
  0x26   :  { %s2721_s18 = scalar_lea.hbm %s4261_s2, 32 }
  0x27   :  { %p2722_p2 = scmp.ne.s32.totalorder %s4261_s2, %s2721_s18  ;;  %p2725_p3 = scmp.lt.u32.totalorder %s2721_s18, %s4261_s2 }
  0x29   :  { %p2727_p4 = pnand %p2725_p3, %p2722_p2 }
  0x2b   :  { %2730 = shalt.err (!%p2727_p4)
}
  0x2c   :  { %s2731_s8 = scalar_lea.vmem %s37_s28, 32  ;;  %p2736_p6 = scmp.lt.s32.totalorder %s37_s28, %s37_s28 }
  0x2d   :  { %p2732_p5 = scmp.ne.s32.totalorder %s37_s28, %s2731_s8  ;;  %p2737_p7 = scmp.lt.s32.totalorder %s2731_s8, %s2731_s8 }
  0x2f   :  { %p2738_p8 = por %p2737_p7, %p2736_p6 }
  0x31   :  { %p2739_p9 = pnand %p2738_p8, %p2732_p5 }
  0x33   :  { %2742 = shalt.err (!%p2739_p9)
}
  0x34   :  { %39 = dma.hbm_to_vmem [thread:$0]  %s4261_s2, 32, %s37_s28, [#allocation3]  }
  0x35   :  { %s2743_s19 = scalar_lea.hbm %s4265_s6, 256 }
  0x36   :  { %p2744_p10 = scmp.ne.s32.totalorder %s4265_s6, %s2743_s19  ;;  %p2747_p11 = scmp.lt.u32.totalorder %s2743_s19, %s4265_s6 }
  0x38   :  { %p2749_p12 = pnand %p2747_p11, %p2744_p10 }
  0x3a   :  { %2752 = shalt.err (!%p2749_p12)
}
  0x3b   :  { %s2753_s18 = scalar_lea.vmem %s61_s30, 256  ;;  %p2758_p0 = scmp.lt.s32.totalorder %s61_s30, %s61_s30 }
  0x3c   :  { %p2754_p13 = scmp.ne.s32.totalorder %s61_s30, %s2753_s18  ;;  %p2759_p1 = scmp.lt.s32.totalorder %s2753_s18, %s2753_s18 }
  0x3e   :  { %p2760_p2 = por %p2759_p1, %p2758_p0 }
  0x40   :  { %p2761_p3 = pnand %p2760_p2, %p2754_p13 }
  0x42   :  { %2764 = shalt.err (!%p2761_p3)
}
  0x43   :  { %63 = dma.hbm_to_vmem [thread:$0]  %s4265_s6, 256, %s61_s30, [#allocation6]  }
  0x44   :  { %s2845_s20 = smov [#allocation10]   ;;  %s2765_s8 = scalar_lea.hbm %s4268_s9, 256 }
  0x45   :  { %s82_s22 = sshll.u32 %s2845_s20, 4  ;;  %p2766_p4 = scmp.ne.s32.totalorder %s4268_s9, %s2765_s8  ;;  %s83_s22 = int_to_ptr.vmem [resolvable:$true] %s82_s22 }
  0x46   :  { %p2769_p5 = scmp.lt.u32.totalorder %s2765_s8, %s4268_s9 }
  0x48   :  { %p2771_p6 = pnand %p2769_p5, %p2766_p4 }
  0x4a   :  { %2774 = shalt.err (!%p2771_p6)
}
  0x4b   :  { %s2775_s19 = scalar_lea.vmem %s83_s22, 256  ;;  %p2780_p8 = scmp.lt.s32.totalorder %s83_s22, %s83_s22 }
  0x4c   :  { %p2776_p7 = scmp.ne.s32.totalorder %s83_s22, %s2775_s19  ;;  %p2781_p9 = scmp.lt.s32.totalorder %s2775_s19, %s2775_s19 }
  0x4e   :  { %p2782_p10 = por %p2781_p9, %p2780_p8 }
  0x50   :  { %p2783_p11 = pnand %p2782_p10, %p2776_p7 }
  0x52   :  { %2786 = shalt.err (!%p2783_p11)
}
  0x53   :  { %85 = dma.hbm_to_vmem [thread:$0]  %s4268_s9, 256, %s83_s22, [#allocation9]  }
  0x54   :  { %2831 = dma.done.wait [#allocation3], 32  }
  0x55   :  { %2832 = vsyncadd [#allocation3], 4294967264 }
  0x56   :  { %2833 = dma.done.wait [#allocation6], 512  }
  0x57   :  { %2834 = vsyncadd [#allocation6], 4294966784 }
  0x58   :  { %2835 = dma.done.wait [#allocation9], 512  }
  0x59   :  { %2836 = vsyncadd [#allocation9], 4294966784  ;;  %v156_v0 = vld [vmem:[%s4259_s0] sm:$0xff]  ;;  %v157_v1 = vld [vmem:[%s4259_s0 + $0x8] sm:$0xff]  ;;  %v173_v5 = vlaneseq  ;;  %v4275_v25 = vmov 0.0   ;;  %vm205_vm0 = vcmask 64512  }
  0x5a   :  { %v160_v2 = vadd.f32 %v157_v1, %v156_v0  ;;  %v109_v13 = vld [vmem:[#allocation2] sm:$0x3]  ;;  %306 = vmatprep.mubr.f32.mxu0 %v4275_v25  ;;  %828 = vmatprep.mubr.f32.mxu1 %v4275_v25  ;;  %v3023_v35 = vld [vmem:[%s4263_s4 + $0x8] sm:$0xff]  ;;  %v3057_v48 = vld [vmem:[%s4269_s10 + $0x10] sm:$0xff]  ;;  %vm466_vm1 = vcmask 1040384   ;;  %vm760_vm2 = vcmask 130048  }
  0x5b   :  { %v174_v8 = vshrl.u32 %v173_v5, 7  ;;  %v3028_v36 = vld [vmem:[%s4263_s4] sm:$0xff]  ;;  %v3032_v40 = vld [vmem:[#allocation5 + $0x8] sm:$0xff]  ;;  %v3065_v49 = vld [vmem:[%s4269_s10 + $0x18] sm:$0xff]  ;;  %s2847_s28 = smov 15   ;;  %s2848_s20 = smov 14  }
  0x5c   :  { %161 = vadd.xlane.f32.xlu0 %v160_v2  ;;  %v3034_v41 = vld [vmem:[#allocation5] sm:$0xff]  ;;  %v3089_v52 = vld [vmem:[%s4269_s10 + $0x30] sm:$0xff]  ;;  %v3097_v53 = vld [vmem:[%s4269_s10 + $0x38] sm:$0xff]  ;;  %s2850_s22 = smov 1   ;;  %s2851_s4 = smov 127   ;;  %vm1008_vm3 = vcmask 113664  }
  0x5d   :  { %v3006_v11 = vsub.s32 0, %v174_v8  ;;  %v3008_v12 = vsub.s32 1, %v174_v8  ;;  %v3041_v46 = vld [vmem:[%s4269_s10] sm:$0xff]  ;;  %v3049_v47 = vld [vmem:[%s4269_s10 + $0x8] sm:$0xff]  ;;  %v3121_v56 = vld [vmem:[%s4269_s10 + $0x50] sm:$0xff]  ;;  %s2853_s23 = smov 114  }
  0x5e   :  { %v3073_v50 = vld [vmem:[%s4269_s10 + $0x20] sm:$0xff]  ;;  %v3081_v51 = vld [vmem:[%s4269_s10 + $0x28] sm:$0xff]  ;;  %s2854_s24 = smov 113   ;;  %vm985_vm4 = vcmask 121856   ;;  %vm1031_vm5 = vcmask 105472   ;;  %vm1054_vm6 = vcmask 7168  }
  0x5f   :  { %4288 = vst [vmem:[#allocation19_spill] sm:$0xff] %v3008_v12  ;;  %v3011_v16 = vrot.slane %v109_v13, %v3006_v11  ;;  %v3014_v17 = vrot.slane %v109_v13, %v3008_v12  ;;  %v3105_v54 = vld [vmem:[%s4269_s10 + $0x40] sm:$0xff]  ;;  %v3113_v55 = vld [vmem:[%s4269_s10 + $0x48] sm:$0xff]  ;;  %vm1076_vm7 = vcmask 1039360   ;;  %vm1099_vm8 = vcmask 941056  }
  0x60   :  { %vm1122_vm9 = vcmask 932864   ;;  %vm1145_vm10 = vcmask 924672  }
  0xe9   :  { %v162_v3 = vpop.xlane.xlu0 %161 }
  0xea   :  { %v163_v4 = vrot.slane %v162_v3, 4 }
  0xec   :  { %v164_v6 = vadd.f32 %v163_v4, %v162_v3 }
  0xee   :  { %v165_v7 = vrot.slane %v164_v6, 2 }
  0xf0   :  { %v166_v9 = vadd.f32 %v165_v7, %v164_v6 }
  0xf2   :  { %v167_v10 = vrot.slane %v166_v9, 1 }
  0xf4   :  { %v168_v14 = vadd.f32 %v167_v10, %v166_v9 }
  0xf6   :  { %v169_v15 = vmul.f32 0.0006377551, %v168_v14 }
  0xf8   :  { %v170_v18 = vsub.f32 %v156_v0, %v169_v15  ;;  %v171_v19 = vsub.f32 %v157_v1, %v169_v15 }
  0xfa   :  { %v183_v20 = vmul.f32 %v3011_v16, %v170_v18  ;;  %v184_v21 = vmul.f32 %v3014_v17, %v171_v19 }
  0xfc   :  { %v185_v22 = vmul.f32 %v183_v20, %v183_v20  ;;  %v186_v23 = vmul.f32 %v184_v21, %v184_v21 }
  0xfe   :  { %v187_v24 = vadd.f32 %v186_v23, %v185_v22 }
 0x100   :  { %188 = vadd.xlane.f32.xlu0 %v187_v24 }
 0x18d   :  { %v189_v26 = vpop.xlane.xlu0 %188 }
 0x18e   :  { %v190_v27 = vrot.slane %v189_v26, 4 }
 0x190   :  { %v191_v28 = vadd.f32 %v190_v27, %v189_v26 }
 0x192   :  { %v192_v29 = vrot.slane %v191_v28, 2 }
 0x194   :  { %v193_v30 = vadd.f32 %v192_v29, %v191_v28 }
 0x196   :  { %v194_v31 = vrot.slane %v193_v30, 1 }
 0x198   :  { %v195_v32 = vadd.f32 %v194_v31, %v193_v30 }
 0x19a   :  { %v196_v33 = vmul.f32 0.0006377551, %v195_v32 }
 0x19c   :  { %v197_v34 = vadd.f32 1e-05, %v196_v33 }
 0x19e   :  { %2580 = vrsqrt.f32 %v197_v34 }
 0x1a8   :  { %v2581_v37 = vpop.eup %2580 }
 0x1a9   :  { %v200_v38 = vmul.f32 %v2581_v37, %v3023_v35  ;;  %v199_v39 = vmul.f32 %v2581_v37, %v3028_v36 }
 0x1ab   :  { %v202_v42 = vmul.f32 %v200_v38, %v184_v21  ;;  %v201_v43 = vmul.f32 %v199_v39, %v183_v20 }
 0x1ad   :  { %v204_v44 = vadd.f32 %v202_v42, %v3032_v40  ;;  %v203_v45 = vadd.f32 %v201_v43, %v3034_v41 }
 0x1af   :  { %242 = vmatprep.subr.mxu0 %v204_v44 }
 0x1b0   :  { %243 = vmatpush1.msra.mxu0 %v203_v45 }
 0x1b1   :  { %2435 = vmatmul.mubr.msk.f32.vlgmr.msra.gmra.mrb[0].mxu0 %vm205_vm0, %v3041_v46 }
 0x1b2   :  { %312 = vmatprep.mubr.f32.mxu0 %v4275_v25 }
 0x1b5   :  { %2436 = vmatmul.mubr.msk.f32.gmra.mrb[2].mxu0 %vm205_vm0, %v3049_v47 }
 0x1b6   :  { %318 = vmatprep.mubr.f32.mxu0 %v4275_v25 }
 0x1b9   :  { %2437 = vmatmul.mubr.msk.f32.gmra.mrb[4].mxu0 %vm205_vm0, %v3057_v48 }
 0x1ba   :  { %324 = vmatprep.mubr.f32.mxu0 %v4275_v25 }
 0x1bd   :  { %2438 = vmatmul.mubr.msk.f32.gmra.mrb[6].mxu0 %vm205_vm0, %v3065_v49 }
 0x1be   :  { %330 = vmatprep.mubr.f32.mxu0 %v4275_v25 }
 0x1c1   :  { %2439 = vmatmul.mubr.msk.f32.gmra.mrb[8].mxu0 %vm205_vm0, %v3073_v50 }
 0x1c2   :  { %336 = vmatprep.mubr.f32.mxu0 %v4275_v25 }
 0x1c5   :  { %2440 = vmatmul.mubr.msk.f32.gmra.mrb[10].mxu0 %vm205_vm0, %v3081_v51 }
 0x1c6   :  { %342 = vmatprep.mubr.f32.mxu0 %v4275_v25 }
 0x1c9   :  { %2441 = vmatmul.mubr.msk.f32.gmra.mrb[12].mxu0 %vm205_vm0, %v3089_v52 }
 0x1ca   :  { %348 = vmatprep.mubr.f32.mxu0 %v4275_v25 }
 0x1cd   :  { %2442 = vmatmul.mubr.msk.f32.gmra.mrb[14].mxu0 %vm205_vm0, %v3097_v53 }
 0x1ce   :  { %354 = vmatprep.mubr.f32.mxu0 %v4275_v25 }
 0x1d1   :  { %2443 = vmatmul.mubr.msk.f32.gmra.mrb[16].mxu0 %vm205_vm0, %v3105_v54 }
 0x1d2   :  { %360 = vmatprep.mubr.f32.mxu0 %v4275_v25 }
 0x1d5   :  { %2444 = vmatmul.mubr.msk.f32.gmra.mrb[18].mxu0 %vm205_vm0, %v3113_v55 }
 0x1d6   :  { %366 = vmatprep.mubr.f32.mxu0 %v4275_v25 }
 0x1d9   :  { %2445 = vmatmul.mubr.msk.f32.gmra.mrb[20].mxu0 %vm205_vm0, %v3121_v56 }
 0x1da   :  { %372 = vmatprep.mubr.f32.mxu0 %v4275_v25 }
 0x284   :  { %v308_v57 = vpop.f32.mrb[0].mxu0 }
 0x285   :  { %v310_v58 = vpop.f32.mrb[1].mxu0 }
 0x288   :  { %v314_v59 = vpop.f32.mrb[2].mxu0 }
 0x289   :  { %v379_v60 = vmul.f32 %v314_v59, %v308_v57  ;;  %v316_v61 = vpop.f32.mrb[3].mxu0 }
 0x28a   :  { %v380_v62 = vmul.f32 %v316_v61, %v310_v58 }
 0x28b   :  { %v381_v63 = vrot.slane %v379_v60, 4 }
 0x28c   :  { %v387_v0 = vrot.slane %v380_v62, 4  ;;  %v3126_v1 = vpop.f32.mrb[4].mxu0 }
 0x28d   :  { %v382_v2 = vadd.f32 %v381_v63, %v379_v60  ;;  %v3128_v3 = vpop.f32.mrb[5].mxu0 }
 0x28e   :  { %v388_v4 = vadd.f32 %v387_v0, %v380_v62 }
 0x28f   :  { %v383_v5 = vrot.slane %v382_v2, 2 }
 0x290   :  { %v389_v6 = vrot.slane %v388_v4, 2  ;;  %v326_v7 = vpop.f32.mrb[6].mxu0 }
 0x291   :  { %v411_v8 = vmul.f32 %v326_v7, %v314_v59  ;;  %v328_v9 = vpop.f32.mrb[7].mxu0  ;;  %v384_v10 = vadd.f32 %v383_v5, %v382_v2 }
 0x292   :  { %v412_v13 = vmul.f32 %v328_v9, %v316_v61  ;;  %v390_v14 = vadd.f32 %v389_v6, %v388_v4 }
 0x293   :  { %v385_v15 = vrot.slane %v384_v10, 1  ;;  %v413_v18 = vrot.slane %v411_v8, 4 }
 0x294   :  { %v332_v19 = vpop.f32.mrb[8].mxu0  ;;  %v391_v20 = vrot.slane %v390_v14, 1  ;;  %v419_v32 = vrot.slane %v412_v13, 4 }
 0x295   :  { %v395_v21 = vmul.f32 %v332_v19, %v308_v57  ;;  %v427_v22 = vmul.f32 %v332_v19, %v326_v7  ;;  %v334_v23 = vpop.f32.mrb[9].mxu0  ;;  %v386_v24 = vadd.f32 %v385_v15, %v384_v10  ;;  %v414_v31 = vadd.f32 %v413_v18, %v411_v8 }
 0x296   :  { %v396_v26 = vmul.f32 %v334_v23, %v310_v58  ;;  %v428_v27 = vmul.f32 %v334_v23, %v328_v9  ;;  %v392_v28 = vadd.f32 %v391_v20, %v390_v14  ;;  %v420_v57 = vadd.f32 %v419_v32, %v412_v13 }
 0x297   :  { %v397_v29 = vrot.slane %v395_v21, 4  ;;  %v3130_v30 = vmul.f32 0.35355338, %v386_v24  ;;  %v415_v45 = vrot.slane %v414_v31, 2  ;;  %v429_v63 = vrot.slane %v427_v22, 4 }
 0x298   :  { %v403_v33 = vrot.slane %v396_v26, 4  ;;  %v3132_v34 = vpop.f32.mrb[10].mxu0  ;;  %v3134_v37 = vmul.f32 0.35355338, %v392_v28  ;;  %v435_v0 = vrot.slane %v428_v27, 4  ;;  %v421_v5 = vrot.slane %v420_v57, 2 }
 0x299   :  { %v398_v38 = vadd.f32 %v397_v29, %v395_v21  ;;  %v3136_v39 = vpop.f32.mrb[11].mxu0  ;;  %v416_v4 = vadd.f32 %v415_v45, %v414_v31  ;;  %v430_v18 = vadd.f32 %v429_v63, %v427_v22 }
 0x29a   :  { %v404_v42 = vadd.f32 %v403_v33, %v396_v26  ;;  %v443_v43 = vmax.f32 %v3130_v30, %v3134_v37  ;;  %v436_v13 = vadd.f32 %v435_v0, %v428_v27  ;;  %v422_v21 = vadd.f32 %v421_v5, %v420_v57 }
 0x29b   :  { %v399_v44 = vrot.slane %v398_v38, 2  ;;  %v417_v28 = vrot.slane %v416_v4, 1 }
 0x29c   :  { %v405_v58 = vrot.slane %v404_v42, 2  ;;  %444 = vmax.xlane.f32.xlu1 %v443_v43  ;;  %v344_v59 = vpop.f32.mrb[12].mxu0  ;;  %v437_v22 = vrot.slane %v436_v13, 2  ;;  %v423_v45 = vrot.slane %v422_v21, 1 }
 0x29d   :  { %v400_v60 = vadd.f32 %v399_v44, %v398_v38  ;;  %v346_v61 = vpop.f32.mrb[13].mxu0  ;;  %v431_v38 = vrot.slane %v430_v18, 2  ;;  %v418_v44 = vadd.f32 %v417_v28, %v416_v4 }
 0x29e   :  { %v406_v62 = vadd.f32 %v405_v58, %v404_v42  ;;  %v438_v5 = vadd.f32 %v437_v22, %v436_v13 }
 0x29f   :  { %v401_v2 = vrot.slane %v400_v60, 1 }
 0x2a0   :  { %v350_v6 = vpop.f32.mrb[14].mxu0  ;;  %v407_v7 = vrot.slane %v406_v62, 1 }
 0x2a1   :  { %v570_v8 = vmul.f32 %v350_v6, %v344_v59  ;;  %v352_v9 = vpop.f32.mrb[15].mxu0  ;;  %v402_v10 = vadd.f32 %v401_v2, %v400_v60  ;;  %v432_v2 = vadd.f32 %v431_v38, %v430_v18 }
 0x2a2   :  { %v571_v14 = vmul.f32 %v352_v9, %v346_v61  ;;  %v408_v15 = vadd.f32 %v407_v7, %v406_v62  ;;  %v3153_v62 = vld [vmem:[%s4269_s10 + $0x58] sm:$0xff]  ;;  %s2852_s10 = smov 115  }
 0x2a3   :  { %v572_v19 = vrot.slane %v570_v8, 4  ;;  %v3140_v20 = vmul.f32 0.35355338, %v402_v10  ;;  %4289 = vst [vmem:[#allocation20_spill] sm:$0xff] %v3153_v62  ;;  %2446 = vmatmul.mubr.msk.f32.gmra.mrb[22].mxu0 %vm205_vm0, %v3153_v62 }
 0x2a4   :  { %v578_v23 = vrot.slane %v571_v14, 4  ;;  %v3142_v24 = vpop.f32.mrb[16].mxu0  ;;  %v3144_v26 = vmul.f32 0.35355338, %v408_v15  ;;  %1459 = vmatprep.mubr.f32.mxu0 %v4275_v25  ;;  %v3158_v15 = vmul.f32 0.35355338, %v418_v44 }
 0x2a5   :  { %v573_v29 = vadd.f32 %v572_v19, %v570_v8  ;;  %v3146_v31 = vpop.f32.mrb[17].mxu0 }
 0x2a6   :  { %v579_v32 = vadd.f32 %v578_v23, %v571_v14  ;;  %v446_v33 = vmax.f32 %v3140_v20, %v3144_v26  ;;  %v424_v14 = vadd.f32 %v423_v45, %v422_v21 }
 0x2a7   :  { %v574_v27 = vrot.slane %v573_v29, 2 }
 0x2a8   :  { %v580_v42 = vrot.slane %v579_v32, 2  ;;  %447 = vmax.xlane.f32.xlu1 %v446_v33  ;;  %v362_v43 = vpop.f32.mrb[18].mxu0 }
 0x2a9   :  { %v575_v57 = vadd.f32 %v574_v27, %v573_v29  ;;  %v602_v58 = vmul.f32 %v362_v43, %v350_v6  ;;  %v364_v60 = vpop.f32.mrb[19].mxu0 }
 0x2aa   :  { %v581_v63 = vadd.f32 %v580_v42, %v579_v32  ;;  %v603_v0 = vmul.f32 %v364_v60, %v352_v9 }
 0x2ab   :  { %v604_v7 = vrot.slane %v602_v58, 4  ;;  %v576_v8 = vrot.slane %v575_v57, 1 }
 0x2ac   :  { %v610_v4 = vrot.slane %v603_v0, 4  ;;  %v368_v10 = vpop.f32.mrb[20].mxu0  ;;  %v582_v6 = vrot.slane %v581_v63, 1 }
 0x2ad   :  { %v605_v19 = vadd.f32 %v604_v7, %v602_v58  ;;  %v586_v23 = vmul.f32 %v368_v10, %v344_v59  ;;  %v618_v28 = vmul.f32 %v368_v10, %v362_v43  ;;  %v370_v29 = vpop.f32.mrb[21].mxu0  ;;  %v577_v9 = vadd.f32 %v576_v8, %v575_v57 }
 0x2ae   :  { %v611_v32 = vadd.f32 %v610_v4, %v603_v0  ;;  %v587_v33 = vmul.f32 %v370_v29, %v346_v61  ;;  %v619_v27 = vmul.f32 %v370_v29, %v364_v60  ;;  %v583_v18 = vadd.f32 %v582_v6, %v581_v63 }
 0x2af   :  { %v606_v13 = vrot.slane %v605_v19, 2  ;;  %v588_v38 = vrot.slane %v586_v23, 4  ;;  %v620_v22 = vrot.slane %v618_v28, 4  ;;  %v3160_v42 = vmul.f32 0.35355338, %v577_v9 }
 0x2b0   :  { %v612_v25 = vrot.slane %v611_v32, 2  ;;  %v594_v12 = vrot.slane %v587_v33, 4  ;;  %v626_v62 = vrot.slane %v619_v27, 4  ;;  %v3162_v21 = vmul.f32 0.35355338, %v583_v18 }
 0x2b1   :  { %v607_v44 = vadd.f32 %v606_v13, %v605_v19  ;;  %v589_v45 = vadd.f32 %v588_v38, %v586_v23  ;;  %v621_v59 = vadd.f32 %v620_v22, %v618_v28  ;;  %v3164_v43 = vmul.f32 0.35355338, %v424_v14  ;;  %v3177_v22 = vld [vmem:[%s4259_s0 + $0x10] sm:$0xff] }
 0x2b2   :  { %v613_v57 = vadd.f32 %v612_v25, %v611_v32  ;;  %v595_v58 = vadd.f32 %v594_v12, %v587_v33  ;;  %v627_v61 = vadd.f32 %v626_v62, %v619_v27  ;;  %v634_v60 = vmax.f32 %v3160_v42, %v3162_v21 }
 0x2b3   :  { %v590_v63 = vrot.slane %v589_v45, 2  ;;  %v622_v0 = vrot.slane %v621_v59, 2  ;;  %v608_v7 = vrot.slane %v607_v44, 1  ;;  %v433_v6 = vrot.slane %v432_v2, 1 }
 0x2b4   :  { %v596_v8 = vrot.slane %v595_v58, 2  ;;  %v628_v4 = vrot.slane %v627_v61, 2  ;;  %635 = vmax.xlane.f32.xlu0 %v634_v60  ;;  %v614_v10 = vrot.slane %v613_v57, 1  ;;  %v485_v19 = vmax.f32 %v3158_v15, %v3164_v43 }
 0x2b5   :  { %v591_v29 = vadd.f32 %v590_v63, %v589_v45  ;;  %v609_v14 = vadd.f32 %v608_v7, %v607_v44  ;;  %v439_v23 = vrot.slane %v438_v5, 1  ;;  %v623_v25 = vadd.f32 %v622_v0, %v621_v59  ;;  %v3182_v44 = vld [vmem:[%s4259_s0 + $0x18] sm:$0xff] }
 0x2b6   :  { %v597_v12 = vadd.f32 %v596_v8, %v595_v58  ;;  %v629_v62 = vadd.f32 %v628_v4, %v627_v61  ;;  %v615_v28 = vadd.f32 %v614_v10, %v613_v57  ;;  %v434_v13 = vadd.f32 %v433_v6, %v432_v2 }
 0x2b7   :  { %v3170_v9 = vmul.f32 0.35355338, %v609_v14  ;;  %v592_v32 = vrot.slane %v591_v29, 1  ;;  %v440_v38 = vadd.f32 %v439_v23, %v438_v5  ;;  %v624_v57 = vrot.slane %v623_v25, 1 }
 0x2b8   :  { %486 = vmax.xlane.f32.xlu0 %v485_v19  ;;  %v3172_v33 = vmul.f32 0.35355338, %v615_v28  ;;  %v598_v27 = vrot.slane %v597_v12, 1  ;;  %v630_v58 = vrot.slane %v629_v62, 1  ;;  %v1361_v5 = vadd.f32 %v3182_v44, %v3177_v22 }
 0x2b9   :  { %v593_v18 = vadd.f32 %v592_v32, %v591_v29  ;;  %v3192_v60 = vmul.f32 0.35355338, %v434_v13  ;;  %v3196_v0 = vmul.f32 0.35355338, %v440_v38  ;;  %v625_v7 = vadd.f32 %v624_v57, %v623_v25 }
 0x2ba   :  { %v675_v45 = vmax.f32 %v3170_v9, %v3172_v33  ;;  %v599_v59 = vadd.f32 %v598_v27, %v597_v12  ;;  %v631_v8 = vadd.f32 %v630_v58, %v629_v62 }
 0x2bb   :  { %v3186_v61 = vmul.f32 0.35355338, %v593_v18  ;;  %v488_v4 = vmax.f32 %v3192_v60, %v3196_v0  ;;  %v3200_v10 = vmul.f32 0.35355338, %v625_v7 }
 0x2bc   :  { %676 = vmax.xlane.f32.xlu0 %v675_v45  ;;  %v3188_v2 = vmul.f32 0.35355338, %v599_v59  ;;  %v3202_v6 = vmul.f32 0.35355338, %v631_v8 }
 0x2be   :  { %v637_v63 = vmax.f32 %v3186_v61, %v3188_v2  ;;  %v678_v29 = vmax.f32 %v3200_v10, %v3202_v6 }
 0x2c0   :  { %638 = vmax.xlane.f32.xlu1 %v637_v63  ;;  %1362 = vadd.xlane.f32.xlu0 %v1361_v5 }
 0x2c4   :  { %489 = vmax.xlane.f32.xlu1 %v488_v4 }
 0x2c8   :  { %679 = vmax.xlane.f32.xlu1 %v678_v29 }
 0x329   :  { %v445_v19 = vpop.xlane.xlu1 %444 }
 0x335   :  { %v448_v14 = vpop.xlane.xlu1 %447 }
 0x336   :  { %v449_v23 = vmax.f32 %v445_v19, %v448_v14 }
 0x338   :  { %v450_v25 = vsub.f32 %v3130_v30, %v449_v23  ;;  %v451_v12 = vsub.f32 %v3134_v37, %v449_v23  ;;  %v458_v62 = vsub.f32 %v3140_v20, %v449_v23  ;;  %v459_v28 = vsub.f32 %v3144_v26, %v449_v23 }
 0x33a   :  { %v452_v32 = vmul.f32 1.442695, %v450_v25  ;;  %v454_v27 = vmul.f32 1.442695, %v451_v12  ;;  %v460_v18 = vmul.f32 1.442695, %v458_v62 }
 0x33b   :  { %v462_v13 = vmul.f32 1.442695, %v459_v28 }
 0x33c   :  { %2582 = vpow2.f32 %v452_v32 }
 0x33d   :  { %2584 = vpow2.f32 %v454_v27 }
 0x33e   :  { %2586 = vpow2.f32 %v460_v18 }
 0x33f   :  { %2588 = vpow2.f32 %v462_v13 }
 0x341   :  { %v636_v38 = vpop.xlane.xlu0 %635 }
 0x345   :  { %v487_v45 = vpop.xlane.xlu0 %486 }
 0x346   :  { %v2583_v59 = vpop.eup %2582 }
 0x347   :  { %v2585_v57 = vpop.eup %2584  ;;  %v3211_v30 = vmul.f32 %v2583_v59, %v3011_v16 }
 0x348   :  { %v2587_v37 = vpop.eup %2586  ;;  %v3214_v20 = vmul.f32 %v2585_v57, %v3014_v17 }
 0x349   :  { %v2589_v26 = vpop.eup %2588  ;;  %v677_v58 = vpop.xlane.xlu0 %676  ;;  %v3217_v5 = vmul.f32 %v2587_v37, %v3011_v16  ;;  %v467_v63 = vsel %vm466_vm1, %v3211_v30, 0.0 }
 0x34a   :  { %v3222_v7 = vmul.f32 %v2589_v26, %v3014_v17  ;;  %v468_v8 = vsel %vm466_vm1, %v3214_v20, 0.0 }
 0x34b   :  { %v473_v4 = vsel %vm466_vm1, %v3217_v5, 0.0  ;;  %v469_v29 = vadd.f32 %v468_v8, %v467_v63 }
 0x34c   :  { %v474_v19 = vsel %vm466_vm1, %v3222_v7, 0.0 }
 0x34d   :  { %v475_v14 = vadd.f32 %v474_v19, %v473_v4  ;;  %470 = vadd.xlane.f32.xlu1 %v469_v29  ;;  %v639_v23 = vpop.xlane.xlu1 %638  ;;  %v1363_v25 = vpop.xlane.xlu0 %1362 }
 0x34e   :  { %v640_v12 = vmax.f32 %v636_v38, %v639_v23  ;;  %v1364_v62 = vrot.slane %v1363_v25, 4 }
 0x34f   :  { %476 = vadd.xlane.f32.xlu0 %v475_v14 }
 0x350   :  { %v641_v28 = vsub.f32 %v3160_v42, %v640_v12  ;;  %v642_v32 = vsub.f32 %v3162_v21, %v640_v12  ;;  %v649_v27 = vsub.f32 %v3186_v61, %v640_v12  ;;  %v650_v18 = vsub.f32 %v3188_v2, %v640_v12 }
 0x351   :  { %v490_v13 = vpop.xlane.xlu1 %489  ;;  %v1365_v59 = vadd.f32 %v1364_v62, %v1363_v25 }
 0x352   :  { %v643_v57 = vmul.f32 1.442695, %v641_v28  ;;  %v645_v37 = vmul.f32 1.442695, %v642_v32  ;;  %v651_v26 = vmul.f32 1.442695, %v649_v27  ;;  %v491_v63 = vmax.f32 %v487_v45, %v490_v13 }
 0x353   :  { %v653_v8 = vmul.f32 1.442695, %v650_v18  ;;  %v1366_v4 = vrot.slane %v1365_v59, 2 }
 0x354   :  { %2590 = vpow2.f32 %v643_v57  ;;  %v492_v38 = vsub.f32 %v3158_v15, %v491_v63  ;;  %v493_v29 = vsub.f32 %v3164_v43, %v491_v63  ;;  %v500_v42 = vsub.f32 %v3192_v60, %v491_v63 }
 0x355   :  { %2592 = vpow2.f32 %v645_v37  ;;  %v501_v21 = vsub.f32 %v3196_v0, %v491_v63  ;;  %v680_v61 = vpop.xlane.xlu1 %679  ;;  %v1367_v2 = vadd.f32 %v1366_v4, %v1365_v59 }
 0x356   :  { %2594 = vpow2.f32 %v651_v26  ;;  %v494_v19 = vmul.f32 1.442695, %v492_v38  ;;  %v496_v14 = vmul.f32 1.442695, %v493_v29  ;;  %v502_v23 = vmul.f32 1.442695, %v500_v42 }
 0x357   :  { %2596 = vpow2.f32 %v653_v8  ;;  %v504_v45 = vmul.f32 1.442695, %v501_v21  ;;  %v681_v25 = vmax.f32 %v677_v58, %v680_v61  ;;  %v1368_v12 = vrot.slane %v1367_v2, 1 }
 0x358   :  { %2598 = vpow2.f32 %v494_v19 }
 0x359   :  { %2600 = vpow2.f32 %v496_v14  ;;  %v682_v15 = vsub.f32 %v3170_v9, %v681_v25  ;;  %v683_v43 = vsub.f32 %v3172_v33, %v681_v25  ;;  %v690_v60 = vsub.f32 %v3200_v10, %v681_v25 }
 0x35a   :  { %2602 = vpow2.f32 %v502_v23  ;;  %v691_v0 = vsub.f32 %v3202_v6, %v681_v25  ;;  %v1369_v62 = vadd.f32 %v1368_v12, %v1367_v2 }
 0x35b   :  { %2604 = vpow2.f32 %v504_v45  ;;  %v684_v28 = vmul.f32 1.442695, %v682_v15  ;;  %v686_v32 = vmul.f32 1.442695, %v683_v43  ;;  %v692_v27 = vmul.f32 1.442695, %v690_v60 }
 0x35c   :  { %v694_v18 = vmul.f32 1.442695, %v691_v0  ;;  %v1370_v13 = vmul.f32 0.0006377551, %v1369_v62 }
 0x35d   :  { %2606 = vpow2.f32 %v684_v28 }
 0x35e   :  { %v2591_v58 = vpop.eup %2590  ;;  %2608 = vpow2.f32 %v686_v32  ;;  %v1371_v4 = vsub.f32 %v3177_v22, %v1370_v13  ;;  %v1372_v38 = vsub.f32 %v3182_v44, %v1370_v13 }
 0x35f   :  { %v2593_v59 = vpop.eup %2592  ;;  %2610 = vpow2.f32 %v692_v27  ;;  %v3243_v9 = vmul.f32 %v2591_v58, %v3011_v16 }
 0x360   :  { %v2595_v33 = vpop.eup %2594  ;;  %2612 = vpow2.f32 %v694_v18  ;;  %v3246_v10 = vmul.f32 %v2593_v59, %v3014_v17  ;;  %v3281_v15 = vmul.f32 %v1371_v4, %v3011_v16  ;;  %v3284_v43 = vmul.f32 %v1372_v38, %v3014_v17 }
 0x361   :  { %v2597_v6 = vpop.eup %2596  ;;  %v3249_v57 = vmul.f32 %v2595_v33, %v3011_v16  ;;  %v657_v37 = vsel %vm466_vm1, %v3243_v9, 0.0 }
 0x362   :  { %v2599_v26 = vpop.eup %2598  ;;  %v3254_v63 = vmul.f32 %v2597_v6, %v3014_v17  ;;  %v658_v8 = vsel %vm466_vm1, %v3246_v10, 0.0 }
 0x363   :  { %v2601_v29 = vpop.eup %2600  ;;  %v663_v42 = vsel %vm466_vm1, %v3249_v57, 0.0  ;;  %v659_v21 = vadd.f32 %v658_v8, %v657_v37  ;;  %v3263_v61 = vmul.f32 %v2599_v26, %v3011_v16  ;;  %v1375_v37 = vmul.f32 %v3281_v15, %v3281_v15 }
 0x364   :  { %v2603_v2 = vpop.eup %2602  ;;  %v664_v19 = vsel %vm466_vm1, %v3254_v63, 0.0  ;;  %v3268_v14 = vmul.f32 %v2601_v29, %v3014_v17  ;;  %v1376_v26 = vmul.f32 %v3284_v43, %v3284_v43 }
 0x365   :  { %v2605_v23 = vpop.eup %2604  ;;  %v665_v45 = vadd.f32 %v664_v19, %v663_v42  ;;  %660 = vadd.xlane.f32.xlu1 %v659_v21  ;;  %v3271_v22 = vmul.f32 %v2603_v2, %v3011_v16  ;;  %v508_v44 = vsel %vm466_vm1, %v3263_v61, 0.0 }
 0x366   :  { %v3276_v25 = vmul.f32 %v2605_v23, %v3014_v17  ;;  %v509_v12 = vsel %vm466_vm1, %v3268_v14, 0.0  ;;  %v1377_v2 = vadd.f32 %v1376_v26, %v1375_v37 }
 0x367   :  { %v2607_v60 = vpop.eup %2606  ;;  %666 = vadd.xlane.f32.xlu0 %v665_v45  ;;  %v514_v0 = vsel %vm466_vm1, %v3271_v22, 0.0  ;;  %v510_v62 = vadd.f32 %v509_v12, %v508_v44 }
 0x368   :  { %v2609_v28 = vpop.eup %2608  ;;  %v515_v32 = vsel %vm466_vm1, %v3276_v25, 0.0  ;;  %v3291_v27 = vmul.f32 %v2607_v60, %v3011_v16 }
 0x369   :  { %v2611_v18 = vpop.eup %2610  ;;  %v516_v58 = vadd.f32 %v515_v32, %v514_v0  ;;  %511 = vadd.xlane.f32.xlu1 %v510_v62  ;;  %v3294_v13 = vmul.f32 %v2609_v28, %v3014_v17 }
 0x36a   :  { %v2613_v59 = vpop.eup %2612  ;;  %v3297_v33 = vmul.f32 %v2611_v18, %v3011_v16  ;;  %v698_v6 = vsel %vm466_vm1, %v3291_v27, 0.0 }
 0x36b   :  { %517 = vadd.xlane.f32.xlu0 %v516_v58  ;;  %v3306_v8 = vmul.f32 %v2613_v59, %v3014_v17  ;;  %v699_v4 = vsel %vm466_vm1, %v3294_v13, 0.0 }
 0x36c   :  { %v704_v38 = vsel %vm466_vm1, %v3297_v33, 0.0  ;;  %v700_v29 = vadd.f32 %v699_v4, %v698_v6 }
 0x36d   :  { %v705_v42 = vsel %vm466_vm1, %v3306_v8, 0.0 }
 0x36e   :  { %v706_v21 = vadd.f32 %v705_v42, %v704_v38  ;;  %701 = vadd.xlane.f32.xlu1 %v700_v29 }
 0x370   :  { %707 = vadd.xlane.f32.xlu0 %v706_v21 }
 0x372   :  { %1378 = vadd.xlane.f32.xlu1 %v1377_v2 }
 0x376   :  { %v3314_v19 = vpop.f32.mrb[22].mxu0 }
 0x377   :  { %v3316_v23 = vpop.f32.mrb[23].mxu0 }
 0x3da   :  { %v471_v45 = vpop.xlane.xlu1 %470 }
 0x3dc   :  { %v477_v44 = vpop.xlane.xlu0 %476 }
 0x3dd   :  { %v479_v12 = vadd.f32 %v477_v44, %v471_v45 }
 0x3df   :  { %2614 = vrcp.f32 %v479_v12 }
 0x3e9   :  { %v2615_v60 = vpop.eup %2614 }
 0x3ea   :  { %v482_v0 = vmul.f32 %v2615_v60, %v3214_v20  ;;  %v484_v62 = vmul.f32 %v2615_v60, %v3222_v7  ;;  %v481_v28 = vmul.f32 %v2615_v60, %v3211_v30  ;;  %v483_v32 = vmul.f32 %v2615_v60, %v3217_v5 }
 0x3ec   :  { %v533_v18 = vrot.slane %v482_v0, %v3006_v11  ;;  %v543_v58 = vrot.slane %v484_v62, %v3006_v11  ;;  %v529_v59 = vrot.slane %v481_v28, %v3006_v11  ;;  %v539_v6 = vrot.slane %v483_v32, %v3006_v11 }
 0x3ee   :  { %v535_v37 = vmul.f32 %v533_v18, %v3128_v3  ;;  %v545_v26 = vmul.f32 %v543_v58, %v3136_v39  ;;  %v534_v20 = vmul.f32 %v529_v59, %v3126_v1  ;;  %v544_v7 = vmul.f32 %v539_v6, %v3132_v34 }
 0x3f0   :  { %v547_v4 = vadd.f32 %v545_v26, %v535_v37  ;;  %v3330_v30 = vadd.f32 %v544_v7, %v534_v20 }
 0x3f2   :  { %v661_v5 = vpop.xlane.xlu1 %660 }
 0x3f4   :  { %v667_v38 = vpop.xlane.xlu0 %666 }
 0x3f5   :  { %v669_v29 = vadd.f32 %v667_v38, %v661_v5 }
 0x3f6   :  { %v512_v42 = vpop.xlane.xlu1 %511 }
 0x3f7   :  { %2616 = vrcp.f32 %v669_v29 }
 0x3f8   :  { %v518_v21 = vpop.xlane.xlu0 %517 }
 0x3f9   :  { %v520_v2 = vadd.f32 %v518_v21, %v512_v42 }
 0x3fb   :  { %2618 = vrcp.f32 %v520_v2  ;;  %v702_v45 = vpop.xlane.xlu1 %701 }
 0x3fd   :  { %v708_v44 = vpop.xlane.xlu0 %707 }
 0x3fe   :  { %v710_v12 = vadd.f32 %v708_v44, %v702_v45 }
 0x3ff   :  { %v1379_v60 = vpop.xlane.xlu1 %1378 }
 0x400   :  { %2620 = vrcp.f32 %v710_v12  ;;  %v1380_v0 = vrot.slane %v1379_v60, 4 }
 0x401   :  { %v2617_v62 = vpop.eup %2616 }
 0x402   :  { %v1381_v28 = vadd.f32 %v1380_v0, %v1379_v60  ;;  %v673_v32 = vmul.f32 %v2617_v62, %v3249_v57  ;;  %v674_v18 = vmul.f32 %v2617_v62, %v3254_v63  ;;  %v672_v58 = vmul.f32 %v2617_v62, %v3246_v10 }
 0x403   :  { %v671_v59 = vmul.f32 %v2617_v62, %v3243_v9 }
 0x404   :  { %v1382_v6 = vrot.slane %v1381_v28, 2  ;;  %v729_v37 = vrot.slane %v673_v32, %v3006_v11  ;;  %v733_v26 = vrot.slane %v674_v18, %v3006_v11  ;;  %v723_v20 = vrot.slane %v672_v58, %v3006_v11 }
 0x405   :  { %v2619_v7 = vpop.eup %2618  ;;  %v719_v5 = vrot.slane %v671_v59, %v3006_v11 }
 0x406   :  { %v1383_v38 = vadd.f32 %v1382_v6, %v1381_v28  ;;  %v522_v29 = vmul.f32 %v2619_v7, %v3263_v61  ;;  %v524_v57 = vmul.f32 %v2619_v7, %v3271_v22  ;;  %v734_v63 = vmul.f32 %v729_v37, %v3314_v19 }
 0x407   :  { %v735_v10 = vmul.f32 %v733_v26, %v3316_v23  ;;  %v725_v9 = vmul.f32 %v723_v20, %v3146_v31  ;;  %v724_v42 = vmul.f32 %v719_v5, %v3142_v24  ;;  %v523_v21 = vmul.f32 %v2619_v7, %v3268_v14 }
 0x408   :  { %v1384_v2 = vrot.slane %v1383_v38, 1  ;;  %v551_v45 = vrot.slane %v522_v29, %v3006_v11  ;;  %v561_v44 = vrot.slane %v524_v57, %v3006_v11  ;;  %v525_v12 = vmul.f32 %v2619_v7, %v3276_v25  ;;  %v149_v29 = vld [vmem:[%s4270_s11] sm:$0xff] }
 0x409   :  { %v737_v61 = vadd.f32 %v735_v10, %v725_v9  ;;  %v736_v60 = vadd.f32 %v734_v63, %v724_v42  ;;  %v555_v22 = vrot.slane %v523_v21, %v3006_v11 }
 0x40a   :  { %v2621_v0 = vpop.eup %2620  ;;  %v1385_v62 = vadd.f32 %v1384_v2, %v1383_v38  ;;  %v556_v28 = vmul.f32 %v551_v45, %v3126_v1  ;;  %v566_v32 = vmul.f32 %v561_v44, %v3132_v34  ;;  %v565_v18 = vrot.slane %v525_v12, %v3006_v11 }
 0x40b   :  { %v712_v14 = vmul.f32 %v2621_v0, %v3291_v27  ;;  %v714_v58 = vmul.f32 %v2621_v0, %v3297_v33  ;;  %v713_v59 = vmul.f32 %v2621_v0, %v3294_v13  ;;  %v715_v25 = vmul.f32 %v2621_v0, %v3306_v8 }
 0x40c   :  { %v1386_v6 = vmul.f32 0.0006377551, %v1385_v62  ;;  %v568_v37 = vadd.f32 %v566_v32, %v556_v28  ;;  %v2471_v26 = vpack.c.bf16 %v737_v61, %v547_v4  ;;  %v2473_v20 = vpack.c.bf16 %v736_v60, %v3330_v30 }
 0x40d   :  { %v741_v7 = vrot.slane %v712_v14, %v3006_v11  ;;  %v751_v1 = vrot.slane %v714_v58, %v3006_v11  ;;  %v745_v34 = vrot.slane %v713_v59, %v3006_v11  ;;  %v755_v5 = vrot.slane %v715_v25, %v3006_v11 }
 0x40e   :  { %v1387_v27 = vadd.f32 1e-05, %v1386_v6  ;;  %2472 = vmatprep.subr.bf16.mxu1 %v2471_v26  ;;  %v557_v13 = vmul.f32 %v555_v22, %v3128_v3  ;;  %v567_v33 = vmul.f32 %v565_v18, %v3136_v39 }
 0x40f   :  { %v746_v8 = vmul.f32 %v741_v7, %v3142_v24  ;;  %v756_v4 = vmul.f32 %v751_v1, %v3314_v19  ;;  %v747_v30 = vmul.f32 %v745_v34, %v3146_v31  ;;  %v757_v38 = vmul.f32 %v755_v5, %v3316_v23  ;;  %2474 = vmatpush1.bf16.msra.mxu1 %v2473_v20 }
 0x410   :  { %2622 = vrsqrt.f32 %v1387_v27  ;;  %v569_v57 = vadd.f32 %v567_v33, %v557_v13  ;;  %v4290_v24 = vmov 0.0  }
 0x411   :  { %v758_v63 = vadd.f32 %v756_v4, %v746_v8  ;;  %v759_v10 = vadd.f32 %v757_v38, %v747_v30 }
 0x412   :  { %2447 = vmatmul.mubr.msk.f32.vlgmr.msra.gmra.mrb[0].mxu1 %vm760_vm2, %v149_v29 }
 0x413   :  { %v2477_v3 = vpack.c.bf16 %v758_v63, %v568_v37  ;;  %v2475_v39 = vpack.c.bf16 %v759_v10, %v569_v57  ;;  %899 = vmatprep.mubr.f32.mxu1 %v4290_v24 }
 0x415   :  { %2476 = vmatprep.subr.bf16.mxu1 %v2475_v39 }
 0x416   :  { %2478 = vmatpush1.bf16.msra.mxu1 %v2477_v3 }
 0x419   :  { %2448 = vmatmul.mubr.msk.f32.vlgmr.msra.gmra.mrb[2].mxu1 %vm760_vm2, %v149_v29 }
 0x41a   :  { %v2623_v31 = vpop.eup %2622 }
 0x41b   :  { %v1390_v19 = vmul.f32 %v2623_v31, %v3023_v35  ;;  %v1389_v23 = vmul.f32 %v2623_v31, %v3028_v36  ;;  %v4291_v35 = vld [vmem:[#allocation20_spill] sm:$0xff] }
 0x41d   :  { %v1392_v9 = vmul.f32 %v1390_v19, %v3284_v43  ;;  %v1391_v42 = vmul.f32 %v1389_v23, %v3281_v15 }
 0x41f   :  { %v1394_v21 = vadd.f32 %v1392_v9, %v3032_v40  ;;  %v1393_v2 = vadd.f32 %v1391_v42, %v3034_v41  ;;  %v2672_v40 = vld [vmem:[%s4259_s0] sm:$0xff] }
 0x421   :  { %1395 = vmatprep.subr.mxu0 %v1394_v21 }
 0x422   :  { %1396 = vmatpush1.msra.mxu0 %v1393_v2 }
 0x423   :  { %2455 = vmatmul.mubr.msk.f32.vlgmr.msra.gmra.mrb[24].mxu0 %vm205_vm0, %v3041_v46 }
 0x424   :  { %1465 = vmatprep.mubr.f32.mxu0 %v4290_v24 }
 0x427   :  { %2456 = vmatmul.mubr.msk.f32.gmra.mrb[26].mxu0 %vm205_vm0, %v3049_v47  ;;  %v2673_v47 = vld [vmem:[%s4259_s0 + $0x8] sm:$0xff] }
 0x428   :  { %1471 = vmatprep.mubr.f32.mxu0 %v4290_v24 }
 0x42b   :  { %2457 = vmatmul.mubr.msk.f32.gmra.mrb[28].mxu0 %vm205_vm0, %v3057_v48 }
 0x42c   :  { %1477 = vmatprep.mubr.f32.mxu0 %v4290_v24 }
 0x42f   :  { %2458 = vmatmul.mubr.msk.f32.gmra.mrb[30].mxu0 %vm205_vm0, %v3065_v49 }
 0x430   :  { %1483 = vmatprep.mubr.f32.mxu0 %v4290_v24 }
 0x433   :  { %2459 = vmatmul.mubr.msk.f32.gmra.mrb[32].mxu0 %vm205_vm0, %v3073_v50  ;;  %v158_v50 = vld [vmem:[%s4260_s1] sm:$0xff] }
 0x434   :  { %1489 = vmatprep.mubr.f32.mxu0 %v4290_v24 }
 0x437   :  { %2460 = vmatmul.mubr.msk.f32.gmra.mrb[34].mxu0 %vm205_vm0, %v3081_v51  ;;  %v159_v51 = vld [vmem:[%s4260_s1 + $0x8] sm:$0xff] }
 0x438   :  { %1495 = vmatprep.mubr.f32.mxu0 %v4290_v24 }
 0x43b   :  { %2461 = vmatmul.mubr.msk.f32.gmra.mrb[36].mxu0 %vm205_vm0, %v3089_v52 }
 0x43c   :  { %1501 = vmatprep.mubr.f32.mxu0 %v4290_v24 }
 0x43f   :  { %2462 = vmatmul.mubr.msk.f32.gmra.mrb[38].mxu0 %vm205_vm0, %v3097_v53 }
 0x440   :  { %1507 = vmatprep.mubr.f32.mxu0 %v4290_v24 }
 0x443   :  { %2463 = vmatmul.mubr.msk.f32.gmra.mrb[40].mxu0 %vm205_vm0, %v3105_v54 }
 0x444   :  { %1513 = vmatprep.mubr.f32.mxu0 %v4290_v24 }
 0x447   :  { %2464 = vmatmul.mubr.msk.f32.gmra.mrb[42].mxu0 %vm205_vm0, %v3113_v55 }
 0x448   :  { %1519 = vmatprep.mubr.f32.mxu0 %v4290_v24 }
 0x44b   :  { %2465 = vmatmul.mubr.msk.f32.gmra.mrb[44].mxu0 %vm205_vm0, %v3121_v56 }
 0x44c   :  { %1525 = vmatprep.mubr.f32.mxu0 %v4290_v24 }
 0x44f   :  { %2466 = vmatmul.mubr.msk.f32.gmra.mrb[46].mxu0 %vm205_vm0, %v4291_v35 }
 0x4e5   :  { %v830_v36 = vpop.f32.mrb[0].mxu1 }
 0x4e6   :  { %v3419_v41 = vadd.f32 %v2672_v40, %v830_v36  ;;  %v832_v46 = vpop.f32.mrb[1].mxu1 }
 0x4e7   :  { %v3424_v48 = vadd.f32 %v2673_v47, %v832_v46 }
 0x4e8   :  { %4292 = vst [vmem:[#allocation20_spill] sm:$0xff] %v3419_v41 }
 0x4e9   :  { %4293 = vst [vmem:[#allocation21_spill] sm:$0xff] %v3424_v48  ;;  %v910_v49 = vadd.f32 %v3424_v48, %v3419_v41 }
 0x4eb   :  { %911 = vadd.xlane.f32.xlu0 %v910_v49 }
 0x4ec   :  { %v901_v52 = vpop.f32.mrb[2].mxu1 }
 0x4ed   :  { %v3434_v53 = vadd.f32 %v901_v52, %v158_v50  ;;  %v903_v54 = vpop.f32.mrb[3].mxu1 }
 0x4ee   :  { %v3436_v55 = vadd.f32 %v903_v54, %v159_v51 }
 0x4ef   :  { %4294 = vst [vmem:[#allocation22_spill] sm:$0xff] %v3434_v53 }
 0x4f0   :  { %4295 = vst [vmem:[#allocation23_spill] sm:$0xff] %v3436_v55  ;;  %v944_v56 = vadd.f32 %v3436_v55, %v3434_v53 }
 0x4f2   :  { %945 = vadd.xlane.f32.xlu1 %v944_v56 }
 0x4f6   :  { %v1461_v15 = vpop.f32.mrb[24].mxu0 }
 0x4f7   :  { %v1463_v43 = vpop.f32.mrb[25].mxu0 }
 0x4fa   :  { %v1467_v45 = vpop.f32.mrb[26].mxu0 }
 0x4fb   :  { %v3440_v44 = vmul.f32 %v1467_v45, %v1461_v15  ;;  %v1469_v12 = vpop.f32.mrb[27].mxu0 }
 0x4fc   :  { %v3442_v61 = vmul.f32 %v1469_v12, %v1463_v43 }
 0x4fe   :  { %v3444_v60 = vpop.f32.mrb[28].mxu0 }
 0x4ff   :  { %v3446_v22 = vpop.f32.mrb[29].mxu0 }
 0x502   :  { %v1479_v0 = vpop.f32.mrb[30].mxu0 }
 0x503   :  { %v3448_v62 = vmul.f32 %v1479_v0, %v1467_v45  ;;  %v1481_v28 = vpop.f32.mrb[31].mxu0 }
 0x504   :  { %v3450_v32 = vmul.f32 %v1481_v28, %v1469_v12 }
 0x506   :  { %v1485_v18 = vpop.f32.mrb[32].mxu0 }
 0x507   :  { %v1548_v14 = vmul.f32 %v1485_v18, %v1461_v15  ;;  %v3452_v58 = vmul.f32 %v1485_v18, %v1479_v0  ;;  %v1487_v59 = vpop.f32.mrb[33].mxu0 }
 0x508   :  { %v1549_v25 = vmul.f32 %v1487_v59, %v1463_v43  ;;  %v3454_v6 = vmul.f32 %v1487_v59, %v1481_v28 }
 0x509   :  { %v1550_v37 = vrot.slane %v1548_v14, 4 }
 0x50a   :  { %v1556_v26 = vrot.slane %v1549_v25, 4  ;;  %v3456_v20 = vpop.f32.mrb[34].mxu0 }
 0x50b   :  { %v1551_v7 = vadd.f32 %v1550_v37, %v1548_v14  ;;  %v3458_v1 = vpop.f32.mrb[35].mxu0 }
 0x50c   :  { %v1557_v34 = vadd.f32 %v1556_v26, %v1549_v25 }
 0x50d   :  { %v1552_v5 = vrot.slane %v1551_v7, 2 }
 0x50e   :  { %v1558_v27 = vrot.slane %v1557_v34, 2  ;;  %v1497_v13 = vpop.f32.mrb[36].mxu0 }
 0x50f   :  { %v1553_v33 = vadd.f32 %v1552_v5, %v1551_v7  ;;  %v1499_v8 = vpop.f32.mrb[37].mxu0  ;;  %v1534_v7 = vrot.slane %v3440_v44, 4 }
 0x510   :  { %v1559_v4 = vadd.f32 %v1558_v27, %v1557_v34  ;;  %v1540_v34 = vrot.slane %v3442_v61, 4 }
 0x511   :  { %v1554_v30 = vrot.slane %v1553_v33, 1  ;;  %v1535_v5 = vadd.f32 %v1534_v7, %v3440_v44 }
 0x512   :  { %v1503_v38 = vpop.f32.mrb[38].mxu0  ;;  %v1560_v29 = vrot.slane %v1559_v4, 1  ;;  %v1541_v27 = vadd.f32 %v1540_v34, %v3442_v61 }
 0x513   :  { %v1722_v57 = vmul.f32 %v1503_v38, %v1497_v13  ;;  %v1505_v63 = vpop.f32.mrb[39].mxu0  ;;  %v1555_v10 = vadd.f32 %v1554_v30, %v1553_v33 }
 0x514   :  { %v1723_v3 = vmul.f32 %v1505_v63, %v1499_v8  ;;  %v1561_v39 = vadd.f32 %v1560_v29, %v1559_v4  ;;  %v1542_v33 = vrot.slane %v1541_v27, 2 }
 0x515   :  { %v3460_v31 = vmul.f32 0.35355338, %v1555_v10  ;;  %v1572_v10 = vrot.slane %v3450_v32, 4 }
 0x516   :  { %v3462_v19 = vpop.f32.mrb[40].mxu0  ;;  %v3464_v23 = vmul.f32 0.35355338, %v1561_v39  ;;  %v1730_v4 = vrot.slane %v1723_v3, 4  ;;  %v1582_v39 = vrot.slane %v3452_v58, 4 }
 0x517   :  { %v3466_v9 = vpop.f32.mrb[41].mxu0 }
 0x518   :  { %v1599_v42 = vmax.f32 %v3460_v31, %v3464_v23 }
 0x51a   :  { %1600 = vmax.xlane.f32.xlu1 %v1599_v42  ;;  %v1515_v21 = vpop.f32.mrb[42].mxu0  ;;  %v1543_v42 = vadd.f32 %v1542_v33, %v1541_v27 }
 0x51b   :  { %v3470_v2 = vmul.f32 %v1515_v21, %v1503_v38  ;;  %v1517_v35 = vpop.f32.mrb[43].mxu0 }
 0x51c   :  { %v3472_v36 = vmul.f32 %v1517_v35, %v1505_v63  ;;  %v1566_v63 = vrot.slane %v3448_v62, 4 }
 0x51e   :  { %v1521_v40 = vpop.f32.mrb[44].mxu0 }
 0x51f   :  { %v1738_v46 = vmul.f32 %v1521_v40, %v1497_v13  ;;  %v3474_v47 = vmul.f32 %v1521_v40, %v1515_v21  ;;  %v1523_v49 = vpop.f32.mrb[45].mxu0  ;;  %v1536_v13 = vrot.slane %v1535_v5, 2  ;;  %v1588_v21 = vrot.slane %v3454_v6, 4 }
 0x520   :  { %v1739_v50 = vmul.f32 %v1523_v49, %v1499_v8  ;;  %v3476_v51 = vmul.f32 %v1523_v49, %v1517_v35  ;;  %v1724_v8 = vrot.slane %v1722_v57, 4  ;;  %v1731_v40 = vadd.f32 %v1730_v4, %v1723_v3 }
 0x521   :  { %v1740_v52 = vrot.slane %v1738_v46, 4  ;;  %v1537_v38 = vadd.f32 %v1536_v13, %v1535_v5  ;;  %v1567_v49 = vadd.f32 %v1566_v63, %v3448_v62  ;;  %v1762_v62 = vrot.slane %v3472_v36, 4 }
 0x522   :  { %v1746_v54 = vrot.slane %v1739_v50, 4  ;;  %v1725_v35 = vadd.f32 %v1724_v8, %v1722_v57  ;;  %v1778_v57 = vrot.slane %v3476_v51, 4 }
 0x523   :  { %v1741_v56 = vadd.f32 %v1740_v52, %v1738_v46  ;;  %v1538_v46 = vrot.slane %v1537_v38, 1  ;;  %v1583_v52 = vadd.f32 %v1582_v39, %v3452_v58 }
 0x524   :  { %v1747_v15 = vadd.f32 %v1746_v54, %v1739_v50  ;;  %v1573_v50 = vadd.f32 %v1572_v10, %v3450_v32  ;;  %v1589_v54 = vadd.f32 %v1588_v21, %v3454_v6  ;;  %v1779_v33 = vadd.f32 %v1778_v57, %v3476_v51 }
 0x525   :  { %v1742_v43 = vrot.slane %v1741_v56, 2  ;;  %v1539_v32 = vadd.f32 %v1538_v46, %v1537_v38 }
 0x526   :  { %v1748_v45 = vrot.slane %v1747_v15, 2  ;;  %v1574_v58 = vrot.slane %v1573_v50, 2  ;;  %v1780_v51 = vrot.slane %v1779_v33, 2 }
 0x527   :  { %v1743_v12 = vadd.f32 %v1742_v43, %v1741_v56  ;;  %v1726_v56 = vrot.slane %v1725_v35, 2  ;;  %v3504_v38 = vmul.f32 0.35355338, %v1539_v32 }
 0x528   :  { %v1749_v0 = vadd.f32 %v1748_v45, %v1747_v15  ;;  %v1544_v45 = vrot.slane %v1543_v42, 1  ;;  %v1575_v10 = vadd.f32 %v1574_v58, %v1573_v50 }
 0x529   :  { %v1744_v28 = vrot.slane %v1743_v12, 1  ;;  %v1727_v7 = vadd.f32 %v1726_v56, %v1725_v35 }
 0x52a   :  { %v1750_v18 = vrot.slane %v1749_v0, 1  ;;  %v1545_v5 = vadd.f32 %v1544_v45, %v1543_v42 }
 0x52b   :  { %v1745_v14 = vadd.f32 %v1744_v28, %v1743_v12  ;;  %v1732_v12 = vrot.slane %v1731_v40, 2  ;;  %v1756_v28 = vrot.slane %v3470_v2, 4 }
 0x52c   :  { %v1751_v59 = vadd.f32 %v1750_v18, %v1749_v0  ;;  %v1772_v0 = vrot.slane %v3474_v47, 4 }
 0x52d   :  { %v3478_v25 = vmul.f32 0.35355338, %v1745_v14  ;;  %v1568_v14 = vrot.slane %v1567_v49, 2  ;;  %v1733_v27 = vadd.f32 %v1732_v12, %v1731_v40  ;;  %v1757_v4 = vadd.f32 %v1756_v28, %v3470_v2 }
 0x52e   :  { %v3480_v37 = vmul.f32 0.35355338, %v1751_v59  ;;  %v1584_v59 = vrot.slane %v1583_v52, 2  ;;  %v1773_v13 = vadd.f32 %v1772_v0, %v3474_v47  ;;  %v1728_v47 = vrot.slane %v1727_v7, 1 }
 0x52f   :  { %v1569_v63 = vadd.f32 %v1568_v14, %v1567_v49  ;;  %v1734_v46 = vrot.slane %v1733_v27, 1  ;;  %v1758_v2 = vrot.slane %v1757_v4, 2 }
 0x530   :  { %v1789_v26 = vmax.f32 %v3478_v25, %v3480_v37  ;;  %v1585_v39 = vadd.f32 %v1584_v59, %v1583_v52  ;;  %v1774_v40 = vrot.slane %v1773_v13, 2  ;;  %v3514_v52 = vmul.f32 0.35355338, %v1545_v5 }
 0x531   :  { %v1735_v58 = vadd.f32 %v1734_v46, %v1733_v27 }
 0x532   :  { %1790 = vmax.xlane.f32.xlu1 %v1789_v26  ;;  %v1590_v26 = vrot.slane %v1589_v54, 2  ;;  %v1586_v12 = vrot.slane %v1585_v39, 1  ;;  %v1775_v57 = vadd.f32 %v1774_v40, %v1773_v13  ;;  %v1596_v59 = vmax.f32 %v3504_v38, %v3514_v52 }
 0x534   :  { %v1591_v35 = vadd.f32 %v1590_v26, %v1589_v54  ;;  %v1570_v54 = vrot.slane %v1569_v63, 1 }
 0x536   :  { %v1592_v0 = vrot.slane %v1591_v35, 1 }
 0x578   :  { %v912_v30 = vpop.xlane.xlu0 %911 }
 0x579   :  { %v913_v29 = vrot.slane %v912_v30, 4 }
 0x57b   :  { %v914_v44 = vadd.f32 %v913_v29, %v912_v30  ;;  %v1763_v30 = vadd.f32 %v1762_v62, %v3472_v36  ;;  %v1729_v62 = vadd.f32 %v1728_v47, %v1727_v7 }
 0x57d   :  { %v915_v61 = vrot.slane %v914_v44, 2  ;;  %v1764_v56 = vrot.slane %v1763_v30, 2 }
 0x57f   :  { %v916_v15 = vadd.f32 %v915_v61, %v914_v44  ;;  %v946_v43 = vpop.xlane.xlu1 %945  ;;  %v1765_v32 = vadd.f32 %v1764_v56, %v1763_v30  ;;  %v1737_v30 = vmul.f32 0.35355338, %v1735_v58 }
 0x580   :  { %v947_v3 = vrot.slane %v946_v43, 4 }
 0x581   :  { %v917_v18 = vrot.slane %v916_v15, 1 }
 0x582   :  { %v948_v6 = vadd.f32 %v947_v3, %v946_v43  ;;  %v1781_v3 = vadd.f32 %v1780_v51, %v1779_v33  ;;  %v1776_v33 = vrot.slane %v1775_v57, 1 }
 0x583   :  { %v918_v34 = vadd.f32 %v917_v18, %v916_v15  ;;  %v1576_v15 = vrot.slane %v1575_v10, 1  ;;  %v1759_v18 = vadd.f32 %v1758_v2, %v1757_v4  ;;  %v1736_v4 = vmul.f32 0.35355338, %v1729_v62 }
 0x584   :  { %v949_v8 = vrot.slane %v948_v6, 2  ;;  %v1782_v27 = vrot.slane %v1781_v3, 1  ;;  %v1777_v40 = vadd.f32 %v1776_v33, %v1775_v57 }
 0x585   :  { %v919_v29 = vmul.f32 0.0006377551, %v918_v34  ;;  %v1571_v34 = vadd.f32 %v1570_v54, %v1569_v63  ;;  %v1577_v5 = vadd.f32 %v1576_v15, %v1575_v10 }
 0x586   :  { %v950_v21 = vadd.f32 %v949_v8, %v948_v6  ;;  %v1587_v8 = vadd.f32 %v1586_v12, %v1585_v39  ;;  %v1783_v51 = vadd.f32 %v1782_v27, %v1781_v3  ;;  %v3544_v54 = vmul.f32 0.35355338, %v1777_v40 }
 0x587   :  { %v920_v42 = vsub.f32 %v3419_v41, %v919_v29  ;;  %v921_v44 = vsub.f32 %v3424_v48, %v919_v29  ;;  %v1593_v29 = vadd.f32 %v1592_v0, %v1591_v35  ;;  %v3534_v10 = vmul.f32 0.35355338, %v1571_v34 }
 0x588   :  { %v951_v61 = vrot.slane %v950_v21, 1  ;;  %v3536_v39 = vmul.f32 0.35355338, %v1587_v8  ;;  %v3540_v46 = vmul.f32 0.35355338, %v1577_v5 }
 0x589   :  { %v3509_v36 = vmul.f32 %v920_v42, %v3011_v16  ;;  %v3512_v49 = vmul.f32 %v921_v44, %v3014_v17  ;;  %v1766_v42 = vrot.slane %v1765_v32, 1  ;;  %v3538_v47 = vmul.f32 0.35355338, %v1593_v29 }
 0x58a   :  { %v952_v50 = vadd.f32 %v951_v61, %v950_v21  ;;  %v1760_v21 = vrot.slane %v1759_v18, 1  ;;  %v1786_v61 = vmax.f32 %v1736_v4, %v1737_v30  ;;  %v3546_v15 = vmul.f32 0.35355338, %v1783_v51 }
 0x58b   :  { %v924_v43 = vmul.f32 %v3509_v36, %v3509_v36  ;;  %v925_v45 = vmul.f32 %v3512_v49, %v3512_v49  ;;  %v1767_v56 = vadd.f32 %v1766_v42, %v1765_v32 }
 0x58c   :  { %v953_v28 = vmul.f32 0.0006377551, %v952_v50  ;;  %v1761_v2 = vadd.f32 %v1760_v21, %v1759_v18  ;;  %v1640_v50 = vmax.f32 %v3536_v39, %v3538_v47  ;;  %v1830_v0 = vmax.f32 %v3544_v54, %v3546_v15 }
 0x58d   :  { %v926_v14 = vadd.f32 %v925_v45, %v924_v43  ;;  %v1637_v43 = vmax.f32 %v3534_v10, %v3540_v46  ;;  %v3552_v12 = vmul.f32 0.35355338, %v1767_v56 }
 0x58e   :  { %v954_v6 = vsub.f32 %v3434_v53, %v953_v28  ;;  %v955_v26 = vsub.f32 %v3436_v55, %v953_v28  ;;  %v3550_v45 = vmul.f32 0.35355338, %v1761_v2 }
 0x58f   :  { %927 = vadd.xlane.f32.xlu0 %v926_v14 }
 0x590   :  { %v3525_v13 = vmul.f32 %v954_v6, %v3011_v16  ;;  %v3528_v7 = vmul.f32 %v955_v26, %v3014_v17  ;;  %v1827_v57 = vmax.f32 %v3550_v45, %v3552_v12 }
 0x592   :  { %v958_v44 = vmul.f32 %v3525_v13, %v3525_v13  ;;  %v959_v63 = vmul.f32 %v3528_v7, %v3528_v7 }
 0x593   :  { %1597 = vmax.xlane.f32.xlu0 %v1596_v59 }
 0x594   :  { %v960_v35 = vadd.f32 %v959_v63, %v958_v44 }
 0x596   :  { %961 = vadd.xlane.f32.xlu1 %v960_v35 }
 0x597   :  { %1787 = vmax.xlane.f32.xlu0 %v1786_v61 }
 0x59a   :  { %1641 = vmax.xlane.f32.xlu1 %v1640_v50 }
 0x59b   :  { %1638 = vmax.xlane.f32.xlu0 %v1637_v43 }
 0x59e   :  { %1831 = vmax.xlane.f32.xlu1 %v1830_v0 }
 0x59f   :  { %1828 = vmax.xlane.f32.xlu0 %v1827_v57 }
 0x5a7   :  { %v1601_v3 = vpop.xlane.xlu1 %1600 }
 0x5bf   :  { %v1791_v18 = vpop.xlane.xlu1 %1790 }
 0x61c   :  { %v928_v28 = vpop.xlane.xlu0 %927 }
 0x61d   :  { %v929_v62 = vrot.slane %v928_v28, 4 }
 0x61f   :  { %v930_v32 = vadd.f32 %v929_v62, %v928_v28 }
 0x620   :  { %v1598_v14 = vpop.xlane.xlu0 %1597 }
 0x621   :  { %v1602_v58 = vmax.f32 %v1598_v14, %v1601_v3  ;;  %v931_v5 = vrot.slane %v930_v32, 2 }
 0x623   :  { %v1603_v59 = vsub.f32 %v3504_v38, %v1602_v58  ;;  %v1604_v6 = vsub.f32 %v3514_v52, %v1602_v58  ;;  %v1611_v26 = vsub.f32 %v3460_v31, %v1602_v58  ;;  %v3561_v34 = vpop.xlane.xlu1 %961  ;;  %v1612_v8 = vsub.f32 %v3464_v23, %v1602_v58 }
 0x624   :  { %v1788_v29 = vpop.xlane.xlu0 %1787  ;;  %v932_v38 = vadd.f32 %v931_v5, %v930_v32 }
 0x625   :  { %v1605_v33 = vmul.f32 1.442695, %v1603_v59  ;;  %v1607_v27 = vmul.f32 1.442695, %v1604_v6  ;;  %v1792_v21 = vmax.f32 %v1788_v29, %v1791_v18  ;;  %v1613_v42 = vmul.f32 1.442695, %v1611_v26 }
 0x626   :  { %v1615_v44 = vmul.f32 1.442695, %v1612_v8  ;;  %v933_v0 = vrot.slane %v932_v38, 1 }
 0x627   :  { %2624 = vpow2.f32 %v1605_v33  ;;  %v1793_v63 = vsub.f32 %v1736_v4, %v1792_v21  ;;  %v1794_v35 = vsub.f32 %v1737_v30, %v1792_v21  ;;  %v1642_v40 = vpop.xlane.xlu1 %1641  ;;  %v1801_v52 = vsub.f32 %v3478_v25, %v1792_v21 }
 0x628   :  { %2626 = vpow2.f32 %v1607_v27  ;;  %v1802_v31 = vsub.f32 %v3480_v37, %v1792_v21  ;;  %v1639_v51 = vpop.xlane.xlu0 %1638  ;;  %v934_v32 = vadd.f32 %v933_v0, %v932_v38 }
 0x629   :  { %2628 = vpow2.f32 %v1613_v42  ;;  %v1795_v61 = vmul.f32 1.442695, %v1793_v63  ;;  %v1797_v23 = vmul.f32 1.442695, %v1794_v35  ;;  %v1803_v2 = vmul.f32 1.442695, %v1801_v52 }
 0x62a   :  { %2630 = vpow2.f32 %v1615_v44  ;;  %v1805_v56 = vmul.f32 1.442695, %v1802_v31  ;;  %v1643_v50 = vmax.f32 %v1639_v51, %v1642_v40 }
 0x62b   :  { %2632 = vpow2.f32 %v1795_v61  ;;  %v1832_v43 = vpop.xlane.xlu1 %1831 }
 0x62c   :  { %2634 = vpow2.f32 %v1797_v23  ;;  %v1829_v4 = vpop.xlane.xlu0 %1828  ;;  %v1644_v30 = vsub.f32 %v3534_v10, %v1643_v50  ;;  %v1645_v57 = vsub.f32 %v3540_v46, %v1643_v50  ;;  %v1652_v25 = vsub.f32 %v3536_v39, %v1643_v50 }
 0x62d   :  { %2636 = vpow2.f32 %v1803_v2  ;;  %v1653_v37 = vsub.f32 %v3538_v47, %v1643_v50  ;;  %v1833_v3 = vmax.f32 %v1829_v4, %v1832_v43 }
 0x62e   :  { %2638 = vpow2.f32 %v1805_v56  ;;  %v1646_v28 = vmul.f32 1.442695, %v1644_v30  ;;  %v1648_v62 = vmul.f32 1.442695, %v1645_v57  ;;  %v1654_v18 = vmul.f32 1.442695, %v1652_v25 }
 0x62f   :  { %v1834_v14 = vsub.f32 %v3550_v45, %v1833_v3  ;;  %v1835_v58 = vsub.f32 %v3552_v12, %v1833_v3  ;;  %v1656_v10 = vmul.f32 1.442695, %v1653_v37  ;;  %v1842_v46 = vsub.f32 %v3544_v54, %v1833_v3 }
 0x630   :  { %2640 = vpow2.f32 %v1646_v28  ;;  %v1843_v39 = vsub.f32 %v3546_v15, %v1833_v3  ;;  %v935_v45 = vmul.f32 0.0006377551, %v934_v32 }
 0x631   :  { %v2625_v59 = vpop.eup %2624  ;;  %2642 = vpow2.f32 %v1648_v62  ;;  %v1836_v47 = vmul.f32 1.442695, %v1834_v14  ;;  %v1838_v5 = vmul.f32 1.442695, %v1835_v58  ;;  %v1844_v33 = vmul.f32 1.442695, %v1842_v46 }
 0x632   :  { %v2627_v6 = vpop.eup %2626  ;;  %2644 = vpow2.f32 %v1654_v18  ;;  %v3575_v8 = vmul.f32 %v2625_v59, %v3011_v16  ;;  %v1846_v15 = vmul.f32 1.442695, %v1843_v39  ;;  %v936_v30 = vadd.f32 1e-05, %v935_v45 }
 0x633   :  { %v2629_v26 = vpop.eup %2628  ;;  %v3581_v27 = vmul.f32 %v2627_v6, %v3014_v17  ;;  %2646 = vpow2.f32 %v1656_v10 }
 0x634   :  { %v2631_v29 = vpop.eup %2630  ;;  %v3578_v12 = vmul.f32 %v2629_v26, %v3011_v16  ;;  %v1619_v42 = vsel %vm466_vm1, %v3575_v8, 0.0  ;;  %2648 = vpow2.f32 %v1836_v47 }
 0x635   :  { %v2633_v54 = vpop.eup %2632  ;;  %v3584_v21 = vmul.f32 %v2631_v29, %v3014_v17  ;;  %v1620_v35 = vsel %vm466_vm1, %v3581_v27, 0.0  ;;  %2650 = vpow2.f32 %v1838_v5 }
 0x636   :  { %v2635_v44 = vpop.eup %2634  ;;  %v1625_v63 = vsel %vm466_vm1, %v3578_v12, 0.0  ;;  %v3593_v40 = vmul.f32 %v2633_v54, %v3011_v16  ;;  %v1621_v52 = vadd.f32 %v1620_v35, %v1619_v42  ;;  %2652 = vpow2.f32 %v1844_v33 }
 0x637   :  { %v1626_v38 = vsel %vm466_vm1, %v3584_v21, 0.0  ;;  %v3598_v31 = vmul.f32 %v2635_v44, %v3014_v17  ;;  %v2637_v51 = vpop.eup %2636  ;;  %2654 = vpow2.f32 %v1846_v15  ;;  %v963_v33 = vrot.slane %v3561_v34, 4 }
 0x638   :  { %v1627_v61 = vadd.f32 %v1626_v38, %v1625_v63  ;;  %v2639_v23 = vpop.eup %2638  ;;  %1622 = vadd.xlane.f32.xlu0 %v1621_v52  ;;  %v1809_v2 = vsel %vm466_vm1, %v3593_v40, 0.0  ;;  %v3605_v50 = vmul.f32 %v2637_v51, %v3011_v16  ;;  %2656 = vrsqrt.f32 %v936_v30  ;;  %v3659_v30 = vld [vmem:[#allocation7 + $0x8] sm:$0xff] }
 0x639   :  { %v1810_v56 = vsel %vm466_vm1, %v3598_v31, 0.0  ;;  %v3608_v0 = vmul.f32 %v2639_v23, %v3014_v17  ;;  %v964_v52 = vadd.f32 %v963_v33, %v3561_v34 }
 0x63a   :  { %1628 = vadd.xlane.f32.xlu1 %v1627_v61  ;;  %v1811_v43 = vadd.f32 %v1810_v56, %v1809_v2  ;;  %v2641_v4 = vpop.eup %2640  ;;  %v1815_v25 = vsel %vm466_vm1, %v3605_v50, 0.0  ;;  %v3656_v2 = vld [vmem:[#allocation7] sm:$0xff] }
 0x63b   :  { %v2643_v57 = vpop.eup %2642  ;;  %v1816_v37 = vsel %vm466_vm1, %v3608_v0, 0.0  ;;  %v3615_v3 = vmul.f32 %v2641_v4, %v3011_v16  ;;  %v965_v4 = vrot.slane %v964_v52, 2 }
 0x63c   :  { %v2645_v28 = vpop.eup %2644  ;;  %1812 = vadd.xlane.f32.xlu0 %v1811_v43  ;;  %v3618_v62 = vmul.f32 %v2643_v57, %v3014_v17  ;;  %v1817_v14 = vadd.f32 %v1816_v37, %v1815_v25  ;;  %v3666_v37 = vld [vmem:[%s4266_s7] sm:$0xff] }
 0x63d   :  { %v3621_v18 = vmul.f32 %v2645_v28, %v3011_v16  ;;  %v2647_v32 = vpop.eup %2646  ;;  %v1660_v46 = vsel %vm466_vm1, %v3615_v3, 0.0  ;;  %v966_v25 = vadd.f32 %v965_v4, %v964_v52 }
 0x63e   :  { %v2649_v58 = vpop.eup %2648  ;;  %v3624_v59 = vmul.f32 %v2647_v32, %v3014_v17  ;;  %v1661_v39 = vsel %vm466_vm1, %v3618_v62, 0.0 }
 0x63f   :  { %v1666_v10 = vsel %vm466_vm1, %v3621_v18, 0.0  ;;  %v2651_v6 = vpop.eup %2650  ;;  %v3633_v47 = vmul.f32 %v2649_v58, %v3011_v16  ;;  %v1662_v15 = vadd.f32 %v1661_v39, %v1660_v46  ;;  %v3675_v58 = vld [vmem:[%s4266_s7 + $0x8] sm:$0xff]  ;;  %v3686_v39 = vpop.f32.mrb[46].mxu0  ;;  %s2849_s7 = smov 13  }
 0x640   :  { %1818 = vadd.xlane.f32.xlu0 %v1817_v14  ;;  %v2653_v26 = vpop.eup %2652  ;;  %v1667_v5 = vsel %vm466_vm1, %v3624_v59, 0.0  ;;  %v3638_v29 = vmul.f32 %v2651_v6, %v3014_v17  ;;  %v967_v14 = vrot.slane %v966_v25, 1  ;;  %v3692_v6 = vpop.f32.mrb[47].mxu0 }
 0x641   :  { %v2655_v45 = vpop.eup %2654  ;;  %v1668_v54 = vadd.f32 %v1667_v5, %v1666_v10  ;;  %v1850_v42 = vsel %vm466_vm1, %v3633_v47, 0.0  ;;  %v3646_v63 = vmul.f32 %v2653_v26, %v3011_v16  ;;  %v3702_v5 = vld [vmem:[#allocation8 + $0x8] sm:$0xff] }
 0x642   :  { %v1851_v44 = vsel %vm466_vm1, %v3638_v29, 0.0  ;;  %v3649_v35 = vmul.f32 %v2655_v45, %v3014_v17  ;;  %v2657_v23 = vpop.eup %2656  ;;  %v968_v10 = vadd.f32 %v967_v14, %v966_v25  ;;  %4296 = vst [vmem:[#allocation24_spill] sm:$0xff] %v3702_v5  ;;  %v3708_v45 = vld [vmem:[#allocation8] sm:$0xff] }
 0x643   :  { %1669 = vadd.xlane.f32.xlu1 %v1668_v54  ;;  %v1852_v38 = vadd.f32 %v1851_v44, %v1850_v42  ;;  %v1856_v51 = vsel %vm466_vm1, %v3646_v63, 0.0  ;;  %v938_v43 = vmul.f32 %v2657_v23, %v3656_v2  ;;  %v939_v57 = vmul.f32 %v2657_v23, %v3659_v30  ;;  %4297 = vst [vmem:[#allocation25_spill] sm:$0xff] %v3708_v45  ;;  %v3717_v42 = vld [vmem:[#allocation10 + $0x8] sm:$0xff]  ;;  %v2428_v14 = vld [vmem:[%s4262_s3 + $0x2] sm:$0x3] }
 0x644   :  { %1663 = vadd.xlane.f32.xlu0 %v1662_v15  ;;  %v1857_v61 = vsel %vm466_vm1, %v3649_v35, 0.0  ;;  %4298 = vst [vmem:[#allocation26_spill] sm:$0xff] %v3717_v42 }
 0x645   :  { %v1858_v56 = vadd.f32 %v1857_v61, %v1856_v51  ;;  %v940_v34 = vmul.f32 %v938_v43, %v3509_v36  ;;  %v941_v28 = vmul.f32 %v939_v57, %v3512_v49  ;;  %v969_v49 = vmul.f32 0.0006377551, %v968_v10 }
 0x647   :  { %v3670_v32 = vadd.f32 %v940_v34, %v3666_v37  ;;  %v3680_v36 = vadd.f32 %v941_v28, %v3675_v58  ;;  %v970_v46 = vadd.f32 1e-05, %v969_v49 }
 0x648   :  { %1853 = vadd.xlane.f32.xlu0 %v1852_v38  ;;  %v3724_v38 = vld [vmem:[#allocation10] sm:$0xff] }
 0x649   :  { %2658 = vrsqrt.f32 %v970_v46  ;;  %4299 = vst [vmem:[#allocation27_spill] sm:$0xff] %v3724_v38 }
 0x64c   :  { %1859 = vadd.xlane.f32.xlu0 %v1858_v56 }
 0x653   :  { %v2659_v26 = vpop.eup %2658 }
 0x654   :  { %983 = vrot.lane.b32.xlu1 %v3670_v32, %s2847_s28  ;;  %v973_v33 = vmul.f32 %v2659_v26, %v3702_v5  ;;  %v972_v54 = vmul.f32 %v2659_v26, %v3708_v45 }
 0x656   :  { %v975_v15 = vmul.f32 %v973_v33, %v3528_v7  ;;  %v974_v44 = vmul.f32 %v972_v54, %v3525_v13  ;;  %v3769_v13 = vld [vmem:[%s4271_s12 + $0x8] sm:$0xff] }
 0x657   :  { %2449 = vmatprep.mubr.msk.f32.mxu1 %vm760_vm2, %v3769_v13 }
 0x658   :  { %1003 = vrot.lane.b32.xlu1 %v3680_v36, %s2848_s20  ;;  %v3727_v52 = vadd.f32 %v975_v15, %v3717_v42  ;;  %v3734_v7 = vadd.f32 %v974_v44, %v3724_v38 }
 0x65c   :  { %1006 = vrot.lane.b32.xlu1 %v3670_v32, %s2848_s20 }
 0x660   :  { %1029 = vrot.lane.b32.xlu1 %v3670_v32, %s2849_s7 }
 0x662   :  { %979 = vrot.lane.b32.xlu0 %v3680_v36, %s2847_s28 }
 0x664   :  { %1052 = vrot.lane.b32.xlu1 %v3670_v32, %s2850_s22 }
 0x666   :  { %1026 = vrot.lane.b32.xlu0 %v3680_v36, %s2849_s7 }
 0x668   :  { %1074 = vrot.lane.b32.xlu1 %v3680_v36, %s2851_s4 }
 0x66a   :  { %1049 = vrot.lane.b32.xlu0 %v3680_v36, %s2850_s22 }
 0x66c   :  { %1097 = vrot.lane.b32.xlu1 %v3680_v36, %s2852_s10 }
 0x66e   :  { %1072 = vrot.lane.b32.xlu0 %v3670_v32, %s2851_s4 }
 0x670   :  { %1118 = vrot.lane.b32.xlu1 %v3670_v32, %s2853_s23 }
 0x672   :  { %1095 = vrot.lane.b32.xlu0 %v3670_v32, %s2852_s10 }
 0x674   :  { %1120 = vrot.lane.b32.xlu1 %v3680_v36, %s2853_s23 }
 0x676   :  { %1141 = vrot.lane.b32.xlu0 %v3670_v32, %s2854_s24 }
 0x678   :  { %1143 = vrot.lane.b32.xlu1 %v3680_v36, %s2854_s24 }
 0x67a   :  { %1165 = vrot.lane.b32.xlu0 %v3727_v52, %s2847_s28 }
 0x67c   :  { %1169 = vrot.lane.b32.xlu1 %v3734_v7, %s2847_s28 }
 0x67e   :  { %1177 = vrot.lane.b32.xlu0 %v3727_v52, %s2848_s20 }
 0x680   :  { %1180 = vrot.lane.b32.xlu1 %v3734_v7, %s2848_s20 }
 0x682   :  { %1188 = vrot.lane.b32.xlu0 %v3727_v52, %s2849_s7 }
 0x684   :  { %1191 = vrot.lane.b32.xlu1 %v3734_v7, %s2849_s7 }
 0x686   :  { %1199 = vrot.lane.b32.xlu0 %v3727_v52, %s2850_s22 }
 0x688   :  { %1202 = vrot.lane.b32.xlu1 %v3734_v7, %s2850_s22 }
 0x68a   :  { %1210 = vrot.lane.b32.xlu0 %v3734_v7, %s2851_s4 }
 0x68c   :  { %1212 = vrot.lane.b32.xlu1 %v3727_v52, %s2851_s4 }
 0x68e   :  { %1232 = vrot.lane.b32.xlu0 %v3734_v7, %s2853_s23 }
 0x690   :  { %1221 = vrot.lane.b32.xlu1 %v3734_v7, %s2852_s10 }
 0x692   :  { %1243 = vrot.lane.b32.xlu0 %v3734_v7, %s2854_s24 }
 0x694   :  { %1223 = vrot.lane.b32.xlu1 %v3727_v52, %s2852_s10 }
 0x698   :  { %1234 = vrot.lane.b32.xlu1 %v3727_v52, %s2853_s23 }
 0x69c   :  { %1245 = vrot.lane.b32.xlu1 %v3727_v52, %s2854_s24 }
 0x6c5   :  { %v1623_v51 = vpop.xlane.xlu0 %1622 }
 0x6c7   :  { %v1629_v61 = vpop.xlane.xlu1 %1628 }
 0x6c8   :  { %v1631_v23 = vadd.f32 %v1629_v61, %v1623_v51  ;;  %v110_v51 = vld [vmem:[%s4262_s3] sm:$0x3] }
 0x6c9   :  { %v1813_v56 = vpop.xlane.xlu0 %1812 }
 0x6ca   :  { %2660 = vrcp.f32 %v1631_v23 }
 0x6cd   :  { %v1819_v43 = vpop.xlane.xlu0 %1818 }
 0x6ce   :  { %v1821_v4 = vadd.f32 %v1819_v43, %v1813_v56 }
 0x6d0   :  { %2662 = vrcp.f32 %v1821_v4  ;;  %v1670_v57 = vpop.xlane.xlu1 %1669 }
 0x6d1   :  { %v1664_v34 = vpop.xlane.xlu0 %1663 }
 0x6d2   :  { %v1672_v25 = vadd.f32 %v1670_v57, %v1664_v34 }
 0x6d4   :  { %v2661_v28 = vpop.eup %2660  ;;  %2664 = vrcp.f32 %v1672_v25  ;;  %v984_v26 = vpop.permute.xlu1 %983  ;;  %v3800_v25 = vrot.slane %v110_v51, %v3006_v11 }
 0x6d5   :  { %v1633_v10 = vmul.f32 %v2661_v28, %v3575_v8  ;;  %v1635_v49 = vmul.f32 %v2661_v28, %v3578_v12  ;;  %v1634_v46 = vmul.f32 %v2661_v28, %v3581_v27  ;;  %v1854_v33 = vpop.xlane.xlu0 %1853  ;;  %v1636_v54 = vmul.f32 %v2661_v28, %v3584_v21  ;;  %v4300_v12 = vld [vmem:[#allocation19_spill] sm:$0xff] }
 0x6d6   :  { %v3787_v8 = vrot.slane %v2428_v14, %v3006_v11  ;;  %v3790_v27 = vrot.slane %v2428_v14, %v4300_v12  ;;  %v2429_v21 = vld [vmem:[%s4262_s3 + $0x4] sm:$0x3]  ;;  %v3803_v28 = vrot.slane %v110_v51, %v4300_v12  ;;  %v2430_v14 = vld [vmem:[%s4262_s3 + $0x6] sm:$0x3] }
 0x6d7   :  { %v1681_v15 = vrot.slane %v1633_v10, %v3006_v11  ;;  %v1691_v44 = vrot.slane %v1635_v49, %v3006_v11  ;;  %v1685_v61 = vrot.slane %v1634_v46, %v3006_v11  ;;  %v1695_v23 = vrot.slane %v1636_v54, %v3006_v11 }
 0x6d8   :  { %v1004_v57 = vpop.permute.xlu1 %1003 }
 0x6d9   :  { %v1686_v56 = vmul.f32 %v1681_v15, %v3444_v60  ;;  %v1696_v43 = vmul.f32 %v1691_v44, %v3456_v20  ;;  %v1687_v4 = vmul.f32 %v1685_v61, %v3446_v22  ;;  %v1860_v34 = vpop.xlane.xlu0 %1859  ;;  %v1697_v10 = vmul.f32 %v1695_v23, %v3458_v1 }
 0x6da   :  { %v2663_v49 = vpop.eup %2662  ;;  %v1862_v46 = vadd.f32 %v1860_v34, %v1854_v33  ;;  %v3812_v15 = vrot.slane %v2429_v21, %v3006_v11  ;;  %v3815_v44 = vrot.slane %v2429_v21, %v4300_v12  ;;  %v2431_v33 = vld [vmem:[%s4262_s3 + $0xa] sm:$0x3]  ;;  %v3825_v23 = vrot.slane %v2430_v14, %v3006_v11 }
 0x6db   :  { %v3809_v54 = vadd.f32 %v1696_v43, %v1686_v56  ;;  %v1823_v51 = vmul.f32 %v2663_v49, %v3593_v40  ;;  %v1825_v61 = vmul.f32 %v2663_v49, %v3605_v50  ;;  %v1824_v55 = vmul.f32 %v2663_v49, %v3598_v31 }
 0x6dc   :  { %v1826_v53 = vmul.f32 %v2663_v49, %v3608_v0  ;;  %2666 = vrcp.f32 %v1862_v46  ;;  %v3828_v21 = vrot.slane %v2430_v14, %v4300_v12  ;;  %v3830_v56 = vadd.f32 %v1697_v10, %v1687_v4  ;;  %v1007_v40 = vpop.permute.xlu1 %1006 }
 0x6dd   :  { %v1871_v50 = vrot.slane %v1823_v51, %v3006_v11  ;;  %v1881_v31 = vrot.slane %v1825_v61, %v3006_v11  ;;  %v980_v0 = vpop.permute.xlu0 %979  ;;  %v1875_v43 = vrot.slane %v1824_v55, %v3006_v11  ;;  %v1012_v46 = vsel %vm1008_vm3, %v1004_v57, %v1007_v40 }
 0x6de   :  { %v1885_v34 = vrot.slane %v1826_v53, %v3006_v11  ;;  %v2665_v49 = vpop.eup %2664  ;;  %v986_v48 = vsel %vm985_vm4, %v984_v26, %v980_v0  ;;  %v989_v14 = vsel %vm985_vm4, %v980_v0, %v984_v26  ;;  %v3840_v4 = vrot.slane %v2431_v33, %v3006_v11 }
 0x6df   :  { %v1009_v10 = vsel %vm1008_vm3, %v1007_v40, %v1004_v57  ;;  %v1024_v51 = vmul.f32 %v3787_v8, %v1012_v46  ;;  %v1674_v61 = vmul.f32 %v2665_v49, %v3615_v3  ;;  %v1676_v55 = vmul.f32 %v2665_v49, %v3621_v18 }
 0x6e0   :  { %v1876_v53 = vmul.f32 %v1871_v50, %v3462_v19  ;;  %v1886_v41 = vmul.f32 %v1881_v31, %v3686_v39  ;;  %v1001_v38 = vmul.f32 %v3800_v25, %v989_v14  ;;  %v1002_v26 = vmul.f32 %v3803_v28, %v986_v48  ;;  %v1030_v57 = vpop.permute.xlu1 %1029 }
 0x6e1   :  { %v1703_v0 = vrot.slane %v1674_v61, %v3006_v11  ;;  %v1713_v42 = vrot.slane %v1676_v55, %v3006_v11  ;;  %v1877_v40 = vmul.f32 %v1875_v43, %v3466_v9  ;;  %v1887_v3 = vmul.f32 %v1885_v34, %v3692_v6  ;;  %v1027_v46 = vpop.permute.xlu0 %1026 }
 0x6e2   :  { %v1025_v18 = vmul.f32 %v3790_v27, %v1009_v10  ;;  %v3855_v45 = vadd.f32 %v1886_v41, %v1876_v53  ;;  %v2481_v50 = vpack.c.bf16 %v1024_v51, %v1001_v38  ;;  %v1035_v31 = vsel %vm1031_vm5, %v1027_v46, %v1030_v57 }
 0x6e3   :  { %v1708_v14 = vmul.f32 %v1703_v0, %v3444_v60  ;;  %v1718_v48 = vmul.f32 %v1713_v42, %v3456_v20  ;;  %v3860_v61 = vadd.f32 %v1887_v3, %v1877_v40  ;;  %v1032_v55 = vsel %vm1031_vm5, %v1030_v57, %v1027_v46 }
 0x6e4   :  { %v2517_v43 = vpack.c.bf16 %v3855_v45, %v3809_v54  ;;  %v2479_v34 = vpack.c.bf16 %v1025_v18, %v1002_v26  ;;  %v3866_v5 = vrot.slane %v2431_v33, %v4300_v12  ;;  %v1675_v41 = vmul.f32 %v2665_v49, %v3618_v62  ;;  %v1053_v60 = vpop.permute.xlu1 %1052  ;;  %v2674_v45 = vld [vmem:[%s4270_s11] sm:$0xff] }
 0x6e5   :  { %v3869_v38 = vadd.f32 %v1718_v48, %v1708_v14  ;;  %v1047_v10 = vmul.f32 %v3812_v15, %v1035_v31  ;;  %v1050_v51 = vpop.permute.xlu0 %1049  ;;  %v2515_v20 = vpack.c.bf16 %v3860_v61, %v3830_v56  ;;  %v1677_v42 = vmul.f32 %v2665_v49, %v3624_v59 }
 0x6e6   :  { %v2667_v53 = vpop.eup %2666  ;;  %v1048_v0 = vmul.f32 %v3815_v44, %v1032_v55  ;;  %2480 = vmatprep.subr.bf16.mxu1 %v2479_v34  ;;  %v1055_v33 = vsel %vm1054_vm6, %v1053_v60, %v1050_v51  ;;  %v1058_v26 = vsel %vm1054_vm6, %v1050_v51, %v1053_v60  ;;  %v1707_v62 = vrot.slane %v1675_v41, %v3006_v11 }
 0x6e7   :  { %v1864_v57 = vmul.f32 %v2667_v53, %v3633_v47  ;;  %v1866_v40 = vmul.f32 %v2667_v53, %v3646_v63  ;;  %v1865_v3 = vmul.f32 %v2667_v53, %v3638_v29  ;;  %v1867_v46 = vmul.f32 %v2667_v53, %v3649_v35  ;;  %2482 = vmatpush1.bf16.msra.mxu1 %v2481_v50 }
 0x6e8   :  { %v1070_v59 = vmul.f32 %v3825_v23, %v1058_v26  ;;  %v1071_v49 = vmul.f32 %v3828_v21, %v1055_v33  ;;  %v1709_v18 = vmul.f32 %v1707_v62, %v3446_v22  ;;  %v1717_v31 = vrot.slane %v1677_v42, %v3006_v11  ;;  %v1075_v29 = vpop.permute.xlu1 %1074 }
 0x6e9   :  { %v1893_v14 = vrot.slane %v1864_v57, %v3006_v11  ;;  %v1903_v48 = vrot.slane %v1866_v40, %v3006_v11  ;;  %v1897_v47 = vrot.slane %v1865_v3, %v3006_v11  ;;  %v1907_v63 = vrot.slane %v1867_v46, %v3006_v11  ;;  %v1073_v55 = vpop.permute.xlu0 %1072  ;;  %v2432_v57 = vld [vmem:[%s4262_s3 + $0xc] sm:$0x3] }
 0x6ea   :  { %v2485_v35 = vpack.c.bf16 %v1070_v59, %v1047_v10  ;;  %v1077_v50 = vsel %vm1076_vm7, %v1073_v55, %v1075_v29  ;;  %v1081_v34 = vsel %vm1076_vm7, %v1075_v29, %v1073_v55  ;;  %v2483_v41 = vpack.c.bf16 %v1071_v49, %v1048_v0 }
 0x6eb   :  { %v1898_v22 = vmul.f32 %v1893_v14, %v3462_v19  ;;  %v1908_v60 = vmul.f32 %v1903_v48, %v3686_v39  ;;  %v1899_v51 = vmul.f32 %v1897_v47, %v3466_v9  ;;  %v1909_v42 = vmul.f32 %v1907_v63, %v3692_v6 }
 0x6ec   :  { %v1093_v53 = vmul.f32 %v3840_v4, %v1077_v50  ;;  %v1094_v33 = vmul.f32 %v3866_v5, %v1081_v34  ;;  %2484 = vmatprep.subr.bf16.mxu1 %v2483_v41  ;;  %v1719_v10 = vmul.f32 %v1717_v31, %v3458_v1  ;;  %v1098_v0 = vpop.permute.xlu1 %1097  ;;  %v2433_v1 = vld [vmem:[%s4262_s3 + $0xe] sm:$0x3]  ;;  %v3919_v46 = vrot.slane %v2432_v57, %v3006_v11  ;;  %v2434_v41 = vld [vmem:[%s4262_s3 + $0x10] sm:$0x3] }
 0x6ed   :  { %v3900_v26 = vadd.f32 %v1908_v60, %v1898_v22  ;;  %v3902_v62 = vadd.f32 %v1909_v42, %v1899_v51  ;;  %2486 = vmatpush1.bf16.msra.mxu1 %v2485_v35  ;;  %v1096_v19 = vpop.permute.xlu0 %1095  ;;  %v3922_v59 = vrot.slane %v2432_v57, %v4300_v12  ;;  %v3925_v49 = vrot.slane %v2433_v1, %v3006_v11 }
 0x6ee   :  { %v2489_v39 = vpack.c.bf16 %v1093_v53, %v3670_v32  ;;  %v2487_v9 = vpack.c.bf16 %v1094_v33, %v3680_v36  ;;  %v3911_v40 = vadd.f32 %v1719_v10, %v1709_v18  ;;  %v3928_v18 = vrot.slane %v2433_v1, %v4300_v12 }
 0x6ef   :  { %v2521_v6 = vpack.c.bf16 %v3900_v26, %v3869_v38  ;;  %v1100_v31 = vsel %vm1099_vm8, %v1096_v19, %v1098_v0  ;;  %v1104_v14 = vsel %vm1099_vm8, %v1098_v0, %v1096_v19  ;;  %v3942_v42 = vrot.slane %v2434_v41, %v3006_v11  ;;  %v2675_v38 = vld [vmem:[%s4259_s0 + $0x10] sm:$0xff] }
 0x6f0   :  { %2488 = vmatprep.subr.bf16.mxu1 %v2487_v9  ;;  %v1119_v3 = vpop.permute.xlu1 %1118  ;;  %v2519_v36 = vpack.c.bf16 %v3902_v62, %v3911_v40  ;;  %v1116_v29 = vmul.f32 %v3919_v46, %v1100_v31  ;;  %v1117_v55 = vmul.f32 %v3922_v59, %v1104_v14  ;;  %v3945_v53 = vrot.slane %v2434_v41, %v4300_v12  ;;  %v2454_v40 = vld [vmem:[%s4260_s1 + $0x18] sm:$0xff] }
 0x6f1   :  { %2490 = vmatpush1.bf16.msra.mxu1 %v2489_v39  ;;  %v1142_v32 = vpop.permute.xlu0 %1141 }
 0x6f4   :  { %v1121_v48 = vpop.permute.xlu1 %1120 }
 0x6f5   :  { %v1123_v47 = vsel %vm1122_vm9, %v1119_v3, %v1121_v48  ;;  %v1127_v63 = vsel %vm1122_vm9, %v1121_v48, %v1119_v3  ;;  %v1166_v34 = vpop.permute.xlu0 %1165 }
 0x6f6   :  { %v1139_v35 = vmul.f32 %v3925_v49, %v1123_v47  ;;  %v1140_v50 = vmul.f32 %v3928_v18, %v1127_v63 }
 0x6f8   :  { %v2493_v22 = vpack.c.bf16 %v1139_v35, %v1116_v29  ;;  %v1144_v60 = vpop.permute.xlu1 %1143  ;;  %v2491_v51 = vpack.c.bf16 %v1140_v50, %v1117_v55 }
 0x6f9   :  { %v1146_v33 = vsel %vm1145_vm10, %v1142_v32, %v1144_v60  ;;  %v1150_v10 = vsel %vm1145_vm10, %v1144_v60, %v1142_v32  ;;  %v1178_v0 = vpop.permute.xlu0 %1177 }
 0x6fa   :  { %2492 = vmatprep.subr.bf16.mxu1 %v2491_v51  ;;  %v1162_v57 = vmul.f32 %v3942_v42, %v1146_v33  ;;  %v1163_v11 = vmul.f32 %v3945_v53, %v1150_v10 }
 0x6fb   :  { %2494 = vmatpush1.bf16.msra.mxu1 %v2493_v22 }
 0x6fc   :  { %v1170_v19 = vpop.permute.xlu1 %1169 }
 0x6fd   :  { %v1171_v39 = vsel %vm985_vm4, %v1170_v19, %v1166_v34  ;;  %v1174_v9 = vsel %vm985_vm4, %v1166_v34, %v1170_v19  ;;  %v1189_v48 = vpop.permute.xlu0 %1188 }
 0x6fe   :  { %v1175_v1 = vmul.f32 %v1174_v9, %v3800_v25  ;;  %v1176_v12 = vmul.f32 %v1171_v39, %v3803_v28 }
 0x700   :  { %v2497_v3 = vpack.c.bf16 %v1175_v1, %v1162_v57  ;;  %v1181_v31 = vpop.permute.xlu1 %1180  ;;  %v2495_v14 = vpack.c.bf16 %v1176_v12, %v1163_v11 }
 0x701   :  { %v1182_v32 = vsel %vm1008_vm3, %v1181_v31, %v1178_v0  ;;  %v1185_v47 = vsel %vm1008_vm3, %v1178_v0, %v1181_v31  ;;  %v1200_v22 = vpop.permute.xlu0 %1199 }
 0x702   :  { %2496 = vmatprep.subr.bf16.mxu1 %v2495_v14  ;;  %v1186_v35 = vmul.f32 %v1185_v47, %v3787_v8  ;;  %v1187_v50 = vmul.f32 %v1182_v32, %v3790_v27 }
 0x703   :  { %2498 = vmatpush1.bf16.msra.mxu1 %v2497_v3 }
 0x704   :  { %v1192_v63 = vpop.permute.xlu1 %1191 }
 0x705   :  { %v1193_v29 = vsel %vm1031_vm5, %v1192_v63, %v1189_v48  ;;  %v1196_v55 = vsel %vm1031_vm5, %v1189_v48, %v1192_v63  ;;  %v1211_v1 = vpop.permute.xlu0 %1210 }
 0x706   :  { %v1197_v34 = vmul.f32 %v1196_v55, %v3812_v15  ;;  %v1198_v41 = vmul.f32 %v1193_v29, %v3815_v44 }
 0x708   :  { %v2501_v60 = vpack.c.bf16 %v1197_v34, %v1186_v35  ;;  %v1203_v51 = vpop.permute.xlu1 %1202  ;;  %v2499_v33 = vpack.c.bf16 %v1198_v41, %v1187_v50 }
 0x709   :  { %v1204_v10 = vsel %vm1054_vm6, %v1203_v51, %v1200_v22  ;;  %v1207_v0 = vsel %vm1054_vm6, %v1200_v22, %v1203_v51  ;;  %v1233_v47 = vpop.permute.xlu0 %1232 }
 0x70a   :  { %v1208_v19 = vmul.f32 %v1207_v0, %v3825_v23  ;;  %v1209_v39 = vmul.f32 %v1204_v10, %v3828_v21  ;;  %2500 = vmatprep.subr.bf16.mxu1 %v2499_v33 }
 0x70b   :  { %2502 = vmatpush1.bf16.msra.mxu1 %v2501_v60 }
 0x70c   :  { %v2505_v9 = vpack.c.bf16 %v3734_v7, %v1208_v19  ;;  %v1213_v57 = vpop.permute.xlu1 %1212  ;;  %v2503_v11 = vpack.c.bf16 %v3727_v52, %v1209_v39 }
 0x70d   :  { %v1214_v3 = vsel %vm1076_vm7, %v1211_v1, %v1213_v57  ;;  %v1218_v31 = vsel %vm1076_vm7, %v1213_v57, %v1211_v1  ;;  %v1244_v22 = vpop.permute.xlu0 %1243  ;;  %v3996_v1 = vld [vmem:[%s4271_s12 + $0x18] sm:$0xff] }
 0x70e   :  { %2504 = vmatprep.subr.bf16.mxu1 %v2503_v11  ;;  %v1219_v63 = vmul.f32 %v1214_v3, %v3840_v4  ;;  %v1220_v7 = vmul.f32 %v1218_v31, %v3866_v5  ;;  %v3988_v11 = vld [vmem:[%s4271_s12] sm:$0xff] }
 0x70f   :  { %2506 = vmatpush1.bf16.msra.mxu1 %v2505_v9 }
 0x710   :  { %v1222_v12 = vpop.permute.xlu1 %1221 }
 0x714   :  { %v1224_v14 = vpop.permute.xlu1 %1223 }
 0x715   :  { %v1225_v48 = vsel %vm1099_vm8, %v1222_v12, %v1224_v14  ;;  %v1229_v32 = vsel %vm1099_vm8, %v1224_v14, %v1222_v12  ;;  %v4007_v12 = vld [vmem:[%s4271_s12 + $0x10] sm:$0xff] }
 0x716   :  { %v1230_v52 = vmul.f32 %v1225_v48, %v3919_v46  ;;  %v1231_v29 = vmul.f32 %v1229_v32, %v3922_v59 }
 0x718   :  { %v2509_v55 = vpack.c.bf16 %v1230_v52, %v1219_v63  ;;  %v1235_v35 = vpop.permute.xlu1 %1234  ;;  %v2507_v50 = vpack.c.bf16 %v1231_v29, %v1220_v7 }
 0x719   :  { %v1236_v34 = vsel %vm1122_vm9, %v1233_v47, %v1235_v35  ;;  %v1240_v41 = vsel %vm1122_vm9, %v1235_v35, %v1233_v47 }
 0x71a   :  { %2508 = vmatprep.subr.bf16.mxu1 %v2507_v50  ;;  %v1241_v10 = vmul.f32 %v1236_v34, %v3925_v49  ;;  %v1242_v0 = vmul.f32 %v1240_v41, %v3928_v18 }
 0x71b   :  { %2510 = vmatpush1.bf16.msra.mxu1 %v2509_v55 }
 0x71c   :  { %v1246_v60 = vpop.permute.xlu1 %1245 }
 0x71d   :  { %v1247_v51 = vsel %vm1145_vm10, %v1244_v22, %v1246_v60  ;;  %v1251_v33 = vsel %vm1145_vm10, %v1246_v60, %v1244_v22 }
 0x71e   :  { %v1252_v19 = vmul.f32 %v1247_v51, %v3942_v42  ;;  %v1253_v39 = vmul.f32 %v1251_v33, %v3945_v53 }
 0x720   :  { %v2513_v9 = vpack.c.bf16 %v1252_v19, %v1241_v10  ;;  %v2511_v57 = vpack.c.bf16 %v1253_v39, %v1242_v0 }
 0x722   :  { %2512 = vmatprep.subr.bf16.mxu1 %v2511_v57 }
 0x723   :  { %2514 = vmatpush1.bf16.msra.mxu1 %v2513_v9 }
 0x724   :  { %2516 = vmatprep.subr.bf16.mxu1 %v2515_v20 }
 0x726   :  { %1335 = vmatmul.mubr.f32.vlgmr.msra.gmra.mrb[4].mxu1 %v3988_v11 }
 0x727   :  { %2518 = vmatpush1.bf16.msra.mxu1 %v2517_v43  ;;  %2450 = vmatprep.mubr.msk.f32.mxu1 %vm760_vm2, %v3996_v1 }
 0x728   :  { %2520 = vmatprep.subr.bf16.mxu1 %v2519_v36 }
 0x72a   :  { %1341 = vmatmul.mubr.f32.gmra.mrb[6].mxu1 %v4007_v12 }
 0x72b   :  { %1976 = vmatprep.mubr.f32.mxu1 %v4290_v24 }
 0x72e   :  { %2467 = vmatmul.mubr.msk.f32.vlgmr.msra.gmra.mrb[8].mxu1 %vm760_vm2, %v2674_v45 }
 0x72f   :  { %2522 = vmatpush1.bf16.msra.mxu1 %v2521_v6  ;;  %2047 = vmatprep.mubr.f32.mxu1 %v4290_v24  ;;  %v2453_v6 = vld [vmem:[%s4260_s1 + $0x10] sm:$0xff] }
 0x732   :  { %2468 = vmatmul.mubr.msk.f32.vlgmr.msra.gmra.mrb[10].mxu1 %vm760_vm2, %v2674_v45 }
 0x733   :  { %2469 = vmatprep.mubr.msk.f32.mxu1 %vm760_vm2, %v3769_v13  ;;  %v2676_v13 = vld [vmem:[%s4259_s0 + $0x18] sm:$0xff] }
 0x7f9   :  { %v4025_v54 = vpop.f32.mrb[4].mxu1 }
 0x7fa   :  { %v4027_v56 = vpop.f32.mrb[5].mxu1 }
 0x7fd   :  { %v4029_v61 = vpop.f32.mrb[6].mxu1 }
 0x7fe   :  { %v4031_v43 = vpop.f32.mrb[7].mxu1 }
 0x801   :  { %v1978_v20 = vpop.f32.mrb[8].mxu1 }
 0x802   :  { %v4036_v26 = vadd.f32 %v2675_v38, %v1978_v20  ;;  %v1980_v24 = vpop.f32.mrb[9].mxu1 }
 0x803   :  { %v4041_v62 = vadd.f32 %v2676_v13, %v1980_v24 }
 0x805   :  { %v2049_v36 = vpop.f32.mrb[10].mxu1  ;;  %v2058_v3 = vadd.f32 %v4041_v62, %v4036_v26 }
 0x806   :  { %v4051_v31 = vadd.f32 %v2453_v6, %v2049_v36  ;;  %v2051_v14 = vpop.f32.mrb[11].mxu1 }
 0x807   :  { %v4053_v48 = vadd.f32 %v2454_v40, %v2051_v14  ;;  %2059 = vadd.xlane.f32.xlu0 %v2058_v3 }
 0x809   :  { %v2092_v32 = vadd.f32 %v4053_v48, %v4051_v31 }
 0x80b   :  { %2093 = vadd.xlane.f32.xlu1 %v2092_v32  ;;  %v2855_v32 = vmov 0  }
 0x80c   :  { %2578 = vset.pattern.permute.xlu0 %v2855_v32  ;;  %2579 = vset.pattern.permute.xlu1 %v2855_v32 }
 0x894   :  { %v2060_v47 = vpop.xlane.xlu0 %2059 }
 0x895   :  { %v2061_v63 = vrot.slane %v2060_v47, 4 }
 0x897   :  { %v2062_v7 = vadd.f32 %v2061_v63, %v2060_v47 }
 0x898   :  { %v2094_v52 = vpop.xlane.xlu1 %2093 }
 0x899   :  { %v2063_v29 = vrot.slane %v2062_v7, 2  ;;  %v2095_v55 = vrot.slane %v2094_v52, 4 }
 0x89b   :  { %v2064_v35 = vadd.f32 %v2063_v29, %v2062_v7  ;;  %v2096_v50 = vadd.f32 %v2095_v55, %v2094_v52 }
 0x89d   :  { %v2065_v34 = vrot.slane %v2064_v35, 1  ;;  %v2097_v41 = vrot.slane %v2096_v50, 2 }
 0x89f   :  { %v2066_v22 = vadd.f32 %v2065_v34, %v2064_v35  ;;  %v2098_v60 = vadd.f32 %v2097_v41, %v2096_v50 }
 0x8a1   :  { %v2067_v51 = vmul.f32 0.0006377551, %v2066_v22  ;;  %v2099_v33 = vrot.slane %v2098_v60, 1 }
 0x8a3   :  { %v2100_v10 = vadd.f32 %v2099_v33, %v2098_v60  ;;  %v2068_v0 = vsub.f32 %v4036_v26, %v2067_v51  ;;  %v2069_v19 = vsub.f32 %v4041_v62, %v2067_v51 }
 0x8a5   :  { %v2101_v39 = vmul.f32 0.0006377551, %v2100_v10  ;;  %v2070_v9 = vmul.f32 %v2068_v0, %v3011_v16  ;;  %v2071_v57 = vmul.f32 %v2069_v19, %v3014_v17 }
 0x8a7   :  { %v2072_v45 = vmul.f32 %v2070_v9, %v2070_v9  ;;  %v2073_v20 = vmul.f32 %v2071_v57, %v2071_v57  ;;  %v2102_v38 = vsub.f32 %v4051_v31, %v2101_v39  ;;  %v2103_v24 = vsub.f32 %v4053_v48, %v2101_v39 }
 0x8a9   :  { %v2074_v13 = vadd.f32 %v2073_v20, %v2072_v45  ;;  %v2104_v6 = vmul.f32 %v2102_v38, %v3011_v16  ;;  %v2105_v40 = vmul.f32 %v2103_v24, %v3014_v17 }
 0x8ab   :  { %2075 = vadd.xlane.f32.xlu0 %v2074_v13  ;;  %v2106_v36 = vmul.f32 %v2104_v6, %v2104_v6  ;;  %v2107_v3 = vmul.f32 %v2105_v40, %v2105_v40 }
 0x8ad   :  { %v2108_v14 = vadd.f32 %v2107_v3, %v2106_v36  ;;  %v4303_v36 = vld [vmem:[#allocation26_spill] sm:$0xff] }
 0x8af   :  { %2109 = vadd.xlane.f32.xlu0 %v2108_v14 }
 0x938   :  { %v2076_v47 = vpop.xlane.xlu0 %2075 }
 0x939   :  { %v2077_v63 = vrot.slane %v2076_v47, 4 }
 0x93b   :  { %v2078_v7 = vadd.f32 %v2077_v63, %v2076_v47  ;;  %v155_v47 = vld [vmem:[%s4272_s13 + $0x8] sm:$0xff] }
 0x93c   :  { %v2110_v52 = vpop.xlane.xlu0 %2109 }
 0x93d   :  { %v2079_v29 = vrot.slane %v2078_v7, 2  ;;  %v2111_v35 = vrot.slane %v2110_v52, 4 }
 0x93f   :  { %v2080_v55 = vadd.f32 %v2079_v29, %v2078_v7  ;;  %v2112_v16 = vadd.f32 %v2111_v35, %v2110_v52 }
 0x941   :  { %v2081_v50 = vrot.slane %v2080_v55, 1  ;;  %v2113_v22 = vrot.slane %v2112_v16, 2 }
 0x943   :  { %v2082_v34 = vadd.f32 %v2081_v50, %v2080_v55  ;;  %v2114_v60 = vadd.f32 %v2113_v22, %v2112_v16 }
 0x945   :  { %v2083_v41 = vmul.f32 0.0006377551, %v2082_v34  ;;  %v2115_v51 = vrot.slane %v2114_v60, 1 }
 0x947   :  { %v2084_v17 = vadd.f32 1e-05, %v2083_v41  ;;  %v2116_v10 = vadd.f32 %v2115_v51, %v2114_v60 }
 0x949   :  { %2668 = vrsqrt.f32 %v2084_v17  ;;  %v2117_v20 = vmul.f32 0.0006377551, %v2116_v10 }
 0x94b   :  { %v2118_v13 = vadd.f32 1e-05, %v2117_v20 }
 0x94d   :  { %2670 = vrsqrt.f32 %v2118_v13 }
 0x953   :  { %v2669_v33 = vpop.eup %2668 }
 0x954   :  { %v2086_v0 = vmul.f32 %v2669_v33, %v3656_v2  ;;  %v2087_v19 = vmul.f32 %v2669_v33, %v3659_v30  ;;  %v4301_v30 = vld [vmem:[#allocation24_spill] sm:$0xff] }
 0x956   :  { %v2088_v39 = vmul.f32 %v2086_v0, %v2070_v9  ;;  %v2089_v45 = vmul.f32 %v2087_v19, %v2071_v57  ;;  %v4302_v9 = vld [vmem:[#allocation25_spill] sm:$0xff] }
 0x957   :  { %v2671_v2 = vpop.eup %2670 }
 0x958   :  { %v4068_v38 = vadd.f32 %v2088_v39, %v3666_v37  ;;  %v4071_v24 = vadd.f32 %v2089_v45, %v3675_v58  ;;  %v2121_v37 = vmul.f32 %v2671_v2, %v4301_v30  ;;  %v2120_v57 = vmul.f32 %v2671_v2, %v4302_v9 }
 0x95a   :  { %2131 = vrot.lane.b32.xlu1 %v4068_v38, %s2847_s28  ;;  %2127 = vrot.lane.b32.xlu0 %v4071_v24, %s2847_s28  ;;  %v2123_v58 = vmul.f32 %v2121_v37, %v2105_v40  ;;  %v2122_v14 = vmul.f32 %v2120_v57, %v2104_v6  ;;  %v4304_v40 = vld [vmem:[#allocation27_spill] sm:$0xff] }
 0x95b   :  { %v154_v6 = vld [vmem:[%s4272_s13] sm:$0xff]  ;;  %s2856_s13 = smov [#allocation11]  }
 0x95c   :  { %v4104_v3 = vadd.f32 %v2123_v58, %v4303_v36  ;;  %v4115_v32 = vadd.f32 %v2122_v14, %v4304_v40 }
 0x95e   :  { %2139 = vrot.lane.b32.xlu1 %v4071_v24, %s2848_s20  ;;  %2150 = vrot.lane.b32.xlu0 %v4071_v24, %s2849_s7 }
 0x962   :  { %2142 = vrot.lane.b32.xlu1 %v4068_v38, %s2848_s20  ;;  %2161 = vrot.lane.b32.xlu0 %v4071_v24, %s2850_s22 }
 0x966   :  { %2153 = vrot.lane.b32.xlu1 %v4068_v38, %s2849_s7  ;;  %2172 = vrot.lane.b32.xlu0 %v4068_v38, %s2851_s4 }
 0x96a   :  { %2164 = vrot.lane.b32.xlu1 %v4068_v38, %s2850_s22  ;;  %2183 = vrot.lane.b32.xlu0 %v4068_v38, %s2852_s10 }
 0x96e   :  { %2174 = vrot.lane.b32.xlu1 %v4071_v24, %s2851_s4  ;;  %2194 = vrot.lane.b32.xlu0 %v4068_v38, %s2853_s23 }
 0x972   :  { %2185 = vrot.lane.b32.xlu1 %v4071_v24, %s2852_s10  ;;  %2205 = vrot.lane.b32.xlu0 %v4068_v38, %s2854_s24 }
 0x976   :  { %2196 = vrot.lane.b32.xlu1 %v4071_v24, %s2853_s23  ;;  %2217 = vrot.lane.b32.xlu0 %v4104_v3, %s2847_s28 }
 0x97a   :  { %2207 = vrot.lane.b32.xlu1 %v4071_v24, %s2854_s24  ;;  %2229 = vrot.lane.b32.xlu0 %v4104_v3, %s2848_s20 }
 0x97e   :  { %2240 = vrot.lane.b32.xlu0 %v4104_v3, %s2849_s7  ;;  %2221 = vrot.lane.b32.xlu1 %v4115_v32, %s2847_s28 }
 0x982   :  { %2251 = vrot.lane.b32.xlu0 %v4104_v3, %s2850_s22  ;;  %2232 = vrot.lane.b32.xlu1 %v4115_v32, %s2848_s20 }
 0x986   :  { %2262 = vrot.lane.b32.xlu0 %v4115_v32, %s2851_s4  ;;  %2243 = vrot.lane.b32.xlu1 %v4115_v32, %s2849_s7  ;;  %s2398_s7 = sshll.u32 %s2856_s13, 4  ;;  %s2399_s7 = int_to_ptr.vmem [resolvable:$true] %s2398_s7 }
 0x987   :  { %p2792_p13 = scmp.lt.s32.totalorder %s2399_s7, %s2399_s7 }
 0x98a   :  { %2273 = vrot.lane.b32.xlu0 %v4115_v32, %s2852_s10  ;;  %2254 = vrot.lane.b32.xlu1 %v4115_v32, %s2850_s22  ;;  %s2857_s22 = smov [#allocation12]  }
 0x98e   :  { %2284 = vrot.lane.b32.xlu0 %v4115_v32, %s2853_s23  ;;  %2264 = vrot.lane.b32.xlu1 %v4104_v3, %s2851_s4  ;;  %s2410_s4 = sshll.u32 %s2857_s22, 4  ;;  %s2411_s4 = int_to_ptr.vmem [resolvable:$true] %s2410_s4 }
 0x992   :  { %2295 = vrot.lane.b32.xlu0 %v4115_v32, %s2854_s24  ;;  %2275 = vrot.lane.b32.xlu1 %v4104_v3, %s2852_s10  ;;  %s2787_s10 = scalar_lea.vmem %s2399_s7, 512 }
 0x993   :  { %p2788_p12 = scmp.ne.s32.totalorder %s2399_s7, %s2787_s10  ;;  %p2793_p0 = scmp.lt.s32.totalorder %s2787_s10, %s2787_s10 }
 0x995   :  { %p2794_p1 = por %p2793_p0, %p2792_p13 }
 0x996   :  { %1256 = vperm.xlu0 %2578, %v154_v6   ;;  %2286 = vrot.lane.b32.xlu1 %v4104_v3, %s2853_s23 }
 0x997   :  { %p2795_p2 = pnand %p2794_p1, %p2788_p12 }
 0x99a   :  { %2297 = vrot.lane.b32.xlu1 %v4104_v3, %s2854_s24 }
 0x99e   :  { %1261 = vperm.xlu1 %2579, %v155_v47  }
 0x9cc   :  { %v2128_v63 = vpop.permute.xlu0 %2127  ;;  %v2132_v7 = vpop.permute.xlu1 %2131 }
 0x9cd   :  { %v2133_v55 = vsel %vm985_vm4, %v2132_v7, %v2128_v63  ;;  %v2136_v35 = vsel %vm985_vm4, %v2128_v63, %v2132_v7 }
 0x9ce   :  { %v2137_v17 = vmul.f32 %v2136_v35, %v3800_v25  ;;  %v2138_v22 = vmul.f32 %v2133_v55, %v3803_v28 }
 0x9d0   :  { %v2151_v52 = vpop.permute.xlu0 %2150  ;;  %v2140_v29 = vpop.permute.xlu1 %2139 }
 0x9d4   :  { %v2162_v50 = vpop.permute.xlu0 %2161  ;;  %v2143_v34 = vpop.permute.xlu1 %2142 }
 0x9d5   :  { %v2144_v16 = vsel %vm1008_vm3, %v2143_v34, %v2140_v29  ;;  %v2147_v41 = vsel %vm1008_vm3, %v2140_v29, %v2143_v34 }
 0x9d6   :  { %v2148_v60 = vmul.f32 %v2147_v41, %v3787_v8  ;;  %v2149_v51 = vmul.f32 %v2144_v16, %v3790_v27 }
 0x9d8   :  { %v2525_v33 = vpack.c.bf16 %v2148_v60, %v2137_v17  ;;  %v2173_v10 = vpop.permute.xlu0 %2172  ;;  %v2154_v0 = vpop.permute.xlu1 %2153  ;;  %v2523_v19 = vpack.c.bf16 %v2149_v51, %v2138_v22 }
 0x9d9   :  { %v2155_v39 = vsel %vm1031_vm5, %v2154_v0, %v2151_v52  ;;  %v2158_v45 = vsel %vm1031_vm5, %v2151_v52, %v2154_v0 }
 0x9da   :  { %2524 = vmatprep.subr.bf16.mxu1 %v2523_v19  ;;  %v2159_v37 = vmul.f32 %v2158_v45, %v3812_v15  ;;  %v2160_v58 = vmul.f32 %v2155_v39, %v3815_v44 }
 0x9db   :  { %2526 = vmatpush1.bf16.msra.mxu1 %v2525_v33 }
 0x9dc   :  { %v2184_v20 = vpop.permute.xlu0 %2183  ;;  %v2165_v13 = vpop.permute.xlu1 %2164 }
 0x9dd   :  { %v2166_v2 = vsel %vm1054_vm6, %v2165_v13, %v2162_v50  ;;  %v2169_v30 = vsel %vm1054_vm6, %v2162_v50, %v2165_v13 }
 0x9de   :  { %v2170_v9 = vmul.f32 %v2169_v30, %v3825_v23  ;;  %v2171_v57 = vmul.f32 %v2166_v2, %v3828_v21 }
 0x9e0   :  { %v2529_v36 = vpack.c.bf16 %v2170_v9, %v2159_v37  ;;  %v2195_v14 = vpop.permute.xlu0 %2194  ;;  %v2175_v40 = vpop.permute.xlu1 %2174  ;;  %v2527_v6 = vpack.c.bf16 %v2171_v57, %v2160_v58 }
 0x9e1   :  { %v2176_v47 = vsel %vm1076_vm7, %v2173_v10, %v2175_v40  ;;  %v2180_v63 = vsel %vm1076_vm7, %v2175_v40, %v2173_v10 }
 0x9e2   :  { %v2181_v7 = vmul.f32 %v2176_v47, %v3840_v4  ;;  %v2182_v52 = vmul.f32 %v2180_v63, %v3866_v5  ;;  %2528 = vmatprep.subr.bf16.mxu1 %v2527_v6 }
 0x9e3   :  { %2530 = vmatpush1.bf16.msra.mxu1 %v2529_v36 }
 0x9e4   :  { %v2533_v29 = vpack.c.bf16 %v2181_v7, %v4068_v38  ;;  %v2206_v55 = vpop.permute.xlu0 %2205  ;;  %v2186_v35 = vpop.permute.xlu1 %2185  ;;  %v2531_v50 = vpack.c.bf16 %v2182_v52, %v4071_v24 }
 0x9e5   :  { %v2187_v34 = vsel %vm1099_vm8, %v2184_v20, %v2186_v35  ;;  %v2191_v16 = vsel %vm1099_vm8, %v2186_v35, %v2184_v20 }
 0x9e6   :  { %2532 = vmatprep.subr.bf16.mxu1 %v2531_v50  ;;  %v2192_v51 = vmul.f32 %v2187_v34, %v3919_v46  ;;  %v2193_v38 = vmul.f32 %v2191_v16, %v3922_v59 }
 0x9e7   :  { %2534 = vmatpush1.bf16.msra.mxu1 %v2533_v29 }
 0x9e8   :  { %v2218_v41 = vpop.permute.xlu0 %2217  ;;  %v2197_v17 = vpop.permute.xlu1 %2196 }
 0x9e9   :  { %v2198_v22 = vsel %vm1122_vm9, %v2195_v14, %v2197_v17  ;;  %v2202_v60 = vsel %vm1122_vm9, %v2197_v17, %v2195_v14 }
 0x9ea   :  { %v2203_v33 = vmul.f32 %v2198_v22, %v3925_v49  ;;  %v2204_v24 = vmul.f32 %v2202_v60, %v3928_v18 }
 0x9ec   :  { %v2537_v10 = vpack.c.bf16 %v2203_v33, %v2192_v51  ;;  %v2230_v0 = vpop.permute.xlu0 %2229  ;;  %v2208_v19 = vpop.permute.xlu1 %2207  ;;  %v2535_v39 = vpack.c.bf16 %v2204_v24, %v2193_v38 }
 0x9ed   :  { %v2209_v45 = vsel %vm1145_vm10, %v2206_v55, %v2208_v19  ;;  %v2213_v20 = vsel %vm1145_vm10, %v2208_v19, %v2206_v55 }
 0x9ee   :  { %2536 = vmatprep.subr.bf16.mxu1 %v2535_v39  ;;  %v2214_v58 = vmul.f32 %v2209_v45, %v3942_v42  ;;  %v2215_v9 = vmul.f32 %v2213_v20, %v3945_v53 }
 0x9ef   :  { %2538 = vmatpush1.bf16.msra.mxu1 %v2537_v10 }
 0x9f0   :  { %v2241_v13 = vpop.permute.xlu0 %2240  ;;  %v2222_v2 = vpop.permute.xlu1 %2221 }
 0x9f1   :  { %v2223_v30 = vsel %vm985_vm4, %v2222_v2, %v2218_v41  ;;  %v2226_v37 = vsel %vm985_vm4, %v2218_v41, %v2222_v2 }
 0x9f2   :  { %v2227_v57 = vmul.f32 %v2226_v37, %v3800_v25  ;;  %v2228_v36 = vmul.f32 %v2223_v30, %v3803_v28 }
 0x9f4   :  { %v2541_v14 = vpack.c.bf16 %v2227_v57, %v2214_v58  ;;  %v2252_v40 = vpop.permute.xlu0 %2251  ;;  %v2233_v6 = vpop.permute.xlu1 %2232  ;;  %v2539_v47 = vpack.c.bf16 %v2228_v36, %v2215_v9 }
 0x9f5   :  { %v2234_v63 = vsel %vm1008_vm3, %v2233_v6, %v2230_v0  ;;  %v2237_v7 = vsel %vm1008_vm3, %v2230_v0, %v2233_v6 }
 0x9f6   :  { %2540 = vmatprep.subr.bf16.mxu1 %v2539_v47  ;;  %v2238_v35 = vmul.f32 %v2237_v7, %v3787_v8  ;;  %v2239_v25 = vmul.f32 %v2234_v63, %v3790_v27  ;;  %v4306_v63 = vld [vmem:[#allocation21_spill] sm:$0xff] }
 0x9f7   :  { %2542 = vmatpush1.bf16.msra.mxu1 %v2541_v14 }
 0x9f8   :  { %v2244_v52 = vpop.permute.xlu1 %2243  ;;  %v2263_v28 = vpop.permute.xlu0 %2262 }
 0x9f9   :  { %v2245_v29 = vsel %vm1031_vm5, %v2244_v52, %v2241_v13  ;;  %v2248_v55 = vsel %vm1031_vm5, %v2241_v13, %v2244_v52  ;;  %v4307_v52 = vld [vmem:[#allocation22_spill] sm:$0xff] }
 0x9fa   :  { %v2249_v50 = vmul.f32 %v2248_v55, %v3812_v15  ;;  %v2250_v34 = vmul.f32 %v2245_v29, %v3815_v44  ;;  %v4308_v29 = vld [vmem:[#allocation23_spill] sm:$0xff] }
 0x9fc   :  { %v2545_v16 = vpack.c.bf16 %v2249_v50, %v2238_v35  ;;  %v2255_v41 = vpop.permute.xlu1 %2254  ;;  %v2543_v17 = vpack.c.bf16 %v2250_v34, %v2239_v25  ;;  %v2274_v8 = vpop.permute.xlu0 %2273 }
 0x9fd   :  { %v2256_v22 = vsel %vm1054_vm6, %v2255_v41, %v2252_v40  ;;  %v2259_v60 = vsel %vm1054_vm6, %v2252_v40, %v2255_v41 }
 0x9fe   :  { %v2260_v51 = vmul.f32 %v2259_v60, %v3825_v23  ;;  %v2261_v38 = vmul.f32 %v2256_v22, %v3828_v21  ;;  %2544 = vmatprep.subr.bf16.mxu1 %v2543_v17 }
 0x9ff   :  { %2546 = vmatpush1.bf16.msra.mxu1 %v2545_v16 }
 0xa00   :  { %v2549_v27 = vpack.c.bf16 %v4115_v32, %v2260_v51  ;;  %v2265_v33 = vpop.permute.xlu1 %2264  ;;  %v2547_v15 = vpack.c.bf16 %v4104_v3, %v2261_v38  ;;  %v2285_v21 = vpop.permute.xlu0 %2284 }
 0xa01   :  { %v2266_v44 = vsel %vm1076_vm7, %v2263_v28, %v2265_v33  ;;  %v2270_v24 = vsel %vm1076_vm7, %v2265_v33, %v2263_v28 }
 0xa02   :  { %2548 = vmatprep.subr.bf16.mxu1 %v2547_v15  ;;  %v2271_v19 = vmul.f32 %v2266_v44, %v3840_v4  ;;  %v2272_v39 = vmul.f32 %v2270_v24, %v3866_v5 }
 0xa03   :  { %2550 = vmatpush1.bf16.msra.mxu1 %v2549_v27 }
 0xa04   :  { %v2276_v10 = vpop.permute.xlu1 %2275  ;;  %v2296_v37 = vpop.permute.xlu0 %2295 }
 0xa05   :  { %v2277_v0 = vsel %vm1099_vm8, %v2274_v8, %v2276_v10  ;;  %v2281_v23 = vsel %vm1099_vm8, %v2276_v10, %v2274_v8 }
 0xa06   :  { %v2282_v32 = vmul.f32 %v2277_v0, %v3919_v46  ;;  %v2283_v3 = vmul.f32 %v2281_v23, %v3922_v59 }
 0xa08   :  { %v2553_v45 = vpack.c.bf16 %v2282_v32, %v2271_v19  ;;  %v2287_v20 = vpop.permute.xlu1 %2286  ;;  %v2551_v13 = vpack.c.bf16 %v2283_v3, %v2272_v39 }
 0xa09   :  { %v2288_v2 = vsel %vm1122_vm9, %v2285_v21, %v2287_v20  ;;  %v2292_v30 = vsel %vm1122_vm9, %v2287_v20, %v2285_v21 }
 0xa0a   :  { %2552 = vmatprep.subr.bf16.mxu1 %v2551_v13  ;;  %v2293_v5 = vmul.f32 %v2288_v2, %v3925_v49  ;;  %v2294_v46 = vmul.f32 %v2292_v30, %v3928_v18  ;;  %v4305_v49 = vld [vmem:[#allocation20_spill] sm:$0xff] }
 0xa0b   :  { %2554 = vmatpush1.bf16.msra.mxu1 %v2553_v45 }
 0xa0c   :  { %v2298_v58 = vpop.permute.xlu1 %2297 }
 0xa0d   :  { %v2299_v9 = vsel %vm1145_vm10, %v2296_v37, %v2298_v58  ;;  %v2303_v4 = vsel %vm1145_vm10, %v2298_v58, %v2296_v37 }
 0xa0e   :  { %v2304_v59 = vmul.f32 %v2299_v9, %v3942_v42  ;;  %v2305_v57 = vmul.f32 %v2303_v4, %v3945_v53 }
 0xa10   :  { %v2557_v36 = vpack.c.bf16 %v2304_v59, %v2293_v5  ;;  %v2555_v14 = vpack.c.bf16 %v2305_v57, %v2294_v46 }
 0xa12   :  { %2556 = vmatprep.subr.bf16.mxu1 %v2555_v14 }
 0xa13   :  { %2558 = vmatpush1.bf16.msra.mxu1 %v2557_v36 }
 0xa15   :  { %v1257_v40 = vpop.permute.xlu0 %1256 }
 0xa16   :  { %v1337_v6 = vadd.f32 %v4025_v54, %v1257_v40  ;;  %v1339_v47 = vadd.f32 %v4027_v56, %v1257_v40  ;;  %2371 = vmatmul.mubr.f32.vlgmr.msra.gmra.mrb[12].mxu1 %v3988_v11 }
 0xa17   :  { %2470 = vmatprep.mubr.msk.f32.mxu1 %vm760_vm2, %v3996_v1 }
 0xa18   :  { %v1347_v18 = vadd.f32 %v1337_v6, %v4305_v49  ;;  %v1348_v42 = vadd.f32 %v1339_v47, %v4306_v63 }
 0xa1a   :  { %1349 = vst [vmem:[#allocation11] sm:$0xff] %v1347_v18  ;;  %1350 = vst [vmem:[#allocation11 + $0x8] sm:$0xff] %v1348_v42  ;;  %2377 = vmatmul.mubr.f32.gmra.mrb[14].mxu1 %v4007_v12 }
 0xa1d   :  { %v1262_v53 = vpop.permute.xlu1 %1261 }
 0xa1e   :  { %v1343_v7 = vadd.f32 %v4029_v61, %v1262_v53  ;;  %v1345_v54 = vadd.f32 %v4031_v43, %v1262_v53 }
 0xa20   :  { %v1351_v56 = vadd.f32 %v1343_v7, %v4307_v52  ;;  %v1352_v11 = vadd.f32 %v1345_v54, %v4308_v29 }
 0xa22   :  { %1353 = vst [vmem:[#allocation12] sm:$0xff] %v1351_v56  ;;  %1354 = vst [vmem:[#allocation12 + $0x8] sm:$0xff] %v1352_v11 }
 0xae9   :  { %v2372_v1 = vpop.f32.mrb[12].mxu1 }
 0xaea   :  { %v2373_v55 = vadd.f32 %v2372_v1, %v1257_v40  ;;  %v2374_v35 = vpop.f32.mrb[13].mxu1 }
 0xaeb   :  { %v2375_v25 = vadd.f32 %v2374_v35, %v1257_v40 }
 0xaec   :  { %v2383_v28 = vadd.f32 %v2373_v55, %v4036_v26 }
 0xaed   :  { %v2384_v12 = vadd.f32 %v2375_v25, %v4041_v62  ;;  %v2378_v50 = vpop.f32.mrb[14].mxu1 }
 0xaee   :  { %2386 = vst [vmem:[#allocation11 + $0x10] sm:$0xff] %v2383_v28  ;;  %v2379_v61 = vadd.f32 %v2378_v50, %v1262_v53  ;;  %v2380_v43 = vpop.f32.mrb[15].mxu1 }
 0xaef   :  { %2387 = vst [vmem:[#allocation11 + $0x18] sm:$0xff] %v2384_v12  ;;  %v2381_v34 = vadd.f32 %v2380_v43, %v1262_v53 }
 0xaf0   :  { %v2388_v16 = vadd.f32 %v2379_v61, %v4051_v31 }
 0xaf1   :  { %2798 = shalt.err (!%p2795_p2)
}
 0xaf2   :  { %s2799_s21 = scalar_lea.hbm %s4273_s14, 512 }
 0xaf3   :  { %p2800_p3 = scmp.ne.s32.totalorder %s4273_s14, %s2799_s21  ;;  %p2803_p4 = scmp.lt.u32.totalorder %s2799_s21, %s4273_s14 }
 0xaf5   :  { %p2805_p5 = pnand %p2803_p4, %p2800_p3 }
 0xaf7   :  { %2808 = shalt.err (!%p2805_p5)
}
 0xaf8   :  { %s2858_s19 = smov 256   ;;  %s2859_s6 = smov 16   ;;  %v2389_v26 = vadd.f32 %v2381_v34, %v4053_v48  ;;  %2391 = vst [vmem:[#allocation12 + $0x10] sm:$0xff] %v2388_v16 }
 0xaf9   :  { %2404 = dma.vmem_to_hbm [thread:$0]  %s2399_s7, 512, %s4273_s14, [#allocation4], %s2858_s19, %s2858_s19, %s2859_s6  }
 0xafa   :  { %2392 = vst [vmem:[#allocation12 + $0x18] sm:$0xff] %v2389_v26  ;;  %s2809_s29 = scalar_lea.vmem %s2411_s4, 512  ;;  %p2814_p7 = scmp.lt.s32.totalorder %s2411_s4, %s2411_s4 }
 0xafb   :  { %p2810_p6 = scmp.ne.s32.totalorder %s2411_s4, %s2809_s29  ;;  %p2815_p8 = scmp.lt.s32.totalorder %s2809_s29, %s2809_s29 }
 0xafd   :  { %p2816_p9 = por %p2815_p8, %p2814_p7 }
 0xaff   :  { %p2817_p10 = pnand %p2816_p9, %p2810_p6 }
 0xb01   :  { %2820 = shalt.err (!%p2817_p10)
}
 0xb02   :  { %s2821_s16 = scalar_lea.hbm %s4274_s15, 512 }
 0xb03   :  { %p2822_p11 = scmp.ne.s32.totalorder %s4274_s15, %s2821_s16  ;;  %p2825_p12 = scmp.lt.u32.totalorder %s2821_s16, %s4274_s15 }
 0xb05   :  { %p2827_p13 = pnand %p2825_p12, %p2822_p11 }
 0xb07   :  { %2830 = shalt.err (!%p2827_p13)
}
 0xb08   :  { %2416 = dma.vmem_to_hbm [thread:$0]  %s2411_s4, 512, %s4274_s15, [#allocation13], %s2858_s19, %s2858_s19, %s2859_s6  }
 0xb09   :  { %2837 = dma.done.wait [#allocation4], 512  }
 0xb0a   :  { %2838 = vsyncadd [#allocation4], 4294966784 }
 0xb0b   :  { %2839 = dma.done.wait [#allocation13], 512  }
 0xb0c   :  { %2840 = vsyncadd [#allocation13], 4294966784 }
 0xb0d   :  { %2423 = vsyncpa [#allocation3], 1 }
 0xb0e   :  { %2424 = vsyncpa [#allocation6], 1 }
 0xb0f   :  { %2425 = vsyncpa [#allocation9], 1 }
 0xb10   :  { %2426 = vsyncpa [#allocation4], 1 }
 0xb11   :  { %2427 = vsyncpa [#allocation13], 1 }

</bundles_post_ra>
